<compile_context>
chip_gen: v7x
topology: tpu7x:2x2x1
jax: 0.10.0
libtpu: 0.0.40
codegen_flags: <defaults>
</compile_context>

<pallas_src>
import functools

import jax
import jax.numpy as jnp
from jax.experimental import pallas as pl
from jax.experimental.pallas import tpu as pltpu

# Model constants (match the PyTorch module).
PAD = 2            # conv temporal padding
K = 5              # conv kernel size
C1 = 128           # conv1 out channels / SE channels
C2 = 256           # conv2 out channels / d_model
DFF = 512          # transformer feed-forward width
NHEAD = 4
DH = C2 // NHEAD
EMB = 192
EMB_PAD = 256      # lane-padded embedding width (sliced back to EMB)
ALIGN = 8          # aligned sublane offset for the in-kernel conv2 halo


def _layernorm(x, gamma, beta, eps=1e-5):
    mu = jnp.mean(x, axis=-1, keepdims=True)
    var = jnp.mean((x - mu) ** 2, axis=-1, keepdims=True)
    return (x - mu) * jax.lax.rsqrt(var + eps) * gamma + beta


# ----------------------------------------------------------------------------
# Fused kernel: conv1+BN+ReLU -> SE -> conv2+BN+ReLU -> Transformer -> pool+FC
# Processes `Bb` sequences per grid step (M = Bb*T matmul rows).
# ----------------------------------------------------------------------------
def titanet_kernel(
        x_ref,                      # (Bb, T+2*PAD, 128) bf16  time+channel padded
        c1w_ref, c1b_ref,           # (K*128, 128) bf16, (1, 128) f32   (BN folded)
        sw1_ref, sb1_ref,           # (128, 128) bf16, (1, 128) f32     (SE fc1, padded)
        sw2_ref, sb2_ref,           # (128, 128) bf16, (1, 128) f32     (SE fc2, padded)
        c2w_ref, c2b_ref,           # (K*128, 256) bf16, (1, 256) f32   (BN folded)
        wqkv_ref, bqkv_ref,         # (256, 768) bf16, (1, 768) f32
        wo_ref, bo_ref,             # (256, 256) bf16, (1, 256) f32
        l1g_ref, l1b_ref,           # (1, 256) f32
        w1_ref, b1_ref,             # (256, 512) bf16, (1, 512) f32
        w2_ref, b2_ref,             # (512, 256) bf16, (1, 256) f32
        l2g_ref, l2b_ref,           # (1, 256) f32
        we_ref, be_ref,             # (256, 256) bf16, (1, 256) f32     (E padded)
        o_ref,                      # (Bb, 1, 256) f32
        hpad_ref,                   # VMEM (Bb, T+2*ALIGN, 128) bf16 (conv2 halo)
        *, T, Bb):
    bf16 = jnp.bfloat16
    M = Bb * T

    # ---- conv1 (k=5, pad=2) + folded BN + ReLU : one im2col matmul ----------
    xp = x_ref[...]                                            # (Bb, T+4, 128) bf16
    cols1 = jnp.concatenate([xp[:, k:k + T, :] for k in range(K)], axis=-1)
    cols1 = cols1.reshape(M, K * C1)                           # (M, 640) bf16
    h1 = jnp.dot(cols1, c1w_ref[...],
                 preferred_element_type=jnp.float32) + c1b_ref[...]
    h1 = jnp.maximum(h1, 0.0)                                  # (M, 128) f32

    # ---- Squeeze-Excite (per sequence) --------------------------------------
    y = jnp.mean(h1.reshape(Bb, T, C1), axis=1)                # (Bb, 128)
    z = jnp.dot(y.astype(bf16), sw1_ref[...],
                preferred_element_type=jnp.float32) + sb1_ref[...]
    z = jnp.maximum(z, 0.0)
    s = jnp.dot(z.astype(bf16), sw2_ref[...],
                preferred_element_type=jnp.float32) + sb2_ref[...]
    gate = 1.0 / (1.0 + jnp.exp(-s))                           # exact sigmoid
    h1 = (h1.reshape(Bb, T, C1) * gate[:, None, :]).astype(bf16)   # (Bb, T, 128)

    # ---- conv2 halo in bf16 VMEM scratch (zero edges only, aligned rows) ----
    hpad_ref[:, 0:ALIGN, :] = jnp.zeros((Bb, ALIGN, C1), bf16)
    hpad_ref[:, ALIGN + T:, :] = jnp.zeros((Bb, ALIGN, C1), bf16)
    hpad_ref[:, ALIGN:ALIGN + T, :] = h1
    hp = hpad_ref[...]                                         # (Bb, T+16, 128) bf16
    base = ALIGN - PAD
    cols2 = jnp.concatenate(
        [hp[:, base + k:base + k + T, :] for k in range(K)], axis=-1)
    cols2 = cols2.reshape(M, K * C1)                           # (M, 640) bf16
    h2 = jnp.dot(cols2, c2w_ref[...],
                 preferred_element_type=jnp.float32) + c2b_ref[...]
    h2 = jnp.maximum(h2, 0.0)                                  # (M, 256) f32

    # ---- TransformerEncoderLayer (post-norm, ReLU FFN, eval dropout) --------
    qkv = jnp.dot(h2.astype(bf16), wqkv_ref[...],
                  preferred_element_type=jnp.float32) + bqkv_ref[...]
    scale = 1.0 / (DH ** 0.5)
    # TODO(synk): for long T, switch to flash-style KV-tiled online softmax to
    #             bound the O(T^2) score/exp temporaries (v7x has 64 MiB VMEM).
    ctx_rows = []
    for s_i in range(Bb):                                      # static seq loop
        q_s = qkv[s_i * T:(s_i + 1) * T, 0:C2]
        k_s = qkv[s_i * T:(s_i + 1) * T, C2:2 * C2]
        v_s = qkv[s_i * T:(s_i + 1) * T, 2 * C2:3 * C2]
        heads = []
        for hd in range(NHEAD):                                # static head loop
            qh = (q_s[:, hd * DH:(hd + 1) * DH] * scale).astype(bf16)
            kh = k_s[:, hd * DH:(hd + 1) * DH].astype(bf16)
            vh = v_s[:, hd * DH:(hd + 1) * DH].astype(bf16)
            sc = jax.lax.dot_general(qh, kh, (((1,), (1,)), ((), ())),
                                     preferred_element_type=jnp.float32)  # (T, T)
            sc = sc - jnp.max(sc, axis=-1, keepdims=True)
            e = jnp.exp(sc)
            prob = e / jnp.sum(e, axis=-1, keepdims=True)
            heads.append(jnp.dot(prob.astype(bf16), vh,
                                 preferred_element_type=jnp.float32))      # (T, DH)
        ctx_rows.append(jnp.concatenate(heads, axis=-1))       # (T, 256) lane-dense
    ctx = jnp.concatenate(ctx_rows, axis=0).astype(bf16)       # (M, 256)
    # single full-contraction Wo projection (K=256 fills the MXU)
    attn = jnp.dot(ctx, wo_ref[...],
                   preferred_element_type=jnp.float32) + bo_ref[...]

    x1 = _layernorm(h2 + attn, l1g_ref[...], l1b_ref[...])
    hdn = jnp.dot(x1.astype(bf16), w1_ref[...],
                  preferred_element_type=jnp.float32) + b1_ref[...]
    hdn = jnp.maximum(hdn, 0.0)
    ff = jnp.dot(hdn.astype(bf16), w2_ref[...],
                 preferred_element_type=jnp.float32) + b2_ref[...]
    x2 = _layernorm(x1 + ff, l2g_ref[...], l2b_ref[...])       # (M, 256)

    # ---- AdaptiveAvgPool1d(1) over time + embedding Linear ------------------
    m = jnp.mean(x2.reshape(Bb, T, C2), axis=1)                # (Bb, 256)
    emb = jnp.dot(m.astype(bf16), we_ref[...],
                  preferred_element_type=jnp.float32) + be_ref[...]
    o_ref[...] = emb[:, None, :]                               # (Bb, 1, 256)


def _full_spec(shape):
    return pl.BlockSpec(shape, lambda b: (0,) * len(shape))


# ----------------------------------------------------------------------------
# Wrapper: single fused pallas_call, batch-blocked grid
# ----------------------------------------------------------------------------
def titanet_forward(x, p, *, embedding_dim=EMB, block_b=None):
    B, T, F = x.shape
    Tp = T + 2 * PAD

    if block_b is None:
        # Pack >= 128 rows into the MXU M dimension when the batch allows it,
        # but keep the (parallel) grid length >= 2 so v7x's two TensorCores
        # both get work.
        block_b = min(B, max(1, pl.cdiv(128, T)))
        if B >= 2 and B // block_b < 2:
            block_b = max(1, B // 2)
    while B % block_b:
        block_b -= 1
    grid_b = B // block_b

    # pad mel features to a full 128 lanes, add the conv1 time halo, cast bf16
    xpad = jnp.pad(x, ((0, 0), (PAD, PAD), (0, C1 - F))).astype(jnp.bfloat16)

    weight_args = [
        p["c1w"], p["c1b"], p["sw1"], p["sb1"], p["sw2"], p["sb2"],
        p["c2w"], p["c2b"], p["wqkv"], p["bqkv"], p["wo"], p["bo"],
        p["l1g"], p["l1b"], p["w1"], p["b1"], p["w2"], p["b2"],
        p["l2g"], p["l2b"], p["we"], p["be"],
    ]
    in_specs = [pl.BlockSpec((block_b, Tp, C1), lambda b: (b, 0, 0))]
    in_specs += [_full_spec(w.shape) for w in weight_args]

    # advisory cost estimate for XLA's surrounding schedule
    flops_b = (2 * T * (K * C1) * C1 + 2 * T * (K * C1) * C2      # convs
               + 2 * (2 * C1 * C1)                                 # SE
               + 2 * T * C2 * (3 * C2) + 2 * T * C2 * C2           # qkv + Wo
               + NHEAD * (2 * T * T * DH * 2)                      # scores + ctx
               + 2 * T * C2 * DFF * 2                              # FFN
               + 2 * C2 * EMB_PAD)                                 # embedding
    weight_bytes = sum(int(w.size) * w.dtype.itemsize for w in weight_args)
    cost = pl.CostEstimate(
        flops=B * flops_b,
        transcendentals=B * (NHEAD * T * T + 2 * T + C1),
        bytes_accessed=int(xpad.size * 2 + B * EMB_PAD * 4 + weight_bytes),
    )

    out = pl.pallas_call(
        functools.partial(titanet_kernel, T=T, Bb=block_b),
        out_shape=jax.ShapeDtypeStruct((B, 1, EMB_PAD), jnp.float32),
        grid=(grid_b,),
        in_specs=in_specs,
        out_specs=pl.BlockSpec((block_b, 1, EMB_PAD), lambda b: (b, 0, 0)),
        scratch_shapes=[
            pltpu.VMEM((block_b, T + 2 * ALIGN, C1), jnp.bfloat16),  # conv2 halo
        ],
        compiler_params=pltpu.CompilerParams(
            dimension_semantics=("parallel",),
            # 32 MiB is ample for short T; raise on v6e / KV-tile on v7x for
            # long sequences (see TODO in the attention block).
            vmem_limit_bytes=32 * 1024 * 1024,
        ),
        cost_estimate=cost,
    )(xpad, *weight_args)
    return out[:, 0, :embedding_dim]


# ----------------------------------------------------------------------------
# Parameter init (deterministic; matches PyTorch module shapes, pre-transposed
# to (in, out), BN folded, MXU operands cast to bf16)
# ----------------------------------------------------------------------------
def init_params(key, input_dim=80, embedding_dim=EMB):
    ks = list(jax.random.split(key, 32))

    def rnd(shape, scale=0.05):
        return (scale * jax.random.normal(ks.pop(), shape)).astype(jnp.float32)

    eps = 1e-5
    p = {}

    def fold_conv(w_oik, bias, gamma, beta, cin_pad):
        # PyTorch Conv1d weight (Cout, Cin, K) + eval BN with running_mean=0,
        # running_var=1 (fresh model).
        # TODO(synk): for trained checkpoints fold real running stats
        #             (scale = gamma/sqrt(var+eps), shift -= mean*scale).
        cout, cin, k = w_oik.shape
        scale = gamma / jnp.sqrt(1.0 + eps)
        w_kio = jnp.transpose(w_oik, (2, 1, 0)) * scale[None, None, :]
        w_kio = jnp.pad(w_kio, ((0, 0), (0, cin_pad - cin), (0, 0)))
        w_flat = w_kio.reshape(k * cin_pad, cout).astype(jnp.bfloat16)
        shift = (beta + bias * scale).reshape(1, cout)
        return w_flat, shift

    # conv1 + BN1
    p["c1w"], p["c1b"] = fold_conv(rnd((C1, input_dim, K)), rnd((C1,)),
                                   1.0 + rnd((C1,)), rnd((C1,)), C1)
    # SEBlock(128, reduction=16): Linear(128->8), Linear(8->128); hidden padded 8->128
    r = C1 // 16
    se_w1, se_b1 = rnd((r, C1)), rnd((r,))
    se_w2, se_b2 = rnd((C1, r)), rnd((C1,))
    p["sw1"] = jnp.pad(se_w1.T, ((0, 0), (0, C1 - r))).astype(jnp.bfloat16)
    p["sb1"] = jnp.pad(se_b1, (0, C1 - r)).reshape(1, C1)
    p["sw2"] = jnp.pad(se_w2.T, ((0, C1 - r), (0, 0))).astype(jnp.bfloat16)
    p["sb2"] = se_b2.reshape(1, C1)
    # conv2 + BN2
    p["c2w"], p["c2b"] = fold_conv(rnd((C2, C1, K)), rnd((C2,)),
                                   1.0 + rnd((C2,)), rnd((C2,)), C1)
    # TransformerEncoderLayer(d_model=256, nhead=4, ff=512)
    p["wqkv"] = rnd((3 * C2, C2)).T.astype(jnp.bfloat16)
    p["bqkv"] = rnd((3 * C2,)).reshape(1, 3 * C2)
    p["wo"] = rnd((C2, C2)).T.astype(jnp.bfloat16)
    p["bo"] = rnd((C2,)).reshape(1, C2)
    p["w1"] = rnd((DFF, C2)).T.astype(jnp.bfloat16)
    p["b1"] = rnd((DFF,)).reshape(1, DFF)
    p["w2"] = rnd((C2, DFF)).T.astype(jnp.bfloat16)
    p["b2"] = rnd((C2,)).reshape(1, C2)
    p["l1g"] = (1.0 + rnd((C2,))).reshape(1, C2)
    p["l1b"] = rnd((C2,)).reshape(1, C2)
    p["l2g"] = (1.0 + rnd((C2,))).reshape(1, C2)
    p["l2b"] = rnd((C2,)).reshape(1, C2)
    # final embedding Linear(256 -> 192), zero-padded to 256 output lanes
    emb_w, emb_b = rnd((embedding_dim, C2)), rnd((embedding_dim,))
    p["we"] = jnp.pad(emb_w.T, ((0, 0), (0, EMB_PAD - embedding_dim))).astype(jnp.bfloat16)
    p["be"] = jnp.pad(emb_b, (0, EMB_PAD - embedding_dim)).reshape(1, EMB_PAD)
    return p


if __name__ == "__main__":
    key = jax.random.PRNGKey(0)
    kx, kp = jax.random.split(key)
    B, T, F = 2, 16, 80                      # batch, time_steps, mel_features
    x = jax.random.normal(kx, (B, T, F), dtype=jnp.float32)
    params = init_params(kp, input_dim=F, embedding_dim=192)

    out = jax.jit(titanet_forward)(x, params)
    out = jax.block_until_ready(out)

    assert out.shape == (B, 192), out.shape
    assert bool(jnp.all(jnp.isfinite(out)))
    print("KERNEL_OK")
</pallas_src>

<mosaic_0001>
module attributes {stable_mosaic.version = 11 : i64} {
  func.func @titanet_kernel(%arg0: i32, %arg1: memref<1x20x128xbf16, #tpu.memory_space<vmem>>, %arg2: memref<640x128xbf16, #tpu.memory_space<vmem>>, %arg3: memref<1x128xf32, #tpu.memory_space<vmem>>, %arg4: memref<128x128xbf16, #tpu.memory_space<vmem>>, %arg5: memref<1x128xf32, #tpu.memory_space<vmem>>, %arg6: memref<128x128xbf16, #tpu.memory_space<vmem>>, %arg7: memref<1x128xf32, #tpu.memory_space<vmem>>, %arg8: memref<640x256xbf16, #tpu.memory_space<vmem>>, %arg9: memref<1x256xf32, #tpu.memory_space<vmem>>, %arg10: memref<256x768xbf16, #tpu.memory_space<vmem>>, %arg11: memref<1x768xf32, #tpu.memory_space<vmem>>, %arg12: memref<256x256xbf16, #tpu.memory_space<vmem>>, %arg13: memref<1x256xf32, #tpu.memory_space<vmem>>, %arg14: memref<1x256xf32, #tpu.memory_space<vmem>>, %arg15: memref<1x256xf32, #tpu.memory_space<vmem>>, %arg16: memref<256x512xbf16, #tpu.memory_space<vmem>>, %arg17: memref<1x512xf32, #tpu.memory_space<vmem>>, %arg18: memref<512x256xbf16, #tpu.memory_space<vmem>>, %arg19: memref<1x256xf32, #tpu.memory_space<vmem>>, %arg20: memref<1x256xf32, #tpu.memory_space<vmem>>, %arg21: memref<1x256xf32, #tpu.memory_space<vmem>>, %arg22: memref<256x256xbf16, #tpu.memory_space<vmem>>, %arg23: memref<1x256xf32, #tpu.memory_space<vmem>>, %arg24: memref<1x1x256xf32, #tpu.memory_space<vmem>>, %arg25: memref<1x32x128xbf16, #tpu.memory_space<vmem>>) attributes {dimension_semantics = [#tpu.dimension_semantics<parallel>], iteration_bounds = array<i64: 2>, scalar_prefetch = 0 : i64, scratch_operands = 1 : i64, tpu.core_type = #tpu.core_type<tc>, window_params = [{transform_indices = @transform_0, window_bounds = array<i64: 1, 20, 128>}, {pipeline_mode = #tpu.pipeline_mode<synchronous>, transform_indices = @transform_1, window_bounds = array<i64: 640, 128>}, {pipeline_mode = #tpu.pipeline_mode<synchronous>, transform_indices = @transform_2, window_bounds = array<i64: 1, 128>}, {pipeline_mode = #tpu.pipeline_mode<synchronous>, transform_indices = @transform_3, window_bounds = array<i64: 128, 128>}, {pipeline_mode = #tpu.pipeline_mode<synchronous>, transform_indices = @transform_4, window_bounds = array<i64: 1, 128>}, {pipeline_mode = #tpu.pipeline_mode<synchronous>, transform_indices = @transform_5, window_bounds = array<i64: 128, 128>}, {pipeline_mode = #tpu.pipeline_mode<synchronous>, transform_indices = @transform_6, window_bounds = array<i64: 1, 128>}, {pipeline_mode = #tpu.pipeline_mode<synchronous>, transform_indices = @transform_7, window_bounds = array<i64: 640, 256>}, {pipeline_mode = #tpu.pipeline_mode<synchronous>, transform_indices = @transform_8, window_bounds = array<i64: 1, 256>}, {pipeline_mode = #tpu.pipeline_mode<synchronous>, transform_indices = @transform_9, window_bounds = array<i64: 256, 768>}, {pipeline_mode = #tpu.pipeline_mode<synchronous>, transform_indices = @transform_10, window_bounds = array<i64: 1, 768>}, {pipeline_mode = #tpu.pipeline_mode<synchronous>, transform_indices = @transform_11, window_bounds = array<i64: 256, 256>}, {pipeline_mode = #tpu.pipeline_mode<synchronous>, transform_indices = @transform_12, window_bounds = array<i64: 1, 256>}, {pipeline_mode = #tpu.pipeline_mode<synchronous>, transform_indices = @transform_13, window_bounds = array<i64: 1, 256>}, {pipeline_mode = #tpu.pipeline_mode<synchronous>, transform_indices = @transform_14, window_bounds = array<i64: 1, 256>}, {pipeline_mode = #tpu.pipeline_mode<synchronous>, transform_indices = @transform_15, window_bounds = array<i64: 256, 512>}, {pipeline_mode = #tpu.pipeline_mode<synchronous>, transform_indices = @transform_16, window_bounds = array<i64: 1, 512>}, {pipeline_mode = #tpu.pipeline_mode<synchronous>, transform_indices = @transform_17, window_bounds = array<i64: 512, 256>}, {pipeline_mode = #tpu.pipeline_mode<synchronous>, transform_indices = @transform_18, window_bounds = array<i64: 1, 256>}, {pipeline_mode = #tpu.pipeline_mode<synchronous>, transform_indices = @transform_19, window_bounds = array<i64: 1, 256>}, {pipeline_mode = #tpu.pipeline_mode<synchronous>, transform_indices = @transform_20, window_bounds = array<i64: 1, 256>}, {pipeline_mode = #tpu.pipeline_mode<synchronous>, transform_indices = @transform_21, window_bounds = array<i64: 256, 256>}, {pipeline_mode = #tpu.pipeline_mode<synchronous>, transform_indices = @transform_22, window_bounds = array<i64: 1, 256>}, {transform_indices = @transform_23, window_bounds = array<i64: 1, 1, 256>}]} {
    %c0 = arith.constant 0 : index
    %c0_0 = arith.constant 0 : index
    %c0_1 = arith.constant 0 : index
    %0 = vector.load %arg1[%c0, %c0_0, %c0_1] : memref<1x20x128xbf16, #tpu.memory_space<vmem>>, vector<1x20x128xbf16>
    %1 = vector.extract_strided_slice %0 {offsets = [0, 0, 0], sizes = [1, 16, 128], strides = [1, 1, 1]} : vector<1x20x128xbf16> to vector<1x16x128xbf16>
    %2 = vector.extract_strided_slice %0 {offsets = [0, 1, 0], sizes = [1, 16, 128], strides = [1, 1, 1]} : vector<1x20x128xbf16> to vector<1x16x128xbf16>
    %3 = vector.extract_strided_slice %0 {offsets = [0, 2, 0], sizes = [1, 16, 128], strides = [1, 1, 1]} : vector<1x20x128xbf16> to vector<1x16x128xbf16>
    %4 = vector.extract_strided_slice %0 {offsets = [0, 3, 0], sizes = [1, 16, 128], strides = [1, 1, 1]} : vector<1x20x128xbf16> to vector<1x16x128xbf16>
    %5 = vector.extract_strided_slice %0 {offsets = [0, 4, 0], sizes = [1, 16, 128], strides = [1, 1, 1]} : vector<1x20x128xbf16> to vector<1x16x128xbf16>
    %6 = tpu.concatenate %1, %2, %3, %4, %5 in 2 : vector<1x16x128xbf16>, vector<1x16x128xbf16>, vector<1x16x128xbf16>, vector<1x16x128xbf16>, vector<1x16x128xbf16> -> vector<1x16x640xbf16>
    %7 = vector.shape_cast %6 : vector<1x16x640xbf16> to vector<16x640xbf16>
    %c0_2 = arith.constant 0 : index
    %c0_3 = arith.constant 0 : index
    %8 = vector.load %arg2[%c0_2, %c0_3] : memref<640x128xbf16, #tpu.memory_space<vmem>>, vector<640x128xbf16>
    %cst = arith.constant dense<0.000000e+00> : vector<16x128xf32>
    %9 = tpu.matmul %7, %8, %cst {dimension_numbers = #tpu.dot_dimension_numbers<[1], [0], [0], [1], [0, 0, 1, 1], [], []>} : vector<16x640xbf16>, vector<640x128xbf16>, vector<16x128xf32> -> vector<16x128xf32>
    %c0_4 = arith.constant 0 : index
    %c0_5 = arith.constant 0 : index
    %10 = vector.load %arg3[%c0_4, %c0_5] : memref<1x128xf32, #tpu.memory_space<vmem>>, vector<1x128xf32>
    %11 = vector.broadcast %10 : vector<1x128xf32> to vector<16x128xf32>
    %12 = arith.addf %9, %11 : vector<16x128xf32>
    %cst_6 = arith.constant 0.000000e+00 : f32
    %13 = vector.broadcast %cst_6 : f32 to vector<16x128xf32>
    %14 = arith.maximumf %12, %13 : vector<16x128xf32>
    %15 = vector.shape_cast %14 : vector<16x128xf32> to vector<1x16x128xf32>
    %cst_7 = arith.constant dense<0.000000e+00> : vector<1x128xf32>
    %16 = vector.multi_reduction <add>, %15, %cst_7 [1] : vector<1x16x128xf32> to vector<1x128xf32>
    %cst_8 = arith.constant 1.600000e+01 : f32
    %17 = vector.broadcast %cst_8 : f32 to vector<1x128xf32>
    %18 = arith.divf %16, %17 : vector<1x128xf32>
    %19 = arith.truncf %18 : vector<1x128xf32> to vector<1x128xbf16>
    %c0_9 = arith.constant 0 : index
    %c0_10 = arith.constant 0 : index
    %20 = vector.load %arg4[%c0_9, %c0_10] : memref<128x128xbf16, #tpu.memory_space<vmem>>, vector<128x128xbf16>
    %cst_11 = arith.constant dense<0.000000e+00> : vector<1x128xf32>
    %21 = tpu.matmul %19, %20, %cst_11 {dimension_numbers = #tpu.dot_dimension_numbers<[1], [0], [0], [1], [0, 0, 1, 1], [], []>} : vector<1x128xbf16>, vector<128x128xbf16>, vector<1x128xf32> -> vector<1x128xf32>
    %c0_12 = arith.constant 0 : index
    %c0_13 = arith.constant 0 : index
    %22 = vector.load %arg5[%c0_12, %c0_13] : memref<1x128xf32, #tpu.memory_space<vmem>>, vector<1x128xf32>
    %23 = arith.addf %21, %22 : vector<1x128xf32>
    %cst_14 = arith.constant 0.000000e+00 : f32
    %24 = vector.broadcast %cst_14 : f32 to vector<1x128xf32>
    %25 = arith.maximumf %23, %24 : vector<1x128xf32>
    %26 = arith.truncf %25 : vector<1x128xf32> to vector<1x128xbf16>
    %c0_15 = arith.constant 0 : index
    %c0_16 = arith.constant 0 : index
    %27 = vector.load %arg6[%c0_15, %c0_16] : memref<128x128xbf16, #tpu.memory_space<vmem>>, vector<128x128xbf16>
    %cst_17 = arith.constant dense<0.000000e+00> : vector<1x128xf32>
    %28 = tpu.matmul %26, %27, %cst_17 {dimension_numbers = #tpu.dot_dimension_numbers<[1], [0], [0], [1], [0, 0, 1, 1], [], []>} : vector<1x128xbf16>, vector<128x128xbf16>, vector<1x128xf32> -> vector<1x128xf32>
    %c0_18 = arith.constant 0 : index
    %c0_19 = arith.constant 0 : index
    %29 = vector.load %arg7[%c0_18, %c0_19] : memref<1x128xf32, #tpu.memory_space<vmem>>, vector<1x128xf32>
    %30 = arith.addf %28, %29 : vector<1x128xf32>
    %cst_20 = arith.constant 0.000000e+00 : f32
    %31 = vector.broadcast %cst_20 : f32 to vector<1x128xf32>
    %32 = arith.subf %31, %30 : vector<1x128xf32>
    %33 = math.exp %32 : vector<1x128xf32>
    %cst_21 = arith.constant 1.000000e+00 : f32
    %34 = vector.broadcast %cst_21 : f32 to vector<1x128xf32>
    %35 = arith.addf %34, %33 : vector<1x128xf32>
    %cst_22 = arith.constant 1.000000e+00 : f32
    %36 = vector.broadcast %cst_22 : f32 to vector<1x128xf32>
    %37 = arith.divf %36, %35 : vector<1x128xf32>
    %38 = vector.shape_cast %14 : vector<16x128xf32> to vector<1x16x128xf32>
    %39 = vector.shape_cast %37 : vector<1x128xf32> to vector<1x1x128xf32>
    %40 = vector.broadcast %39 : vector<1x1x128xf32> to vector<1x16x128xf32>
    %41 = arith.mulf %38, %40 : vector<1x16x128xf32>
    %42 = arith.truncf %41 : vector<1x16x128xf32> to vector<1x16x128xbf16>
    %cst_23 = arith.constant 0.000000e+00 : bf16
    %43 = vector.broadcast %cst_23 : bf16 to vector<1x8x128xbf16>
    %c0_24 = arith.constant 0 : index
    %c0_25 = arith.constant 0 : index
    %c0_26 = arith.constant 0 : index
    %44 = vector.load %arg25[%c0_24, %c0_25, %c0_26] : memref<1x32x128xbf16, #tpu.memory_space<vmem>>, vector<1x8x128xbf16>
    tpu.vector_store %arg25[%c0_24, %c0_25, %c0_26], %43 {strides = array<i32>} : memref<1x32x128xbf16, #tpu.memory_space<vmem>>, vector<1x8x128xbf16>,
    %cst_27 = arith.constant 0.000000e+00 : bf16
    %45 = vector.broadcast %cst_27 : bf16 to vector<1x8x128xbf16>
    %c0_28 = arith.constant 0 : index
    %c24 = arith.constant 24 : index
    %c0_29 = arith.constant 0 : index
    %46 = vector.load %arg25[%c0_28, %c24, %c0_29] : memref<1x32x128xbf16, #tpu.memory_space<vmem>>, vector<1x8x128xbf16>
    tpu.vector_store %arg25[%c0_28, %c24, %c0_29], %45 {strides = array<i32>} : memref<1x32x128xbf16, #tpu.memory_space<vmem>>, vector<1x8x128xbf16>,
    %c0_30 = arith.constant 0 : index
    %c8 = arith.constant 8 : index
    %c0_31 = arith.constant 0 : index
    %47 = vector.load %arg25[%c0_30, %c8, %c0_31] : memref<1x32x128xbf16, #tpu.memory_space<vmem>>, vector<1x16x128xbf16>
    tpu.vector_store %arg25[%c0_30, %c8, %c0_31], %42 {strides = array<i32>} : memref<1x32x128xbf16, #tpu.memory_space<vmem>>, vector<1x16x128xbf16>,
    %c0_32 = arith.constant 0 : index
    %c0_33 = arith.constant 0 : index
    %c0_34 = arith.constant 0 : index
    %48 = vector.load %arg25[%c0_32, %c0_33, %c0_34] : memref<1x32x128xbf16, #tpu.memory_space<vmem>>, vector<1x32x128xbf16>
    %49 = vector.extract_strided_slice %48 {offsets = [0, 6, 0], sizes = [1, 16, 128], strides = [1, 1, 1]} : vector<1x32x128xbf16> to vector<1x16x128xbf16>
    %50 = vector.extract_strided_slice %48 {offsets = [0, 7, 0], sizes = [1, 16, 128], strides = [1, 1, 1]} : vector<1x32x128xbf16> to vector<1x16x128xbf16>
    %51 = vector.extract_strided_slice %48 {offsets = [0, 8, 0], sizes = [1, 16, 128], strides = [1, 1, 1]} : vector<1x32x128xbf16> to vector<1x16x128xbf16>
    %52 = vector.extract_strided_slice %48 {offsets = [0, 9, 0], sizes = [1, 16, 128], strides = [1, 1, 1]} : vector<1x32x128xbf16> to vector<1x16x128xbf16>
    %53 = vector.extract_strided_slice %48 {offsets = [0, 10, 0], sizes = [1, 16, 128], strides = [1, 1, 1]} : vector<1x32x128xbf16> to vector<1x16x128xbf16>
    %54 = tpu.concatenate %49, %50, %51, %52, %53 in 2 : vector<1x16x128xbf16>, vector<1x16x128xbf16>, vector<1x16x128xbf16>, vector<1x16x128xbf16>, vector<1x16x128xbf16> -> vector<1x16x640xbf16>
    %55 = vector.shape_cast %54 : vector<1x16x640xbf16> to vector<16x640xbf16>
    %c0_35 = arith.constant 0 : index
    %c0_36 = arith.constant 0 : index
    %56 = vector.load %arg8[%c0_35, %c0_36] : memref<640x256xbf16, #tpu.memory_space<vmem>>, vector<640x256xbf16>
    %cst_37 = arith.constant dense<0.000000e+00> : vector<16x256xf32>
    %57 = tpu.matmul %55, %56, %cst_37 {dimension_numbers = #tpu.dot_dimension_numbers<[1], [0], [0], [1], [0, 0, 1, 1], [], []>} : vector<16x640xbf16>, vector<640x256xbf16>, vector<16x256xf32> -> vector<16x256xf32>
    %c0_38 = arith.constant 0 : index
    %c0_39 = arith.constant 0 : index
    %58 = vector.load %arg9[%c0_38, %c0_39] : memref<1x256xf32, #tpu.memory_space<vmem>>, vector<1x256xf32>
    %59 = vector.broadcast %58 : vector<1x256xf32> to vector<16x256xf32>
    %60 = arith.addf %57, %59 : vector<16x256xf32>
    %cst_40 = arith.constant 0.000000e+00 : f32
    %61 = vector.broadcast %cst_40 : f32 to vector<16x256xf32>
    %62 = arith.maximumf %60, %61 : vector<16x256xf32>
    %63 = arith.truncf %62 : vector<16x256xf32> to vector<16x256xbf16>
    %c0_41 = arith.constant 0 : index
    %c0_42 = arith.constant 0 : index
    %64 = vector.load %arg10[%c0_41, %c0_42] : memref<256x768xbf16, #tpu.memory_space<vmem>>, vector<256x768xbf16>
    %cst_43 = arith.constant dense<0.000000e+00> : vector<16x768xf32>
    %65 = tpu.matmul %63, %64, %cst_43 {dimension_numbers = #tpu.dot_dimension_numbers<[1], [0], [0], [1], [0, 0, 1, 1], [], []>} : vector<16x256xbf16>, vector<256x768xbf16>, vector<16x768xf32> -> vector<16x768xf32>
    %c0_44 = arith.constant 0 : index
    %c0_45 = arith.constant 0 : index
    %66 = vector.load %arg11[%c0_44, %c0_45] : memref<1x768xf32, #tpu.memory_space<vmem>>, vector<1x768xf32>
    %67 = vector.broadcast %66 : vector<1x768xf32> to vector<16x768xf32>
    %68 = arith.addf %65, %67 : vector<16x768xf32>
    %69 = vector.extract_strided_slice %68 {offsets = [0, 0], sizes = [16, 256], strides = [1, 1]} : vector<16x768xf32> to vector<16x256xf32>
    %70 = vector.extract_strided_slice %68 {offsets = [0, 256], sizes = [16, 256], strides = [1, 1]} : vector<16x768xf32> to vector<16x256xf32>
    %71 = vector.extract_strided_slice %68 {offsets = [0, 512], sizes = [16, 256], strides = [1, 1]} : vector<16x768xf32> to vector<16x256xf32>
    %72 = vector.extract_strided_slice %69 {offsets = [0, 0], sizes = [16, 64], strides = [1, 1]} : vector<16x256xf32> to vector<16x64xf32>
    %cst_46 = arith.constant 1.250000e-01 : f32
    %73 = vector.broadcast %cst_46 : f32 to vector<16x64xf32>
    %74 = arith.mulf %72, %73 : vector<16x64xf32>
    %75 = arith.truncf %74 : vector<16x64xf32> to vector<16x64xbf16>
    %76 = vector.extract_strided_slice %70 {offsets = [0, 0], sizes = [16, 64], strides = [1, 1]} : vector<16x256xf32> to vector<16x64xf32>
    %77 = arith.truncf %76 : vector<16x64xf32> to vector<16x64xbf16>
    %78 = vector.extract_strided_slice %71 {offsets = [0, 0], sizes = [16, 64], strides = [1, 1]} : vector<16x256xf32> to vector<16x64xf32>
    %79 = arith.truncf %78 : vector<16x64xf32> to vector<16x64xbf16>
    %cst_47 = arith.constant dense<0.000000e+00> : vector<16x16xf32>
    %80 = tpu.matmul %75, %77, %cst_47 {dimension_numbers = #tpu.dot_dimension_numbers<[1], [1], [0], [0], [0, 0, 1, 0], [], []>} : vector<16x64xbf16>, vector<16x64xbf16>, vector<16x16xf32> -> vector<16x16xf32>
    %cst_48 = arith.constant dense<0xFF800000> : vector<16xf32>
    %81 = vector.multi_reduction <maximumf>, %80, %cst_48 [1] : vector<16x16xf32> to vector<16xf32>
    %82 = vector.shape_cast %81 : vector<16xf32> to vector<16x1xf32>
    %83 = vector.broadcast %82 : vector<16x1xf32> to vector<16x16xf32>
    %84 = arith.subf %80, %83 : vector<16x16xf32>
    %85 = math.exp %84 : vector<16x16xf32>
    %cst_49 = arith.constant dense<0.000000e+00> : vector<16xf32>
    %86 = vector.multi_reduction <add>, %85, %cst_49 [1] : vector<16x16xf32> to vector<16xf32>
    %87 = vector.shape_cast %86 : vector<16xf32> to vector<16x1xf32>
    %88 = vector.broadcast %87 : vector<16x1xf32> to vector<16x16xf32>
    %89 = arith.divf %85, %88 : vector<16x16xf32>
    %90 = arith.truncf %89 : vector<16x16xf32> to vector<16x16xbf16>
    %cst_50 = arith.constant dense<0.000000e+00> : vector<16x64xf32>
    %91 = tpu.matmul %90, %79, %cst_50 {dimension_numbers = #tpu.dot_dimension_numbers<[1], [0], [0], [1], [0, 0, 1, 1], [], []>} : vector<16x16xbf16>, vector<16x64xbf16>, vector<16x64xf32> -> vector<16x64xf32>
    %92 = vector.extract_strided_slice %69 {offsets = [0, 64], sizes = [16, 64], strides = [1, 1]} : vector<16x256xf32> to vector<16x64xf32>
    %cst_51 = arith.constant 1.250000e-01 : f32
    %93 = vector.broadcast %cst_51 : f32 to vector<16x64xf32>
    %94 = arith.mulf %92, %93 : vector<16x64xf32>
    %95 = arith.truncf %94 : vector<16x64xf32> to vector<16x64xbf16>
    %96 = vector.extract_strided_slice %70 {offsets = [0, 64], sizes = [16, 64], strides = [1, 1]} : vector<16x256xf32> to vector<16x64xf32>
    %97 = arith.truncf %96 : vector<16x64xf32> to vector<16x64xbf16>
    %98 = vector.extract_strided_slice %71 {offsets = [0, 64], sizes = [16, 64], strides = [1, 1]} : vector<16x256xf32> to vector<16x64xf32>
    %99 = arith.truncf %98 : vector<16x64xf32> to vector<16x64xbf16>
    %cst_52 = arith.constant dense<0.000000e+00> : vector<16x16xf32>
    %100 = tpu.matmul %95, %97, %cst_52 {dimension_numbers = #tpu.dot_dimension_numbers<[1], [1], [0], [0], [0, 0, 1, 0], [], []>} : vector<16x64xbf16>, vector<16x64xbf16>, vector<16x16xf32> -> vector<16x16xf32>
    %cst_53 = arith.constant dense<0xFF800000> : vector<16xf32>
    %101 = vector.multi_reduction <maximumf>, %100, %cst_53 [1] : vector<16x16xf32> to vector<16xf32>
    %102 = vector.shape_cast %101 : vector<16xf32> to vector<16x1xf32>
    %103 = vector.broadcast %102 : vector<16x1xf32> to vector<16x16xf32>
    %104 = arith.subf %100, %103 : vector<16x16xf32>
    %105 = math.exp %104 : vector<16x16xf32>
    %cst_54 = arith.constant dense<0.000000e+00> : vector<16xf32>
    %106 = vector.multi_reduction <add>, %105, %cst_54 [1] : vector<16x16xf32> to vector<16xf32>
    %107 = vector.shape_cast %106 : vector<16xf32> to vector<16x1xf32>
    %108 = vector.broadcast %107 : vector<16x1xf32> to vector<16x16xf32>
    %109 = arith.divf %105, %108 : vector<16x16xf32>
    %110 = arith.truncf %109 : vector<16x16xf32> to vector<16x16xbf16>
    %cst_55 = arith.constant dense<0.000000e+00> : vector<16x64xf32>
    %111 = tpu.matmul %110, %99, %cst_55 {dimension_numbers = #tpu.dot_dimension_numbers<[1], [0], [0], [1], [0, 0, 1, 1], [], []>} : vector<16x16xbf16>, vector<16x64xbf16>, vector<16x64xf32> -> vector<16x64xf32>
    %112 = vector.extract_strided_slice %69 {offsets = [0, 128], sizes = [16, 64], strides = [1, 1]} : vector<16x256xf32> to vector<16x64xf32>
    %cst_56 = arith.constant 1.250000e-01 : f32
    %113 = vector.broadcast %cst_56 : f32 to vector<16x64xf32>
    %114 = arith.mulf %112, %113 : vector<16x64xf32>
    %115 = arith.truncf %114 : vector<16x64xf32> to vector<16x64xbf16>
    %116 = vector.extract_strided_slice %70 {offsets = [0, 128], sizes = [16, 64], strides = [1, 1]} : vector<16x256xf32> to vector<16x64xf32>
    %117 = arith.truncf %116 : vector<16x64xf32> to vector<16x64xbf16>
    %118 = vector.extract_strided_slice %71 {offsets = [0, 128], sizes = [16, 64], strides = [1, 1]} : vector<16x256xf32> to vector<16x64xf32>
    %119 = arith.truncf %118 : vector<16x64xf32> to vector<16x64xbf16>
    %cst_57 = arith.constant dense<0.000000e+00> : vector<16x16xf32>
    %120 = tpu.matmul %115, %117, %cst_57 {dimension_numbers = #tpu.dot_dimension_numbers<[1], [1], [0], [0], [0, 0, 1, 0], [], []>} : vector<16x64xbf16>, vector<16x64xbf16>, vector<16x16xf32> -> vector<16x16xf32>
    %cst_58 = arith.constant dense<0xFF800000> : vector<16xf32>
    %121 = vector.multi_reduction <maximumf>, %120, %cst_58 [1] : vector<16x16xf32> to vector<16xf32>
    %122 = vector.shape_cast %121 : vector<16xf32> to vector<16x1xf32>
    %123 = vector.broadcast %122 : vector<16x1xf32> to vector<16x16xf32>
    %124 = arith.subf %120, %123 : vector<16x16xf32>
    %125 = math.exp %124 : vector<16x16xf32>
    %cst_59 = arith.constant dense<0.000000e+00> : vector<16xf32>
    %126 = vector.multi_reduction <add>, %125, %cst_59 [1] : vector<16x16xf32> to vector<16xf32>
    %127 = vector.shape_cast %126 : vector<16xf32> to vector<16x1xf32>
    %128 = vector.broadcast %127 : vector<16x1xf32> to vector<16x16xf32>
    %129 = arith.divf %125, %128 : vector<16x16xf32>
    %130 = arith.truncf %129 : vector<16x16xf32> to vector<16x16xbf16>
    %cst_60 = arith.constant dense<0.000000e+00> : vector<16x64xf32>
    %131 = tpu.matmul %130, %119, %cst_60 {dimension_numbers = #tpu.dot_dimension_numbers<[1], [0], [0], [1], [0, 0, 1, 1], [], []>} : vector<16x16xbf16>, vector<16x64xbf16>, vector<16x64xf32> -> vector<16x64xf32>
    %132 = vector.extract_strided_slice %69 {offsets = [0, 192], sizes = [16, 64], strides = [1, 1]} : vector<16x256xf32> to vector<16x64xf32>
    %cst_61 = arith.constant 1.250000e-01 : f32
    %133 = vector.broadcast %cst_61 : f32 to vector<16x64xf32>
    %134 = arith.mulf %132, %133 : vector<16x64xf32>
    %135 = arith.truncf %134 : vector<16x64xf32> to vector<16x64xbf16>
    %136 = vector.extract_strided_slice %70 {offsets = [0, 192], sizes = [16, 64], strides = [1, 1]} : vector<16x256xf32> to vector<16x64xf32>
    %137 = arith.truncf %136 : vector<16x64xf32> to vector<16x64xbf16>
    %138 = vector.extract_strided_slice %71 {offsets = [0, 192], sizes = [16, 64], strides = [1, 1]} : vector<16x256xf32> to vector<16x64xf32>
    %139 = arith.truncf %138 : vector<16x64xf32> to vector<16x64xbf16>
    %cst_62 = arith.constant dense<0.000000e+00> : vector<16x16xf32>
    %140 = tpu.matmul %135, %137, %cst_62 {dimension_numbers = #tpu.dot_dimension_numbers<[1], [1], [0], [0], [0, 0, 1, 0], [], []>} : vector<16x64xbf16>, vector<16x64xbf16>, vector<16x16xf32> -> vector<16x16xf32>
    %cst_63 = arith.constant dense<0xFF800000> : vector<16xf32>
    %141 = vector.multi_reduction <maximumf>, %140, %cst_63 [1] : vector<16x16xf32> to vector<16xf32>
    %142 = vector.shape_cast %141 : vector<16xf32> to vector<16x1xf32>
    %143 = vector.broadcast %142 : vector<16x1xf32> to vector<16x16xf32>
    %144 = arith.subf %140, %143 : vector<16x16xf32>
    %145 = math.exp %144 : vector<16x16xf32>
    %cst_64 = arith.constant dense<0.000000e+00> : vector<16xf32>
    %146 = vector.multi_reduction <add>, %145, %cst_64 [1] : vector<16x16xf32> to vector<16xf32>
    %147 = vector.shape_cast %146 : vector<16xf32> to vector<16x1xf32>
    %148 = vector.broadcast %147 : vector<16x1xf32> to vector<16x16xf32>
    %149 = arith.divf %145, %148 : vector<16x16xf32>
    %150 = arith.truncf %149 : vector<16x16xf32> to vector<16x16xbf16>
    %cst_65 = arith.constant dense<0.000000e+00> : vector<16x64xf32>
    %151 = tpu.matmul %150, %139, %cst_65 {dimension_numbers = #tpu.dot_dimension_numbers<[1], [0], [0], [1], [0, 0, 1, 1], [], []>} : vector<16x16xbf16>, vector<16x64xbf16>, vector<16x64xf32> -> vector<16x64xf32>
    %152 = tpu.concatenate %91, %111, %131, %151 in 1 : vector<16x64xf32>, vector<16x64xf32>, vector<16x64xf32>, vector<16x64xf32> -> vector<16x256xf32>
    %153 = arith.truncf %152 : vector<16x256xf32> to vector<16x256xbf16>
    %c0_66 = arith.constant 0 : index
    %c0_67 = arith.constant 0 : index
    %154 = vector.load %arg12[%c0_66, %c0_67] : memref<256x256xbf16, #tpu.memory_space<vmem>>, vector<256x256xbf16>
    %cst_68 = arith.constant dense<0.000000e+00> : vector<16x256xf32>
    %155 = tpu.matmul %153, %154, %cst_68 {dimension_numbers = #tpu.dot_dimension_numbers<[1], [0], [0], [1], [0, 0, 1, 1], [], []>} : vector<16x256xbf16>, vector<256x256xbf16>, vector<16x256xf32> -> vector<16x256xf32>
    %c0_69 = arith.constant 0 : index
    %c0_70 = arith.constant 0 : index
    %156 = vector.load %arg13[%c0_69, %c0_70] : memref<1x256xf32, #tpu.memory_space<vmem>>, vector<1x256xf32>
    %157 = vector.broadcast %156 : vector<1x256xf32> to vector<16x256xf32>
    %158 = arith.addf %155, %157 : vector<16x256xf32>
    %159 = arith.addf %62, %158 : vector<16x256xf32>
    %c0_71 = arith.constant 0 : index
    %c0_72 = arith.constant 0 : index
    %160 = vector.load %arg14[%c0_71, %c0_72] : memref<1x256xf32, #tpu.memory_space<vmem>>, vector<1x256xf32>
    %c0_73 = arith.constant 0 : index
    %c0_74 = arith.constant 0 : index
    %161 = vector.load %arg15[%c0_73, %c0_74] : memref<1x256xf32, #tpu.memory_space<vmem>>, vector<1x256xf32>
    %cst_75 = arith.constant dense<0.000000e+00> : vector<16xf32>
    %162 = vector.multi_reduction <add>, %159, %cst_75 [1] : vector<16x256xf32> to vector<16xf32>
    %163 = vector.shape_cast %162 : vector<16xf32> to vector<16x1xf32>
    %cst_76 = arith.constant 2.560000e+02 : f32
    %164 = vector.broadcast %cst_76 : f32 to vector<16x1xf32>
    %165 = arith.divf %163, %164 : vector<16x1xf32>
    %166 = vector.broadcast %165 : vector<16x1xf32> to vector<16x256xf32>
    %167 = arith.subf %159, %166 : vector<16x256xf32>
    %168 = arith.mulf %167, %167 : vector<16x256xf32>
    %cst_77 = arith.constant dense<0.000000e+00> : vector<16xf32>
    %169 = vector.multi_reduction <add>, %168, %cst_77 [1] : vector<16x256xf32> to vector<16xf32>
    %170 = vector.shape_cast %169 : vector<16xf32> to vector<16x1xf32>
    %cst_78 = arith.constant 2.560000e+02 : f32
    %171 = vector.broadcast %cst_78 : f32 to vector<16x1xf32>
    %172 = arith.divf %170, %171 : vector<16x1xf32>
    %173 = vector.broadcast %165 : vector<16x1xf32> to vector<16x256xf32>
    %174 = arith.subf %159, %173 : vector<16x256xf32>
    %cst_79 = arith.constant 9.99999974E-6 : f32
    %175 = vector.broadcast %cst_79 : f32 to vector<16x1xf32>
    %176 = arith.addf %172, %175 : vector<16x1xf32>
    %177 = math.rsqrt %176 : vector<16x1xf32>
    %178 = vector.broadcast %177 : vector<16x1xf32> to vector<16x256xf32>
    %179 = arith.mulf %174, %178 : vector<16x256xf32>
    %180 = vector.broadcast %160 : vector<1x256xf32> to vector<16x256xf32>
    %181 = arith.mulf %179, %180 : vector<16x256xf32>
    %182 = vector.broadcast %161 : vector<1x256xf32> to vector<16x256xf32>
    %183 = arith.addf %181, %182 : vector<16x256xf32>
    %184 = arith.truncf %183 : vector<16x256xf32> to vector<16x256xbf16>
    %c0_80 = arith.constant 0 : index
    %c0_81 = arith.constant 0 : index
    %185 = vector.load %arg16[%c0_80, %c0_81] : memref<256x512xbf16, #tpu.memory_space<vmem>>, vector<256x512xbf16>
    %cst_82 = arith.constant dense<0.000000e+00> : vector<16x512xf32>
    %186 = tpu.matmul %184, %185, %cst_82 {dimension_numbers = #tpu.dot_dimension_numbers<[1], [0], [0], [1], [0, 0, 1, 1], [], []>} : vector<16x256xbf16>, vector<256x512xbf16>, vector<16x512xf32> -> vector<16x512xf32>
    %c0_83 = arith.constant 0 : index
    %c0_84 = arith.constant 0 : index
    %187 = vector.load %arg17[%c0_83, %c0_84] : memref<1x512xf32, #tpu.memory_space<vmem>>, vector<1x512xf32>
    %188 = vector.broadcast %187 : vector<1x512xf32> to vector<16x512xf32>
    %189 = arith.addf %186, %188 : vector<16x512xf32>
    %cst_85 = arith.constant 0.000000e+00 : f32
    %190 = vector.broadcast %cst_85 : f32 to vector<16x512xf32>
    %191 = arith.maximumf %189, %190 : vector<16x512xf32>
    %192 = arith.truncf %191 : vector<16x512xf32> to vector<16x512xbf16>
    %c0_86 = arith.constant 0 : index
    %c0_87 = arith.constant 0 : index
    %193 = vector.load %arg18[%c0_86, %c0_87] : memref<512x256xbf16, #tpu.memory_space<vmem>>, vector<512x256xbf16>
    %cst_88 = arith.constant dense<0.000000e+00> : vector<16x256xf32>
    %194 = tpu.matmul %192, %193, %cst_88 {dimension_numbers = #tpu.dot_dimension_numbers<[1], [0], [0], [1], [0, 0, 1, 1], [], []>} : vector<16x512xbf16>, vector<512x256xbf16>, vector<16x256xf32> -> vector<16x256xf32>
    %c0_89 = arith.constant 0 : index
    %c0_90 = arith.constant 0 : index
    %195 = vector.load %arg19[%c0_89, %c0_90] : memref<1x256xf32, #tpu.memory_space<vmem>>, vector<1x256xf32>
    %196 = vector.broadcast %195 : vector<1x256xf32> to vector<16x256xf32>
    %197 = arith.addf %194, %196 : vector<16x256xf32>
    %198 = arith.addf %183, %197 : vector<16x256xf32>
    %c0_91 = arith.constant 0 : index
    %c0_92 = arith.constant 0 : index
    %199 = vector.load %arg20[%c0_91, %c0_92] : memref<1x256xf32, #tpu.memory_space<vmem>>, vector<1x256xf32>
    %c0_93 = arith.constant 0 : index
    %c0_94 = arith.constant 0 : index
    %200 = vector.load %arg21[%c0_93, %c0_94] : memref<1x256xf32, #tpu.memory_space<vmem>>, vector<1x256xf32>
    %cst_95 = arith.constant dense<0.000000e+00> : vector<16xf32>
    %201 = vector.multi_reduction <add>, %198, %cst_95 [1] : vector<16x256xf32> to vector<16xf32>
    %202 = vector.shape_cast %201 : vector<16xf32> to vector<16x1xf32>
    %cst_96 = arith.constant 2.560000e+02 : f32
    %203 = vector.broadcast %cst_96 : f32 to vector<16x1xf32>
    %204 = arith.divf %202, %203 : vector<16x1xf32>
    %205 = vector.broadcast %204 : vector<16x1xf32> to vector<16x256xf32>
    %206 = arith.subf %198, %205 : vector<16x256xf32>
    %207 = arith.mulf %206, %206 : vector<16x256xf32>
    %cst_97 = arith.constant dense<0.000000e+00> : vector<16xf32>
    %208 = vector.multi_reduction <add>, %207, %cst_97 [1] : vector<16x256xf32> to vector<16xf32>
    %209 = vector.shape_cast %208 : vector<16xf32> to vector<16x1xf32>
    %cst_98 = arith.constant 2.560000e+02 : f32
    %210 = vector.broadcast %cst_98 : f32 to vector<16x1xf32>
    %211 = arith.divf %209, %210 : vector<16x1xf32>
    %212 = vector.broadcast %204 : vector<16x1xf32> to vector<16x256xf32>
    %213 = arith.subf %198, %212 : vector<16x256xf32>
    %cst_99 = arith.constant 9.99999974E-6 : f32
    %214 = vector.broadcast %cst_99 : f32 to vector<16x1xf32>
    %215 = arith.addf %211, %214 : vector<16x1xf32>
    %216 = math.rsqrt %215 : vector<16x1xf32>
    %217 = vector.broadcast %216 : vector<16x1xf32> to vector<16x256xf32>
    %218 = arith.mulf %213, %217 : vector<16x256xf32>
    %219 = vector.broadcast %199 : vector<1x256xf32> to vector<16x256xf32>
    %220 = arith.mulf %218, %219 : vector<16x256xf32>
    %221 = vector.broadcast %200 : vector<1x256xf32> to vector<16x256xf32>
    %222 = arith.addf %220, %221 : vector<16x256xf32>
    %223 = vector.shape_cast %222 : vector<16x256xf32> to vector<1x16x256xf32>
    %cst_100 = arith.constant dense<0.000000e+00> : vector<1x256xf32>
    %224 = vector.multi_reduction <add>, %223, %cst_100 [1] : vector<1x16x256xf32> to vector<1x256xf32>
    %cst_101 = arith.constant 1.600000e+01 : f32
    %225 = vector.broadcast %cst_101 : f32 to vector<1x256xf32>
    %226 = arith.divf %224, %225 : vector<1x256xf32>
    %227 = arith.truncf %226 : vector<1x256xf32> to vector<1x256xbf16>
    %c0_102 = arith.constant 0 : index
    %c0_103 = arith.constant 0 : index
    %228 = vector.load %arg22[%c0_102, %c0_103] : memref<256x256xbf16, #tpu.memory_space<vmem>>, vector<256x256xbf16>
    %cst_104 = arith.constant dense<0.000000e+00> : vector<1x256xf32>
    %229 = tpu.matmul %227, %228, %cst_104 {dimension_numbers = #tpu.dot_dimension_numbers<[1], [0], [0], [1], [0, 0, 1, 1], [], []>} : vector<1x256xbf16>, vector<256x256xbf16>, vector<1x256xf32> -> vector<1x256xf32>
    %c0_105 = arith.constant 0 : index
    %c0_106 = arith.constant 0 : index
    %230 = vector.load %arg23[%c0_105, %c0_106] : memref<1x256xf32, #tpu.memory_space<vmem>>, vector<1x256xf32>
    %231 = arith.addf %229, %230 : vector<1x256xf32>
    %232 = vector.shape_cast %231 : vector<1x256xf32> to vector<1x1x256xf32>
    %c0_107 = arith.constant 0 : index
    %c0_108 = arith.constant 0 : index
    %c0_109 = arith.constant 0 : index
    %233 = vector.load %arg24[%c0_107, %c0_108, %c0_109] : memref<1x1x256xf32, #tpu.memory_space<vmem>>, vector<1x1x256xf32>
    tpu.vector_store %arg24[%c0_107, %c0_108, %c0_109], %232 {strides = array<i32>} : memref<1x1x256xf32, #tpu.memory_space<vmem>>, vector<1x1x256xf32>,
    return
  }
  func.func @transform_0(%arg0: i32) -> (i32, i32, i32) {
    %c0_i32 = arith.constant 0 : i32
    %c0_i32_0 = arith.constant 0 : i32
    %c0_i32_1 = arith.constant 0 : i32
    return %arg0, %c0_i32, %c0_i32_0 : i32, i32, i32
  }
  func.func @transform_1(%arg0: i32) -> (i32, i32) {
    %c0_i32 = arith.constant 0 : i32
    %c0_i32_0 = arith.constant 0 : i32
    %c0_i32_1 = arith.constant 0 : i32
    return %c0_i32, %c0_i32_0 : i32, i32
  }
  func.func @transform_2(%arg0: i32) -> (i32, i32) {
    %c0_i32 = arith.constant 0 : i32
    %c0_i32_0 = arith.constant 0 : i32
    %c0_i32_1 = arith.constant 0 : i32
    return %c0_i32, %c0_i32_0 : i32, i32
  }
  func.func @transform_3(%arg0: i32) -> (i32, i32) {
    %c0_i32 = arith.constant 0 : i32
    %c0_i32_0 = arith.constant 0 : i32
    %c0_i32_1 = arith.constant 0 : i32
    return %c0_i32, %c0_i32_0 : i32, i32
  }
  func.func @transform_4(%arg0: i32) -> (i32, i32) {
    %c0_i32 = arith.constant 0 : i32
    %c0_i32_0 = arith.constant 0 : i32
    %c0_i32_1 = arith.constant 0 : i32
    return %c0_i32, %c0_i32_0 : i32, i32
  }
  func.func @transform_5(%arg0: i32) -> (i32, i32) {
    %c0_i32 = arith.constant 0 : i32
    %c0_i32_0 = arith.constant 0 : i32
    %c0_i32_1 = arith.constant 0 : i32
    return %c0_i32, %c0_i32_0 : i32, i32
  }
  func.func @transform_6(%arg0: i32) -> (i32, i32) {
    %c0_i32 = arith.constant 0 : i32
    %c0_i32_0 = arith.constant 0 : i32
    %c0_i32_1 = arith.constant 0 : i32
    return %c0_i32, %c0_i32_0 : i32, i32
  }
  func.func @transform_7(%arg0: i32) -> (i32, i32) {
    %c0_i32 = arith.constant 0 : i32
    %c0_i32_0 = arith.constant 0 : i32
    %c0_i32_1 = arith.constant 0 : i32
    return %c0_i32, %c0_i32_0 : i32, i32
  }
  func.func @transform_8(%arg0: i32) -> (i32, i32) {
    %c0_i32 = arith.constant 0 : i32
    %c0_i32_0 = arith.constant 0 : i32
    %c0_i32_1 = arith.constant 0 : i32
    return %c0_i32, %c0_i32_0 : i32, i32
  }
  func.func @transform_9(%arg0: i32) -> (i32, i32) {
    %c0_i32 = arith.constant 0 : i32
    %c0_i32_0 = arith.constant 0 : i32
    %c0_i32_1 = arith.constant 0 : i32
    return %c0_i32, %c0_i32_0 : i32, i32
  }
  func.func @transform_10(%arg0: i32) -> (i32, i32) {
    %c0_i32 = arith.constant 0 : i32
    %c0_i32_0 = arith.constant 0 : i32
    %c0_i32_1 = arith.constant 0 : i32
    return %c0_i32, %c0_i32_0 : i32, i32
  }
  func.func @transform_11(%arg0: i32) -> (i32, i32) {
    %c0_i32 = arith.constant 0 : i32
    %c0_i32_0 = arith.constant 0 : i32
    %c0_i32_1 = arith.constant 0 : i32
    return %c0_i32, %c0_i32_0 : i32, i32
  }
  func.func @transform_12(%arg0: i32) -> (i32, i32) {
    %c0_i32 = arith.constant 0 : i32
    %c0_i32_0 = arith.constant 0 : i32
    %c0_i32_1 = arith.constant 0 : i32
    return %c0_i32, %c0_i32_0 : i32, i32
  }
  func.func @transform_13(%arg0: i32) -> (i32, i32) {
    %c0_i32 = arith.constant 0 : i32
    %c0_i32_0 = arith.constant 0 : i32
    %c0_i32_1 = arith.constant 0 : i32
    return %c0_i32, %c0_i32_0 : i32, i32
  }
  func.func @transform_14(%arg0: i32) -> (i32, i32) {
    %c0_i32 = arith.constant 0 : i32
    %c0_i32_0 = arith.constant 0 : i32
    %c0_i32_1 = arith.constant 0 : i32
    return %c0_i32, %c0_i32_0 : i32, i32
  }
  func.func @transform_15(%arg0: i32) -> (i32, i32) {
    %c0_i32 = arith.constant 0 : i32
    %c0_i32_0 = arith.constant 0 : i32
    %c0_i32_1 = arith.constant 0 : i32
    return %c0_i32, %c0_i32_0 : i32, i32
  }
  func.func @transform_16(%arg0: i32) -> (i32, i32) {
    %c0_i32 = arith.constant 0 : i32
    %c0_i32_0 = arith.constant 0 : i32
    %c0_i32_1 = arith.constant 0 : i32
    return %c0_i32, %c0_i32_0 : i32, i32
  }
  func.func @transform_17(%arg0: i32) -> (i32, i32) {
    %c0_i32 = arith.constant 0 : i32
    %c0_i32_0 = arith.constant 0 : i32
    %c0_i32_1 = arith.constant 0 : i32
    return %c0_i32, %c0_i32_0 : i32, i32
  }
  func.func @transform_18(%arg0: i32) -> (i32, i32) {
    %c0_i32 = arith.constant 0 : i32
    %c0_i32_0 = arith.constant 0 : i32
    %c0_i32_1 = arith.constant 0 : i32
    return %c0_i32, %c0_i32_0 : i32, i32
  }
  func.func @transform_19(%arg0: i32) -> (i32, i32) {
    %c0_i32 = arith.constant 0 : i32
    %c0_i32_0 = arith.constant 0 : i32
    %c0_i32_1 = arith.constant 0 : i32
    return %c0_i32, %c0_i32_0 : i32, i32
  }
  func.func @transform_20(%arg0: i32) -> (i32, i32) {
    %c0_i32 = arith.constant 0 : i32
    %c0_i32_0 = arith.constant 0 : i32
    %c0_i32_1 = arith.constant 0 : i32
    return %c0_i32, %c0_i32_0 : i32, i32
  }
  func.func @transform_21(%arg0: i32) -> (i32, i32) {
    %c0_i32 = arith.constant 0 : i32
    %c0_i32_0 = arith.constant 0 : i32
    %c0_i32_1 = arith.constant 0 : i32
    return %c0_i32, %c0_i32_0 : i32, i32
  }
  func.func @transform_22(%arg0: i32) -> (i32, i32) {
    %c0_i32 = arith.constant 0 : i32
    %c0_i32_0 = arith.constant 0 : i32
    %c0_i32_1 = arith.constant 0 : i32
    return %c0_i32, %c0_i32_0 : i32, i32
  }
  func.func @transform_23(%arg0: i32) -> (i32, i32, i32) {
    %c0_i32 = arith.constant 0 : i32
    %c0_i32_0 = arith.constant 0 : i32
    %c0_i32_1 = arith.constant 0 : i32
    return %arg0, %c0_i32, %c0_i32_0 : i32, i32, i32
  }
}

</mosaic_0001>

<bundles_post_ra>
// kernel: titanet_forward.1
= control target key start
LH: loop header
LB: loop body
LE: loop exit
PB: predicated region body
PF: predicated region fallthrough
CT: control target
= control target key end

     0   :  { %s8334_s0 = inlined_call_operand.vmem [shape: bf16[2,20,128], index: 0, kind: input, shape index: {}]   ;;  %s8335_s1 = inlined_call_operand.hbm [shape: bf16[640,128], index: 1, kind: input, shape index: {}]   ;;  %s8336_s2 = inlined_call_operand.hbm [shape: f32[1,128], index: 2, kind: input, shape index: {}]   ;;  %s8337_s3 = inlined_call_operand.vmem [shape: bf16[128,128], index: 3, kind: input, shape index: {}]   ;;  %s8338_s4 = inlined_call_operand.vmem [shape: f32[1,128], index: 4, kind: input, shape index: {}]   ;;  %s8339_s5 = inlined_call_operand.vmem [shape: bf16[128,128], index: 5, kind: input, shape index: {}]   ;;  %s8340_s6 = inlined_call_operand.vmem [shape: f32[1,128], index: 6, kind: input, shape index: {}]   ;;  %s8341_s7 = inlined_call_operand.hbm [shape: bf16[640,256], index: 7, kind: input, shape index: {}]   ;;  %s8342_s8 = inlined_call_operand.vmem [shape: f32[1,256], index: 8, kind: input, shape index: {}]   ;;  %s8343_s9 = inlined_call_operand.hbm [shape: bf16[256,768], index: 9, kind: input, shape index: {}]   ;;  %s8344_s10 = inlined_call_operand.hbm [shape: f32[1,768], index: 10, kind: input, shape index: {}]   ;;  %s8345_s11 = inlined_call_operand.hbm [shape: bf16[256,256], index: 11, kind: input, shape index: {}]   ;;  %s8346_s12 = inlined_call_operand.hbm [shape: f32[1,256], index: 12, kind: input, shape index: {}]   ;;  %s8347_s13 = inlined_call_operand.hbm [shape: f32[1,256], index: 13, kind: input, shape index: {}]   ;;  %s8348_s14 = inlined_call_operand.hbm [shape: f32[1,256], index: 14, kind: input, shape index: {}]   ;;  %s8349_s15 = inlined_call_operand.hbm [shape: bf16[256,512], index: 15, kind: input, shape index: {}]   ;;  %s8350_s16 = inlined_call_operand.hbm [shape: f32[1,512], index: 16, kind: input, shape index: {}]   ;;  %s8351_s17 = inlined_call_operand.hbm [shape: bf16[512,256], index: 17, kind: input, shape index: {}]   ;;  %s8352_s18 = inlined_call_operand.hbm [shape: f32[1,256], index: 18, kind: input, shape index: {}]   ;;  %s8353_s19 = inlined_call_operand.vmem [shape: f32[1,256], index: 19, kind: input, shape index: {}]   ;;  %s8354_s20 = inlined_call_operand.vmem [shape: f32[1,256], index: 20, kind: input, shape index: {}]   ;;  %s8355_s21 = inlined_call_operand.hbm [shape: bf16[256,256], index: 21, kind: input, shape index: {}]   ;;  %s8356_s22 = inlined_call_operand.hbm [shape: f32[1,256], index: 22, kind: input, shape index: {}]   ;;  %s8357_s23 = inlined_call_operand.vmem [shape: f32[2,1,256], index: 23, kind: output, shape index: {}]  }
   0x1   :  { %8370 = sst [smem:[#allocation35_spill]] %s8334_s0 }
   0x2   :  { %8371 = sst [smem:[#allocation36_spill]] %s8335_s1 }
   0x3   :  { %8372 = sst [smem:[#allocation37_spill]] %s8336_s2 }
   0x4   :  { %8373 = sst [smem:[#allocation38_spill]] %s8337_s3 }
   0x5   :  { %8374 = sst [smem:[#allocation39_spill]] %s8338_s4 }
   0x6   :  { %8375 = sst [smem:[#allocation40_spill]] %s8339_s5 }
   0x7   :  { %8376 = sst [smem:[#allocation41_spill]] %s8340_s6 }
   0x8   :  { %8377 = sst [smem:[#allocation42_spill]] %s8341_s7 }
   0x9   :  { %8378 = sst [smem:[#allocation43_spill]] %s8342_s8 }
   0xa   :  { %8379 = sst [smem:[#allocation44_spill]] %s8343_s9 }
   0xb   :  { %8380 = sst [smem:[#allocation45_spill]] %s8345_s11 }
   0xc   :  { %8381 = sst [smem:[#allocation46_spill]] %s8347_s13 }
   0xd   :  { %8382 = sst [smem:[#allocation47_spill]] %s8349_s15 }
   0xe   :  { %8383 = sst [smem:[#allocation48_spill]] %s8351_s17 }
   0xf   :  { %8384 = sst [smem:[#allocation49_spill]] %s8353_s19 }
  0x10   :  { %8385 = sst [smem:[#allocation50_spill]] %s8354_s20 }
  0x11   :  { %8386 = sst [smem:[#allocation51_spill]] %s8357_s23 }
  0x12   :  { %28 = vsyncpa [#allocation4], 0 }
  0x13   :  { %29 = vsyncpa [#allocation6], 0 }
  0x14   :  { %30 = vsyncpa [#allocation9], 0 }
  0x15   :  { %31 = vsyncpa [#allocation12], 0 }
  0x16   :  { %32 = vsyncpa [#allocation15], 0 }
  0x17   :  { %33 = vsyncpa [#allocation18], 0 }
  0x18   :  { %34 = vsyncpa [#allocation21], 0 }
  0x19   :  { %35 = vsyncpa [#allocation24], 0  ;;  %s7570_s4 = smov 0  }
  0x1a LB: > { %8387 = sst [smem:[#allocation34_spill]] %s7420_s4  ;;  %s7422_s30 = smov [#allocation5]   ;;  %s7420_s4 = sphi %s7570_s4, %s41_s4  }
  0x1b   : > { %s586_s24 = sshll.u32 %s7422_s30, 4  ;;  %s7576_s25 = sadd.s32 4294967295, %s7420_s4   ;;  %s587_s24 = int_to_ptr.vmem [resolvable:$true] %s586_s24 }
  0x1c   : > { %p5438_p0 = scmp.ge.s32.totalorder %s7420_s4, 1  ;;  %p560_p1 = scmp.lt.s32.totalorder %s7420_s4, 3 }
  0x1d   : > { %p8364_p2 = scmp.eq.s32.totalorder %s7576_s25, 0  ;;  %s7423_s1 = smov [#allocation8]  }
  0x1e   : > { %p7581_p3 = pnand %p5438_p0, %p560_p1  ;;  %s624_s26 = sshll.u32 %s7423_s1, 4  ;;  %s7587_s26 = int_to_ptr.vmem [resolvable:$true] %s624_s26 }
  0x1f   : > { %s7424_s6 = smov [#allocation11]   ;;  %s8390_s29 = sld [smem:[#allocation37_spill]] }
  0x20   : > { %s8388_s5 = scalar_select %p7581_p3, 1, 0 }
  0x21   : > { %p6186_p4 = pneg %p7581_p3  ;;  %s7595_s27 = sshll.u32 %s7424_s6, 4  ;;  %s649_s27 = int_to_ptr.vmem [resolvable:$true] %s7595_s27 }
  0x23   : > { %p7591_p5 = pnand %p8364_p2, %p6186_p4 }
  0x25   : > { %s6962_s3 = scalar_lea.hbm %s8390_s29, 16  ;;  %p7605_p7 = pneg %p7591_p5 }
  0x26   : > { %p6963_p6 = scmp.ne.s32.totalorder %s8390_s29, %s6962_s3  ;;  %p6969_p10 = scmp.lt.u32.totalorder %s6962_s3, %s8390_s29 }
  0x28   : > { %p6965_p8 = pnand %p7605_p7, %p6963_p6 }
  0x2a   : > { %p6966_p9 = pneg %p6965_p8 }
  0x2c   : > { %p6971_p11 = pnand %p6969_p10, %p6966_p9 }
  0x2e   : > { %6974 = shalt.err (!%p6971_p11)
}
  0x2f   : > { %s6975_s7 = scalar_lea.vmem %s587_s24, 16  ;;  %s6982_s28 = scalar_lea.vmem %s587_s24, 32 }
  0x30   : > { %p6976_p12 = scmp.ne.s32.totalorder %s587_s24, %s6975_s7  ;;  %p6983_p1 = scmp.lt.s32.totalorder %s587_s24, %s587_s24 }
  0x31   : > { %p6984_p4 = scmp.lt.s32.totalorder %s6982_s28, %s6975_s7 }
  0x32   : > { %p6978_p13 = pnand %p6976_p12, %p7605_p7 }
  0x33   : > { %p6985_p2 = por %p6984_p4, %p6983_p1 }
  0x34   : > { %p6979_p0 = pneg %p6978_p13 }
  0x36   : > { %p6986_p3 = pnand %p6985_p2, %p6979_p0 }
  0x38   : > { %6989 = shalt.err (!%p6986_p3)
}
  0x39   : > { %6192 = dma.hbm_to_vmem [thread:$0]  (!%p7591_p5), %s8390_s29, 16, %s587_s24, [#allocation6]  }
  0x3a   : > { %s8392_s9 = sld [smem:[#allocation44_spill]] }
  0x40   : > { %s6990_s6 = scalar_lea.hbm %s8392_s9, 12288 }
  0x41   : > { %p6991_p6 = scmp.ne.s32.totalorder %s8392_s9, %s6990_s6  ;;  %p6997_p2 = scmp.lt.u32.totalorder %s6990_s6, %s8392_s9 }
  0x43   : > { %p6993_p8 = pnand %p6991_p6, %p7605_p7 }
  0x45   : > { %p6994_p9 = pneg %p6993_p8 }
  0x47   : > { %p6999_p3 = pnand %p6997_p2, %p6994_p9 }
  0x49   : > { %7002 = shalt.err (!%p6999_p3)
}
  0x4a   : > { %s7003_s24 = scalar_lea.vmem %s7587_s26, 12288  ;;  %p7011_p13 = scmp.lt.s32.totalorder %s7587_s26, %s7587_s26 }
  0x4b   : > { %p7004_p10 = scmp.ne.s32.totalorder %s7587_s26, %s7003_s24  ;;  %p7012_p0 = scmp.lt.s32.totalorder %s7003_s24, %s7003_s24 }
  0x4d   : > { %p7006_p11 = pnand %p7004_p10, %p7605_p7  ;;  %p7013_p1 = por %p7012_p0, %p7011_p13 }
  0x4f   : > { %p7007_p12 = pneg %p7006_p11 }
  0x51   : > { %p7014_p4 = pnand %p7013_p1, %p7007_p12 }
  0x53   : > { %7017 = shalt.err (!%p7014_p4)
}
  0x54   : > { %s7425_s20 = smov 384   ;;  %s7426_s23 = smov 24  }
  0x55   : > { %6198 = dma.hbm_to_vmem [thread:$0]  (!%p7591_p5), %s8392_s9, 12288, %s7587_s26, [#allocation9], %s7425_s20, %s7425_s20, %s7426_s23  }
  0x56   : > { %s7427_s4 = smov [#allocation14]   ;;  %s8393_s11 = sld [smem:[#allocation45_spill]] }
  0x57   : > { %s673_s3 = sshll.u32 %s7427_s4, 4  ;;  %s674_s3 = int_to_ptr.vmem [resolvable:$true] %s673_s3 }
  0x5c   : > { %s7018_s28 = scalar_lea.hbm %s8393_s11, 4096 }
  0x5d   : > { %p7019_p6 = scmp.ne.s32.totalorder %s8393_s11, %s7018_s28  ;;  %p7025_p2 = scmp.lt.u32.totalorder %s7018_s28, %s8393_s11 }
  0x5f   : > { %p7021_p8 = pnand %p7019_p6, %p7605_p7 }
  0x61   : > { %p7022_p9 = pneg %p7021_p8 }
  0x63   : > { %p7027_p3 = pnand %p7025_p2, %p7022_p9 }
  0x65   : > { %7030 = shalt.err (!%p7027_p3)
}
  0x66   : > { %s7031_s26 = scalar_lea.vmem %s649_s27, 4096  ;;  %p7039_p13 = scmp.lt.s32.totalorder %s649_s27, %s649_s27 }
  0x67   : > { %p7032_p10 = scmp.ne.s32.totalorder %s649_s27, %s7031_s26  ;;  %p7040_p0 = scmp.lt.s32.totalorder %s7031_s26, %s7031_s26 }
  0x69   : > { %p7034_p11 = pnand %p7032_p10, %p7605_p7  ;;  %p7041_p1 = por %p7040_p0, %p7039_p13 }
  0x6b   : > { %p7035_p12 = pneg %p7034_p11 }
  0x6d   : > { %p7042_p4 = pnand %p7041_p1, %p7035_p12 }
  0x6f   : > { %7045 = shalt.err (!%p7042_p4)
}
  0x70   : > { %s8367_s29 = smov 128   ;;  %s8369_s20 = smov 8  }
  0x71   : > { %6204 = dma.hbm_to_vmem [thread:$0]  (!%p7591_p5), %s8393_s11, 4096, %s649_s27, [#allocation12], %s8367_s29, %s8367_s29, %s8369_s20  }
  0x72   : > { %s8394_s13 = sld [smem:[#allocation46_spill]] }
  0x78   : > { %s7046_s30 = scalar_lea.hbm %s8394_s13, 32 }
  0x79   : > { %p7047_p6 = scmp.ne.s32.totalorder %s8394_s13, %s7046_s30  ;;  %p7053_p2 = scmp.lt.u32.totalorder %s7046_s30, %s8394_s13 }
  0x7b   : > { %p7049_p8 = pnand %p7047_p6, %p7605_p7 }
  0x7d   : > { %p7050_p9 = pneg %p7049_p8 }
  0x7f   : > { %p7055_p3 = pnand %p7053_p2, %p7050_p9 }
  0x81   : > { %7058 = shalt.err (!%p7055_p3)
}
  0x82   : > { %s7059_s24 = scalar_lea.vmem %s674_s3, 32  ;;  %p7067_p13 = scmp.lt.s32.totalorder %s674_s3, %s674_s3 }
  0x83   : > { %p7060_p10 = scmp.ne.s32.totalorder %s674_s3, %s7059_s24  ;;  %p7068_p0 = scmp.lt.s32.totalorder %s7059_s24, %s7059_s24 }
  0x85   : > { %p7062_p11 = pnand %p7060_p10, %p7605_p7  ;;  %p7069_p1 = por %p7068_p0, %p7067_p13 }
  0x87   : > { %p7063_p12 = pneg %p7062_p11 }
  0x89   : > { %p7070_p4 = pnand %p7069_p1, %p7063_p12 }
  0x8b   : > { %7073 = shalt.err (!%p7070_p4)
}
  0x8c   : > { %6210 = dma.hbm_to_vmem [thread:$0]  (!%p7591_p5), %s8394_s13, 32, %s674_s3, [#allocation15]  }
  0x8d   : > { %s7430_s8 = smov [#allocation17]   ;;  %s8395_s15 = sld [smem:[#allocation47_spill]] }
  0x8e   : > { %s694_s19 = sshll.u32 %s7430_s8, 4  ;;  %s695_s19 = int_to_ptr.vmem [resolvable:$true] %s694_s19 }
  0x93   : > { %s7074_s30 = scalar_lea.hbm %s8395_s15, 8192 }
  0x94   : > { %p7075_p6 = scmp.ne.s32.totalorder %s8395_s15, %s7074_s30  ;;  %p7081_p2 = scmp.lt.u32.totalorder %s7074_s30, %s8395_s15 }
  0x96   : > { %p7077_p8 = pnand %p7075_p6, %p7605_p7 }
  0x98   : > { %p7078_p9 = pneg %p7077_p8 }
  0x9a   : > { %p7083_p3 = pnand %p7081_p2, %p7078_p9 }
  0x9c   : > { %7086 = shalt.err (!%p7083_p3)
}
  0x9d   : > { %s7087_s3 = scalar_lea.vmem %s695_s19, 8192  ;;  %p7095_p13 = scmp.lt.s32.totalorder %s695_s19, %s695_s19 }
  0x9e   : > { %p7088_p10 = scmp.ne.s32.totalorder %s695_s19, %s7087_s3  ;;  %p7096_p0 = scmp.lt.s32.totalorder %s7087_s3, %s7087_s3 }
  0xa0   : > { %p7090_p11 = pnand %p7088_p10, %p7605_p7  ;;  %p7097_p1 = por %p7096_p0, %p7095_p13 }
  0xa2   : > { %p7091_p12 = pneg %p7090_p11 }
  0xa4   : > { %p7098_p4 = pnand %p7097_p1, %p7091_p12 }
  0xa6   : > { %7101 = shalt.err (!%p7098_p4)
}
  0xa7   : > { %s7431_s24 = smov 256   ;;  %s7432_s27 = smov 16  }
  0xa8   : > { %6216 = dma.hbm_to_vmem [thread:$0]  (!%p7591_p5), %s8395_s15, 8192, %s695_s19, [#allocation18], %s7431_s24, %s7431_s24, %s7432_s27  }
  0xa9   : > { %s7433_s23 = smov [#allocation20]   ;;  %s7434_s30 = smov [#allocation23]  }
  0xaa   : > { %s718_s0 = sshll.u32 %s7433_s23, 4  ;;  %s748_s4 = sshll.u32 %s7434_s30, 4  ;;  %s719_s0 = int_to_ptr.vmem [resolvable:$true] %s718_s0  ;;  %s7702_s4 = int_to_ptr.vmem [resolvable:$true] %s748_s4 }
  0xab   : > { %s8396_s17 = sld [smem:[#allocation48_spill]] }
  0xb1   : > { %s7102_s28 = scalar_lea.hbm %s8396_s17, 8192 }
  0xb2   : > { %p7103_p6 = scmp.ne.s32.totalorder %s8396_s17, %s7102_s28  ;;  %p7109_p2 = scmp.lt.u32.totalorder %s7102_s28, %s8396_s17 }
  0xb4   : > { %p7105_p8 = pnand %p7103_p6, %p7605_p7 }
  0xb6   : > { %p7106_p9 = pneg %p7105_p8 }
  0xb8   : > { %p7111_p3 = pnand %p7109_p2, %p7106_p9 }
  0xba   : > { %7114 = shalt.err (!%p7111_p3)
}
  0xbb   : > { %s7115_s24 = scalar_lea.vmem %s719_s0, 8192  ;;  %p7123_p13 = scmp.lt.s32.totalorder %s719_s0, %s719_s0 }
  0xbc   : > { %p7116_p10 = scmp.ne.s32.totalorder %s719_s0, %s7115_s24  ;;  %p7124_p0 = scmp.lt.s32.totalorder %s7115_s24, %s7115_s24 }
  0xbe   : > { %p7118_p11 = pnand %p7116_p10, %p7605_p7  ;;  %p7125_p1 = por %p7124_p0, %p7123_p13 }
  0xc0   : > { %p7119_p12 = pneg %p7118_p11 }
  0xc2   : > { %p7126_p4 = pnand %p7125_p1, %p7119_p12 }
  0xc4   : > { %7129 = shalt.err (!%p7126_p4)
}
  0xc5   : > { %s8397_s29 = smov 128   ;;  %s7130_s6 = scalar_lea.hbm %s8355_s21, 4096 }
  0xc6   : > { %6222 = dma.hbm_to_vmem [thread:$0]  (!%p7591_p5), %s8396_s17, 8192, %s719_s0, [#allocation21], %s8397_s29, %s8397_s29, %s8369_s20  }
  0xc7   : > { %p7131_p6 = scmp.ne.s32.totalorder %s8355_s21, %s7130_s6  ;;  %p7137_p2 = scmp.lt.u32.totalorder %s7130_s6, %s8355_s21 }
  0xc9   : > { %p7133_p8 = pnand %p7131_p6, %p7605_p7 }
  0xcb   : > { %p7134_p9 = pneg %p7133_p8 }
  0xcd   : > { %p7139_p3 = pnand %p7137_p2, %p7134_p9 }
  0xcf   : > { %7142 = shalt.err (!%p7139_p3)
}
  0xd0   : > { %s7143_s0 = scalar_lea.vmem %s7702_s4, 4096  ;;  %p7151_p13 = scmp.lt.s32.totalorder %s7702_s4, %s7702_s4 }
  0xd1   : > { %p7144_p10 = scmp.ne.s32.totalorder %s7702_s4, %s7143_s0  ;;  %p7152_p0 = scmp.lt.s32.totalorder %s7143_s0, %s7143_s0 }
  0xd3   : > { %p7146_p11 = pnand %p7144_p10, %p7605_p7  ;;  %p7153_p1 = por %p7152_p0, %p7151_p13 }
  0xd5   : > { %p7147_p12 = pneg %p7146_p11 }
  0xd7   : > { %p7154_p4 = pnand %p7153_p1, %p7147_p12 }
  0xd9   : > { %7157 = shalt.err (!%p7154_p4)
}
  0xda   : > { %6228 = dma.hbm_to_vmem [thread:$0]  (!%p7591_p5), %s8355_s21, 4096, %s7702_s4, [#allocation24], %s8397_s29, %s8397_s29, %s8369_s20  }
  0xdb   : > { %s7435_s27 = smov [#allocation3]   ;;  %s8398_s6 = sld [smem:[#allocation36_spill]] }
  0xdc   : > { %s572_s8 = sshll.u32 %s7435_s27, 4  ;;  %s573_s8 = int_to_ptr.vmem [resolvable:$true] %s572_s8 }
  0xe1   : > { %s7158_s7 = scalar_lea.hbm %s8398_s6, 5120 }
  0xe2   : > { %p7159_p6 = scmp.ne.s32.totalorder %s8398_s6, %s7158_s7  ;;  %p7165_p2 = scmp.lt.u32.totalorder %s7158_s7, %s8398_s6 }
  0xe4   : > { %p7161_p8 = pnand %p7159_p6, %p7605_p7 }
  0xe6   : > { %p7162_p9 = pneg %p7161_p8 }
  0xe8   : > { %p7167_p3 = pnand %p7165_p2, %p7162_p9 }
  0xea   : > { %7170 = shalt.err (!%p7167_p3)
}
  0xeb   : > { %s7171_s4 = scalar_lea.vmem %s573_s8, 5120  ;;  %p7179_p13 = scmp.lt.s32.totalorder %s573_s8, %s573_s8 }
  0xec   : > { %p7172_p10 = scmp.ne.s32.totalorder %s573_s8, %s7171_s4  ;;  %p7180_p0 = scmp.lt.s32.totalorder %s7171_s4, %s7171_s4 }
  0xee   : > { %p7174_p11 = pnand %p7172_p10, %p7605_p7  ;;  %p7181_p1 = por %p7180_p0, %p7179_p13 }
  0xf0   : > { %p7175_p12 = pneg %p7174_p11 }
  0xf2   : > { %p7182_p4 = pnand %p7181_p1, %p7175_p12 }
  0xf4   : > { %7185 = shalt.err (!%p7182_p4)
}
  0xf5   : > { %s7436_s19 = smov 64   ;;  %s7437_s24 = smov 4  }
  0xf6   : > { %6189 = dma.hbm_to_vmem [thread:$0]  (!%p7591_p5), %s8398_s6, 5120, %s573_s8, [#allocation4], %s7436_s19, %s7436_s19, %s7437_s24  }
  0xf7   : > { %s7438_s30 = smov [#allocation7]   ;;  %s7439_s28 = smov [#allocation10]  }
  0xf8   : > { %s608_s7 = sshll.u32 %s7438_s30, 4  ;;  %s638_s3 = sshll.u32 %s7439_s28, 4  ;;  %s609_s7 = int_to_ptr.vmem [resolvable:$true] %s608_s7  ;;  %s639_s3 = int_to_ptr.vmem [resolvable:$true] %s638_s3 }
  0xf9   : > { %s8399_s4 = sld [smem:[#allocation42_spill]] }
  0xff   : > { %s8400_s20 = smov %s8399_s4  ;;  %s7186_s9 = scalar_lea.hbm %s8399_s4, 10240 }
 0x100   : > { %p7187_p6 = scmp.ne.s32.totalorder %s8400_s20, %s7186_s9  ;;  %p7193_p2 = scmp.lt.u32.totalorder %s7186_s9, %s8400_s20 }
 0x102   : > { %p7189_p8 = pnand %p7187_p6, %p7605_p7 }
 0x104   : > { %p7190_p9 = pneg %p7189_p8 }
 0x106   : > { %p7195_p3 = pnand %p7193_p2, %p7190_p9 }
 0x108   : > { %7198 = shalt.err (!%p7195_p3)
}
 0x109   : > { %s7199_s8 = scalar_lea.vmem %s609_s7, 10240  ;;  %p7207_p13 = scmp.lt.s32.totalorder %s609_s7, %s609_s7 }
 0x10a   : > { %p7200_p10 = scmp.ne.s32.totalorder %s609_s7, %s7199_s8  ;;  %p7208_p0 = scmp.lt.s32.totalorder %s7199_s8, %s7199_s8 }
 0x10c   : > { %p7202_p11 = pnand %p7200_p10, %p7605_p7  ;;  %p7209_p1 = por %p7208_p0, %p7207_p13 }
 0x10e   : > { %p7203_p12 = pneg %p7202_p11 }
 0x110   : > { %p7210_p4 = pnand %p7209_p1, %p7203_p12 }
 0x112   : > { %7213 = shalt.err (!%p7210_p4)
}
 0x113   : > { %s8401_s11 = smov 8   ;;  %s7214_s19 = scalar_lea.hbm %s8344_s10, 96 }
 0x114   : > { %6195 = dma.hbm_to_vmem [thread:$0]  (!%p7591_p5), %s8400_s20, 10240, %s609_s7, [#allocation6], %s8397_s29, %s8397_s29, %s8401_s11  }
 0x115   : > { %p7215_p6 = scmp.ne.s32.totalorder %s8344_s10, %s7214_s19  ;;  %p7221_p2 = scmp.lt.u32.totalorder %s7214_s19, %s8344_s10 }
 0x117   : > { %p7217_p8 = pnand %p7215_p6, %p7605_p7 }
 0x119   : > { %p7218_p9 = pneg %p7217_p8 }
 0x11b   : > { %p7223_p3 = pnand %p7221_p2, %p7218_p9 }
 0x11d   : > { %7226 = shalt.err (!%p7223_p3)
}
 0x11e   : > { %s7227_s28 = scalar_lea.vmem %s639_s3, 96  ;;  %p7235_p13 = scmp.lt.s32.totalorder %s639_s3, %s639_s3 }
 0x11f   : > { %p7228_p10 = scmp.ne.s32.totalorder %s639_s3, %s7227_s28  ;;  %p7236_p0 = scmp.lt.s32.totalorder %s7227_s28, %s7227_s28 }
 0x121   : > { %p7230_p11 = pnand %p7228_p10, %p7605_p7  ;;  %p7237_p1 = por %p7236_p0, %p7235_p13 }
 0x123   : > { %p7231_p12 = pneg %p7230_p11 }
 0x125   : > { %p7238_p4 = pnand %p7237_p1, %p7231_p12 }
 0x127   : > { %7241 = shalt.err (!%p7238_p4)
}
 0x128   : > { %6201 = dma.hbm_to_vmem [thread:$0]  (!%p7591_p5), %s8344_s10, 96, %s639_s3, [#allocation9]  }
 0x129   : > { %s7440_s26 = smov [#allocation13]   ;;  %s7441_s4 = smov [#allocation16]  }
 0x12a   : > { %s662_s0 = sshll.u32 %s7440_s26, 4  ;;  %s684_s8 = sshll.u32 %s7441_s4, 4  ;;  %s663_s0 = int_to_ptr.vmem [resolvable:$true] %s662_s0  ;;  %s685_s8 = int_to_ptr.vmem [resolvable:$true] %s684_s8 }
 0x12b   : > { %s7242_s9 = scalar_lea.hbm %s8346_s12, 32 }
 0x12c   : > { %p7243_p6 = scmp.ne.s32.totalorder %s8346_s12, %s7242_s9  ;;  %p7249_p2 = scmp.lt.u32.totalorder %s7242_s9, %s8346_s12 }
 0x12e   : > { %p7245_p8 = pnand %p7243_p6, %p7605_p7 }
 0x130   : > { %p7246_p9 = pneg %p7245_p8 }
 0x132   : > { %p7251_p3 = pnand %p7249_p2, %p7246_p9 }
 0x134   : > { %7254 = shalt.err (!%p7251_p3)
}
 0x135   : > { %s7255_s3 = scalar_lea.vmem %s663_s0, 32  ;;  %p7263_p13 = scmp.lt.s32.totalorder %s663_s0, %s663_s0 }
 0x136   : > { %p7256_p10 = scmp.ne.s32.totalorder %s663_s0, %s7255_s3  ;;  %p7264_p0 = scmp.lt.s32.totalorder %s7255_s3, %s7255_s3 }
 0x138   : > { %p7258_p11 = pnand %p7256_p10, %p7605_p7  ;;  %p7265_p1 = por %p7264_p0, %p7263_p13 }
 0x13a   : > { %p7259_p12 = pneg %p7258_p11 }
 0x13c   : > { %p7266_p4 = pnand %p7265_p1, %p7259_p12 }
 0x13e   : > { %7269 = shalt.err (!%p7266_p4)
}
 0x13f   : > { %6207 = dma.hbm_to_vmem [thread:$0]  (!%p7591_p5), %s8346_s12, 32, %s663_s0, [#allocation12]  }
 0x140   : > { %s7270_s29 = scalar_lea.hbm %s8348_s14, 32 }
 0x141   : > { %p7271_p6 = scmp.ne.s32.totalorder %s8348_s14, %s7270_s29  ;;  %p7277_p2 = scmp.lt.u32.totalorder %s7270_s29, %s8348_s14 }
 0x143   : > { %p7273_p8 = pnand %p7271_p6, %p7605_p7 }
 0x145   : > { %p7274_p9 = pneg %p7273_p8 }
 0x147   : > { %p7279_p3 = pnand %p7277_p2, %p7274_p9 }
 0x149   : > { %7282 = shalt.err (!%p7279_p3)
}
 0x14a   : > { %s7283_s13 = scalar_lea.vmem %s685_s8, 32  ;;  %p7291_p13 = scmp.lt.s32.totalorder %s685_s8, %s685_s8 }
 0x14b   : > { %p7284_p10 = scmp.ne.s32.totalorder %s685_s8, %s7283_s13  ;;  %p7292_p0 = scmp.lt.s32.totalorder %s7283_s13, %s7283_s13 }
 0x14d   : > { %p7286_p11 = pnand %p7284_p10, %p7605_p7  ;;  %p7293_p1 = por %p7292_p0, %p7291_p13 }
 0x14f   : > { %p7287_p12 = pneg %p7286_p11 }
 0x151   : > { %p7294_p4 = pnand %p7293_p1, %p7287_p12 }
 0x153   : > { %7297 = shalt.err (!%p7294_p4)
}
 0x154   : > { %6213 = dma.hbm_to_vmem [thread:$0]  (!%p7591_p5), %s8348_s14, 32, %s685_s8, [#allocation15]  }
 0x155   : > { %s7442_s15 = smov [#allocation19]   ;;  %s7443_s19 = smov [#allocation22]  }
 0x156   : > { %s708_s17 = sshll.u32 %s7442_s15, 4  ;;  %s732_s24 = sshll.u32 %s7443_s19, 4  ;;  %s709_s17 = int_to_ptr.vmem [resolvable:$true] %s708_s17  ;;  %s733_s24 = int_to_ptr.vmem [resolvable:$true] %s732_s24 }
 0x157   : > { %s7298_s23 = scalar_lea.hbm %s8350_s16, 64 }
 0x158   : > { %p7299_p6 = scmp.ne.s32.totalorder %s8350_s16, %s7298_s23  ;;  %p7305_p2 = scmp.lt.u32.totalorder %s7298_s23, %s8350_s16 }
 0x15a   : > { %p7301_p8 = pnand %p7299_p6, %p7605_p7 }
 0x15c   : > { %p7302_p9 = pneg %p7301_p8 }
 0x15e   : > { %p7307_p3 = pnand %p7305_p2, %p7302_p9 }
 0x160   : > { %7310 = shalt.err (!%p7307_p3)
}
 0x161   : > { %s7311_s8 = scalar_lea.vmem %s709_s17, 64  ;;  %p7319_p13 = scmp.lt.s32.totalorder %s709_s17, %s709_s17 }
 0x162   : > { %p7312_p10 = scmp.ne.s32.totalorder %s709_s17, %s7311_s8  ;;  %p7320_p0 = scmp.lt.s32.totalorder %s7311_s8, %s7311_s8 }
 0x164   : > { %p7314_p11 = pnand %p7312_p10, %p7605_p7  ;;  %p7321_p1 = por %p7320_p0, %p7319_p13 }
 0x166   : > { %p7315_p12 = pneg %p7314_p11 }
 0x168   : > { %p7322_p4 = pnand %p7321_p1, %p7315_p12 }
 0x16a   : > { %7325 = shalt.err (!%p7322_p4)
}
 0x16b   : > { %6219 = dma.hbm_to_vmem [thread:$0]  (!%p7591_p5), %s8350_s16, 64, %s709_s17, [#allocation18]  }
 0x16c   : > { %s7326_s0 = scalar_lea.hbm %s8352_s18, 32 }
 0x16d   : > { %p7327_p6 = scmp.ne.s32.totalorder %s8352_s18, %s7326_s0  ;;  %p7333_p2 = scmp.lt.u32.totalorder %s7326_s0, %s8352_s18 }
 0x16f   : > { %p7329_p8 = pnand %p7327_p6, %p7605_p7 }
 0x171   : > { %p7330_p9 = pneg %p7329_p8 }
 0x173   : > { %p7335_p3 = pnand %p7333_p2, %p7330_p9 }
 0x175   : > { %7338 = shalt.err (!%p7335_p3)
}
 0x176   : > { %s7339_s27 = scalar_lea.vmem %s733_s24, 32  ;;  %p7347_p13 = scmp.lt.s32.totalorder %s733_s24, %s733_s24 }
 0x177   : > { %p7340_p10 = scmp.ne.s32.totalorder %s733_s24, %s7339_s27  ;;  %p7348_p0 = scmp.lt.s32.totalorder %s7339_s27, %s7339_s27 }
 0x179   : > { %p7342_p11 = pnand %p7340_p10, %p7605_p7  ;;  %p7349_p1 = por %p7348_p0, %p7347_p13 }
 0x17b   : > { %p7343_p12 = pneg %p7342_p11 }
 0x17d   : > { %p7350_p4 = pnand %p7349_p1, %p7343_p12 }
 0x17f   : > { %7353 = shalt.err (!%p7350_p4)
}
 0x180   : > { %6225 = dma.hbm_to_vmem [thread:$0]  (!%p7591_p5), %s8352_s18, 32, %s733_s24, [#allocation21]  }
 0x181   : > { %s7444_s30 = smov [#allocation25]   ;;  %s7354_s8 = scalar_lea.hbm %s8356_s22, 32 }
 0x182   : > { %s762_s28 = sshll.u32 %s7444_s30, 4  ;;  %p7355_p6 = scmp.ne.s32.totalorder %s8356_s22, %s7354_s8  ;;  %s763_s28 = int_to_ptr.vmem [resolvable:$true] %s762_s28 }
 0x183   : > { %p7361_p2 = scmp.lt.u32.totalorder %s7354_s8, %s8356_s22 }
 0x184   : > { %p7357_p8 = pnand %p7355_p6, %p7605_p7 }
 0x186   : > { %p7358_p9 = pneg %p7357_p8 }
 0x188   : > { %p7363_p3 = pnand %p7361_p2, %p7358_p9 }
 0x18a   : > { %7366 = shalt.err (!%p7363_p3)
}
 0x18b   : > { %s7367_s24 = scalar_lea.vmem %s763_s28, 32  ;;  %p7375_p13 = scmp.lt.s32.totalorder %s763_s28, %s763_s28 }
 0x18c   : > { %p7368_p10 = scmp.ne.s32.totalorder %s763_s28, %s7367_s24  ;;  %p7376_p0 = scmp.lt.s32.totalorder %s7367_s24, %s7367_s24 }
 0x18e   : > { %p7370_p11 = pnand %p7368_p10, %p7605_p7  ;;  %p7377_p1 = por %p7376_p0, %p7375_p13 }
 0x190   : > { %p7371_p12 = pneg %p7370_p11 }
 0x192   : > { %p7378_p4 = pnand %p7377_p1, %p7371_p12 }
 0x194   : > { %7381 = shalt.err (!%p7378_p4)
}
 0x195   : > { %6231 = dma.hbm_to_vmem [thread:$0]  (!%p7591_p5), %s8356_s22, 32, %s763_s28, [#allocation24]  }
 0x196   : > { %p8402_p6 = scmp.ne.s32.totalorder %s8388_s5, 0 }
 0x197   : > { %p8403_p8 = scmp.eq.s32.totalorder (!%p8402_p6), %s7576_s25, 0 }
 0x198   : > { %783 = sbr.rel (%p8402_p6) target bundleno = 5924 (0x1724), region = 112 }
 0x19f   : > { %7387 = dma.done.wait (%p8403_p8), [#allocation4], 5120   ;;  %p8404_p7 = pmov %p8403_p8 }
 0x1a1   : > { %7389 = vsyncadd (%p8404_p7), [#allocation4], 4294962176  ;;  %p8405_p9 = pmov %p8404_p7 }
 0x1a2   : > { %p8406_p2 = pmov %p8404_p7 }
 0x1a3   : > { %7391 = dma.done.wait (%p8405_p9), [#allocation6], 10256  }
 0x1a4   : > { %7393 = vsyncadd (%p8406_p2), [#allocation6], 4294957040  ;;  %p8407_p3 = pmov %p8406_p2 }
 0x1a5   : > { %p8408_p5 = pmov %p8406_p2 }
 0x1a6   : > { %7395 = dma.done.wait (%p8407_p3), [#allocation9], 12384  }
 0x1a7   : > { %7397 = vsyncadd (%p8408_p5), [#allocation9], 4294954912  ;;  %p8409_p10 = pmov %p8406_p2 }
 0x1a8   : > { %p8410_p11 = pmov %p8406_p2 }
 0x1a9   : > { %7399 = dma.done.wait (%p8409_p10), [#allocation12], 4128  }
 0x1aa   : > { %7401 = vsyncadd (%p8410_p11), [#allocation12], 4294963168  ;;  %p8411_p12 = pmov %p8406_p2 }
 0x1ab   : > { %p8412_p13 = pmov %p8406_p2 }
 0x1ac   : > { %7403 = dma.done.wait (%p8411_p12), [#allocation15], 64  }
 0x1ad   : > { %7405 = vsyncadd (%p8412_p13), [#allocation15], 4294967232  ;;  %p8413_p0 = pmov %p8406_p2 }
 0x1af   : > { %7407 = dma.done.wait (%p8413_p0), [#allocation18], 8256   ;;  %p8414_p1 = pmov %p8413_p0 }
 0x1b0   : > { %p8415_p4 = pmov %p8413_p0 }
 0x1b1   : > { %7409 = vsyncadd (%p8414_p1), [#allocation18], 4294959040 }
 0x1b2   : > { %7411 = dma.done.wait (%p8415_p4), [#allocation21], 8224   ;;  %p8416_p6 = pmov %p8413_p0 }
 0x1b3   : > { %p8417_p8 = pmov %p8413_p0 }
 0x1b4   : > { %7413 = vsyncadd (%p8416_p6), [#allocation21], 4294959072 }
 0x1b5   : > { %7415 = dma.done.wait (%p8417_p8), [#allocation24], 4128   ;;  %p8418_p7 = pmov %p8413_p0 }
 0x1b6   : > { %v6308_v0 = vld [vmem:[#allocation3 + $0x40] sm:$0xff]   ;;  %v6312_v4 = vld [vmem:[#allocation3 + $0x48] sm:$0xff]   ;;  %v6316_v8 = vld [vmem:[#allocation3 + $0x50] sm:$0xff]   ;;  %p902_p9 = scmp.lt.s32.totalorder %s7576_s25, 1  ;;  %s8419_s15 = sld [smem:[#allocation35_spill]]  ;;  %v7445_v33 = vmov 0.0  }
 0x1b7   : > { %7417 = vsyncadd (%p8418_p7), [#allocation24], 4294963168  ;;  %v6309_v1 = vld [vmem:[#allocation3] sm:$0xff]   ;;  %5910 = vmatprep.subr.bf16.mxu0 %v6308_v0  ;;  %v6313_v5 = vld [vmem:[#allocation3 + $0x8] sm:$0xff]   ;;  %vm924_vm0 = vsmask.f32 7424 }
 0x1b8   : > { %v6310_v2 = vld [vmem:[#allocation3 + $0xc0] sm:$0xff]   ;;  %5911 = vmatpush3.bf16.msra.mxu0 %v6309_v1  ;;  %v6314_v6 = vld [vmem:[#allocation3 + $0xc8] sm:$0xff]   ;;  %v6317_v9 = vld [vmem:[#allocation3 + $0x10] sm:$0xff]   ;;  %s8430_s25 = smov (!%p902_p9, %s7576_s25), 1  ;;  %vm938_vm1 = vcmask 1046528   ;;  %vm7446_vm3 = vmmov 0  }
 0x1b9   : > { %v6311_v3 = vld [vmem:[#allocation3 + $0x80] sm:$0xff]   ;;  %5932 = vmatprep.subr.bf16.mxu1 %v6310_v2  ;;  %5912 = vmatprep.subr.bf16.mxu0 %v6312_v4  ;;  %v6315_v7 = vld [vmem:[#allocation3 + $0x88] sm:$0xff]   ;;  %v6318_v10 = vld [vmem:[#allocation3 + $0xd0] sm:$0xff]   ;;  %s6125_s5 = smul.u32 12, %s8430_s25  ;;  %vm943_vm2 = vsmask.f32 6400 }
 0x1ba   : > { %5933 = vmatpush3.bf16.msra.mxu1 %v6311_v3  ;;  %v6319_v11 = vld [vmem:[#allocation3 + $0x90] sm:$0xff]   ;;  %v6320_v12 = vld [vmem:[#allocation3 + $0x58] sm:$0xff]   ;;  %v6324_v16 = vld [vmem:[#allocation3 + $0x60] sm:$0xff]   ;;  %vm954_vm4 = vcmask 1045504   ;;  %s8420_s17 = sld [smem:[#allocation38_spill]]  ;;  %vm1777_vm5 = vcmask 1044480  }
 0x1bb   : > { %5934 = vmatprep.subr.bf16.mxu1 %v6314_v6  ;;  %v6321_v13 = vld [vmem:[#allocation3 + $0x18] sm:$0xff]   ;;  %v6325_v17 = vld [vmem:[#allocation3 + $0x20] sm:$0xff]   ;;  %v6328_v20 = vld [vmem:[#allocation3 + $0x68] sm:$0xff]   ;;  %s8424_s23 = sld [smem:[#allocation43_spill]]  ;;  %vm3075_vm6 = vcmask 523264   ;;  %vm3123_vm7 = vcmask 130048  }
 0x1bc   : > { %5913 = vmatpush3.bf16.msra.mxu0 %v6313_v5  ;;  %v6322_v14 = vld [vmem:[#allocation3 + $0xd8] sm:$0xff]   ;;  %v6326_v18 = vld [vmem:[#allocation3 + $0xe0] sm:$0xff]   ;;  %v6329_v21 = vld [vmem:[#allocation3 + $0x28] sm:$0xff]   ;;  %s906_s19 = scalar_lea.vmem %s8419_s15, %s6125_s5  ;;  %s8421_s15 = sld [smem:[#allocation40_spill]] }
 0x1bd   : > { %5914 = vmatprep.subr.bf16.mxu0 %v6316_v8  ;;  %v6323_v15 = vld [vmem:[#allocation3 + $0x98] sm:$0xff]   ;;  %v6327_v19 = vld [vmem:[#allocation3 + $0xa0] sm:$0xff]   ;;  %v6330_v22 = vld [vmem:[#allocation3 + $0xe8] sm:$0xff]   ;;  %s8422_s5 = sld [smem:[#allocation39_spill]]  ;;  %s7448_s30 = smov 64  }
 0x1be   : > { %5935 = vmatpush3.bf16.msra.mxu1 %v6315_v7  ;;  %v6331_v23 = vld [vmem:[#allocation3 + $0xa8] sm:$0xff]   ;;  %v6332_v24 = vld [vmem:[#allocation3 + $0x70] sm:$0xff]   ;;  %v6336_v28 = vld [vmem:[#allocation3 + $0x78] sm:$0xff]   ;;  %s8425_s7 = sld [smem:[#allocation49_spill]]  ;;  %s8426_s4 = sld [smem:[#allocation50_spill]] }
 0x1bf   : > { %5936 = vmatprep.subr.bf16.mxu1 %v6318_v10  ;;  %v6333_v25 = vld [vmem:[#allocation3 + $0x30] sm:$0xff]   ;;  %v6337_v29 = vld [vmem:[#allocation3 + $0x38] sm:$0xff]   ;;  %v6342_v50 = vld [vmem:[#allocation3 + $0x100] sm:$0xff]   ;;  %s5472_s11 = sshll.u32 %s8430_s25, 1  ;;  %s8427_s0 = sld [smem:[#allocation51_spill]] }
 0x1c0   : > { %5915 = vmatpush3.bf16.msra.mxu0 %v6317_v9  ;;  %v6334_v26 = vld [vmem:[#allocation3 + $0xf0] sm:$0xff]   ;;  %v6338_v30 = vld [vmem:[#allocation3 + $0xf8] sm:$0xff]   ;;  %v6343_v54 = vld [vmem:[#allocation3 + $0x108] sm:$0xff]  }
 0x1c1   : > { %5916 = vmatprep.subr.bf16.mxu0 %v6320_v12  ;;  %v6335_v27 = vld [vmem:[#allocation3 + $0xb0] sm:$0xff]   ;;  %v6340_v32 = vld [vmem:[%s906_s19 + $0x8] ss:$0 sps:$4 sm:$0x33]   ;;  %v6346_v57 = vld [vmem:[#allocation3 + $0x120] sm:$0xff]  }
 0x1c2   : > { %5937 = vmatpush3.bf16.msra.mxu1 %v6319_v11  ;;  %v6339_v31 = vld [vmem:[%s906_s19] sm:$0xff]   ;;  %v6341_v34 = vld [vmem:[#allocation3 + $0xb8] sm:$0xff]   ;;  %v933_v37 = vshll.u32 %v6340_v32, 16  ;;  %v947_v38 = vshrl.u32 %v6340_v32, 16  ;;  %v940_v40 = vrot.slane %v6340_v32, 1  ;;  %v6347_v58 = vld [vmem:[#allocation3 + $0x128] sm:$0xff]  }
 0x1c3   : > { %5938 = vmatprep.subr.bf16.mxu1 %v6322_v14  ;;  %v926_v35 = vshrl.u32 %v6339_v31, 16  ;;  %v928_v36 = vshll.u32 %v6339_v31, 16  ;;  %v939_v39 = vrot.slane %v6339_v31, 1  ;;  %v6344_v55 = vld [vmem:[#allocation3 + $0x110] sm:$0xff]   ;;  %v6345_v56 = vld [vmem:[#allocation3 + $0x118] sm:$0xff]   ;;  %v955_v61 = vrot.slane %v6339_v31, 2 }
 0x1c4   : > { %5917 = vmatpush3.bf16.msra.mxu0 %v6321_v13  ;;  %v935_v42 = vrot.slane %v933_v37, 1  ;;  %v949_v45 = vrot.slane %v947_v38, 1  ;;  %v950_v46 = vrot.slane %v933_v37, 2  ;;  %v6348_v59 = vld [vmem:[#allocation3 + $0x130] sm:$0xff]   ;;  %v6349_v60 = vld [vmem:[#allocation3 + $0x138] sm:$0xff]   ;;  %v956_v62 = vrot.slane %v6340_v32, 2 }
 0x1c5   : > { %5918 = vmatprep.subr.bf16.mxu0 %v6324_v16  ;;  %v930_v41 = vrot.slane %v928_v36, 1  ;;  %v944_v43 = vrot.slane %v926_v35, 1  ;;  %v945_v44 = vrot.slane %v928_v36, 2  ;;  %v941_v52 = vsel %vm938_vm1, %v939_v39, %v940_v40  ;;  %v6350_v0 = vld [vmem:[%s8420_s17] sm:$0xff]   ;;  %v6351_v1 = vld [vmem:[%s8420_s17 + $0x8] sm:$0xff]   ;;  %v6352_v2 = vld [vmem:[%s8420_s17 + $0x10] sm:$0xff]   ;;  %s910_s9 = scalar_lea.vmem %s8427_s0, %s5472_s11 }
 0x1c6   : > { %5939 = vmatpush3.bf16.msra.mxu1 %v6323_v15  ;;  %v951_v49 = vor.u32 %v950_v46, %v949_v45  ;;  %v957_v63 = vsel %vm954_vm4, %v955_v61, %v956_v62  ;;  %v6353_v3 = vld [vmem:[%s8420_s17 + $0x18] sm:$0xff]   ;;  %v6354_v4 = vld [vmem:[%s8420_s17 + $0x20] sm:$0xff]   ;;  %v6355_v5 = vld [vmem:[%s8420_s17 + $0x28] sm:$0xff]   ;;  %s8423_s19 = sld [smem:[#allocation41_spill]] }
 0x1c7   : > { %5940 = vmatprep.subr.bf16.mxu1 %v6326_v18  ;;  %v931_v47 = vor.u32 %v930_v41, %v926_v35  ;;  %v946_v48 = vor.u32 %v945_v44, %v944_v43  ;;  %v6356_v6 = vld [vmem:[%s8420_s17 + $0x30] sm:$0xff]   ;;  %v6357_v7 = vld [vmem:[%s8420_s17 + $0x38] sm:$0xff]   ;;  %v6358_v8 = vld [vmem:[%s8421_s15] sm:$0xff]  }
 0x1c8   : > { %5919 = vmatpush3.bf16.msra.mxu0 %v6325_v17  ;;  %v6359_v9 = vld [vmem:[%s8421_s15 + $0x8] sm:$0xff]   ;;  %v6360_v10 = vld [vmem:[%s8421_s15 + $0x10] sm:$0xff]   ;;  %v6361_v11 = vld [vmem:[%s8421_s15 + $0x18] sm:$0xff]  }
 0x1c9   : > { %5920 = vmatprep.subr.bf16.mxu0 %v6328_v20  ;;  %v936_v51 = vsel %vm924_vm0, %v931_v47, %v935_v42  ;;  %v952_v53 = vsel %vm943_vm2, %v946_v48, %v951_v49  ;;  %v6362_v12 = vld [vmem:[%s8421_s15 + $0x20] sm:$0xff]   ;;  %v6363_v13 = vld [vmem:[%s8421_s15 + $0x28] sm:$0xff]   ;;  %v5475_v15 = vld [vmem:[#allocation5] ss:$0 sm:$0xff] }
 0x1ca   : > { %5941 = vmatpush3.bf16.msra.mxu1 %v6327_v19  ;;  %1318 = vmatprep.mubr.bf16.mxu0 %v936_v51  ;;  %v6364_v49 = vld [vmem:[%s8421_s15 + $0x30] sm:$0xff]  }
 0x1cb   : > { %5942 = vmatprep.subr.bf16.mxu1 %v6330_v22  ;;  %1359 = vmatprep.mubr.bf16.mxu1 %v952_v53  ;;  %v6366_v51 = vld [vmem:[#allocation7] ss:$8 sps:$4 sm:$0xff]   ;;  %v6371_v53 = vld [vmem:[#allocation7 + $0x14] ss:$8 sps:$4 sm:$0xff]  }
 0x1cc   : > { %5921 = vmatpush3.bf16.msra.mxu0 %v6329_v21 }
 0x1cd   : > { %5922 = vmatprep.subr.bf16.mxu0 %v6332_v24 }
 0x1ce   : > { %5943 = vmatpush3.bf16.msra.mxu1 %v6331_v23 }
 0x1cf   : > { %5944 = vmatprep.subr.bf16.mxu1 %v6334_v26 }
 0x1d0   : > { %5923 = vmatpush3.bf16.msra.mxu0 %v6333_v25 }
 0x1d1   : > { %5924 = vmatprep.subr.bf16.mxu0 %v6336_v28 }
 0x1d2   : > { %5945 = vmatpush3.bf16.msra.mxu1 %v6335_v27 }
 0x1d3   : > { %5946 = vmatprep.subr.bf16.mxu1 %v6338_v30 }
 0x1d4   : > { %5925 = vmatpush3.bf16.msra.mxu0 %v6337_v29 }
 0x1d5   : > { %5997 = vmatprep.subr.bf16.mxu0 %v7445_v33 }
 0x1d6   : > { %5947 = vmatpush3.bf16.msra.mxu1 %v6341_v34 }
 0x1d7   : > { %6017 = vmatprep.subr.bf16.mxu1 %v7445_v33  ;;  %1319 = vmatmul.mubr.bf16.vlgmr.msra.gmra.mrb[0].mxu0 %v6339_v31 }
 0x1d8   : > { %5998 = vmatpush3.bf16.msra.mxu0 %v6342_v50  ;;  %6013 = vmatprep.mubr.msk.bf16.mxu0 %vm7446_vm3, %v7445_v33  ;;  %v6365_v50 = vld [vmem:[%s8421_s15 + $0x38] sm:$0xff]  }
 0x1d9   : > { %1360 = vmatmul.mubr.bf16.vlgmr.msra.gmra.mrb[0].mxu1 %v941_v52  ;;  %5999 = vmatprep.subr.bf16.mxu0 %v7445_v33  ;;  %v6368_v52 = vld [vmem:[#allocation7 + $0x4] ss:$8 sps:$4 sm:$0xff]  }
 0x1da   : > { %6033 = vmatprep.mubr.msk.bf16.mxu1 %vm7446_vm3, %v7445_v33  ;;  %6018 = vmatpush3.bf16.msra.mxu1 %v6350_v0  ;;  %v6372_v0 = vld [vmem:[#allocation7 + $0x20] ss:$8 sps:$4 sm:$0xff]  }
 0x1db   : > { %6019 = vmatprep.subr.bf16.mxu1 %v7445_v33 }
 0x1dc   : > { %6000 = vmatpush3.bf16.msra.mxu0 %v6343_v54  ;;  %v6369_v54 = vld [vmem:[#allocation7 + $0x10] ss:$8 sps:$4 sm:$0xff]  }
 0x1dd   : > { %6001 = vmatprep.subr.bf16.mxu0 %v7445_v33 }
 0x1de   : > { %6020 = vmatpush3.bf16.msra.mxu1 %v6351_v1  ;;  %v6377_v1 = vld [vmem:[#allocation7 + $0x34] ss:$8 sps:$4 sm:$0xff]  }
 0x1df   : > { %6021 = vmatprep.subr.bf16.mxu1 %v7445_v33 }
 0x1e0   : > { %6002 = vmatpush3.bf16.msra.mxu0 %v6344_v55  ;;  %v1437_v55 = vld [vmem:[%s8422_s5] sm:$0x1] }
 0x1e1   : > { %6003 = vmatprep.subr.bf16.mxu0 %v7445_v33 }
 0x1e2   : > { %6022 = vmatpush3.bf16.msra.mxu1 %v6352_v2  ;;  %v6375_v2 = vld [vmem:[#allocation7 + $0x30] ss:$8 sps:$4 sm:$0xff]  }
 0x1e3   : > { %6023 = vmatprep.subr.bf16.mxu1 %v7445_v33 }
 0x1e4   : > { %6004 = vmatpush3.bf16.msra.mxu0 %v6345_v56 }
 0x1e5   : > { %6005 = vmatprep.subr.bf16.mxu0 %v7445_v33 }
 0x1e6   : > { %6024 = vmatpush3.bf16.msra.mxu1 %v6353_v3  ;;  %v6380_v3 = vld [vmem:[#allocation7 + $0x44] ss:$8 sps:$4 sm:$0xff]  }
 0x1e7   : > { %6025 = vmatprep.subr.bf16.mxu1 %v7445_v33 }
 0x1e8   : > { %6006 = vmatpush3.bf16.msra.mxu0 %v6346_v57 }
 0x1e9   : > { %6007 = vmatprep.subr.bf16.mxu0 %v7445_v33 }
 0x1ea   : > { %6026 = vmatpush3.bf16.msra.mxu1 %v6354_v4  ;;  %v6378_v4 = vld [vmem:[#allocation7 + $0x40] ss:$8 sps:$4 sm:$0xff]  }
 0x1eb   : > { %6027 = vmatprep.subr.bf16.mxu1 %v7445_v33 }
 0x1ec   : > { %6008 = vmatpush3.bf16.msra.mxu0 %v6347_v58 }
 0x1ed   : > { %6009 = vmatprep.subr.bf16.mxu0 %v7445_v33 }
 0x1ee   : > { %6028 = vmatpush3.bf16.msra.mxu1 %v6355_v5  ;;  %v6383_v5 = vld [vmem:[#allocation7 + $0x54] ss:$8 sps:$4 sm:$0xff]  }
 0x1ef   : > { %6029 = vmatprep.subr.bf16.mxu1 %v7445_v33 }
 0x1f0   : > { %6010 = vmatpush3.bf16.msra.mxu0 %v6348_v59 }
 0x1f1   : > { %6011 = vmatprep.subr.bf16.mxu0 %v7445_v33 }
 0x1f2   : > { %6030 = vmatpush3.bf16.msra.mxu1 %v6356_v6  ;;  %v6381_v6 = vld [vmem:[#allocation7 + $0x50] ss:$8 sps:$4 sm:$0xff]  }
 0x1f3   : > { %6031 = vmatprep.subr.bf16.mxu1 %v7445_v33 }
 0x1f4   : > { %6012 = vmatpush3.bf16.msra.mxu0 %v6349_v60 }
 0x1f5   : > { %6037 = vmatprep.subr.bf16.mxu0 %v7445_v33 }
 0x1f6   : > { %6032 = vmatpush3.bf16.msra.mxu1 %v6357_v7  ;;  %v6386_v7 = vld [vmem:[#allocation7 + $0x64] ss:$8 sps:$4 sm:$0xff]  }
 0x1f7   : > { %6014 = vmatmul.mubr.bf16.vlgmr.msra.gmra.mrb[4].mxu0 %v957_v63  ;;  %2198 = vmatprep.subr.bf16.mxu1 %v6368_v52  ;;  %v6374_v63 = vld [vmem:[#allocation7 + $0x24] ss:$8 sps:$4 sm:$0xff]  }
 0x1f8   : > { %6053 = vmatprep.mubr.msk.bf16.mxu0 %vm7446_vm3, %v7445_v33  ;;  %6038 = vmatpush3.bf16.msra.mxu0 %v6358_v8  ;;  %v6384_v8 = vld [vmem:[#allocation7 + $0x60] ss:$8 sps:$4 sm:$0xff]   ;;  %v6494_v52 = vld [vmem:[#allocation8 + $0x64] ss:$24 sps:$4 sm:$0xff]  }
 0x1f9   : > { %6039 = vmatprep.subr.bf16.mxu0 %v7445_v33 }
 0x1fc   : > { %6040 = vmatpush3.bf16.msra.mxu0 %v6359_v9  ;;  %v6389_v9 = vld [vmem:[#allocation7 + $0x74] ss:$8 sps:$4 sm:$0xff]  }
 0x1fd   : > { %6041 = vmatprep.subr.bf16.mxu0 %v7445_v33 }
 0x200   : > { %6042 = vmatpush3.bf16.msra.mxu0 %v6360_v10  ;;  %v6387_v10 = vld [vmem:[#allocation7 + $0x70] ss:$8 sps:$4 sm:$0xff]  }
 0x201   : > { %6043 = vmatprep.subr.bf16.mxu0 %v7445_v33 }
 0x204   : > { %6044 = vmatpush3.bf16.msra.mxu0 %v6361_v11  ;;  %v6392_v11 = vld [vmem:[#allocation7 + $0x84] ss:$8 sps:$4 sm:$0xff]  }
 0x205   : > { %6045 = vmatprep.subr.bf16.mxu0 %v7445_v33 }
 0x208   : > { %6046 = vmatpush3.bf16.msra.mxu0 %v6362_v12  ;;  %v6390_v12 = vld [vmem:[#allocation7 + $0x80] ss:$8 sps:$4 sm:$0xff]  }
 0x209   : > { %6047 = vmatprep.subr.bf16.mxu0 %v7445_v33 }
 0x20c   : > { %6048 = vmatpush3.bf16.msra.mxu0 %v6363_v13  ;;  %v6395_v13 = vld [vmem:[#allocation7 + $0x94] ss:$8 sps:$4 sm:$0xff]  }
 0x20d   : > { %6049 = vmatprep.subr.bf16.mxu0 %v7445_v33 }
 0x210   : > { %6050 = vmatpush3.bf16.msra.mxu0 %v6364_v49  ;;  %v6491_v49 = vld [vmem:[#allocation8 + $0x34] ss:$24 sps:$4 sm:$0xff]  }
 0x211   : > { %6051 = vmatprep.subr.bf16.mxu0 %v7445_v33 }
 0x214   : > { %6052 = vmatpush3.bf16.msra.mxu0 %v6365_v50  ;;  %v6489_v50 = vld [vmem:[#allocation8 + $0x30] ss:$24 sps:$4 sm:$0xff]  }
 0x2aa   : > { %v5926_v14 = vpop.f32.mrb[0].mxu0 }
 0x2ab   : > { %v5927_v16 = vpop.f32.mrb[1].mxu0 }
 0x2ac   : > { %v5948_v17 = vpop.f32.mrb[0].mxu1  ;;  %v5928_v18 = vadd.f32 %v5927_v16, %v5926_v14  ;;  %v5929_v19 = vpop.f32.mrb[2].mxu0  ;;  %v6393_v14 = vld [vmem:[#allocation7 + $0x90] ss:$8 sps:$4 sm:$0xff]   ;;  %v6396_v16 = vld [vmem:[#allocation7 + $0xa0] ss:$8 sps:$4 sm:$0xff]  }
 0x2ad   : > { %v5949_v20 = vpop.f32.mrb[1].mxu1  ;;  %v5930_v21 = vpop.f32.mrb[3].mxu0 }
 0x2ae   : > { %v5950_v22 = vadd.f32 %v5949_v20, %v5948_v17  ;;  %v5951_v23 = vpop.f32.mrb[2].mxu1  ;;  %v1321_v24 = vadd.f32 %v5928_v18, %v5475_v15  ;;  %v5931_v25 = vadd.f32 %v5930_v21, %v5929_v19  ;;  %v6401_v17 = vld [vmem:[#allocation7 + $0xb4] ss:$8 sps:$4 sm:$0xff]   ;;  %v6399_v18 = vld [vmem:[#allocation7 + $0xb0] ss:$8 sps:$4 sm:$0xff]   ;;  %v7447_v21 = vmov 0  }
 0x2af   : > { %v5952_v26 = vpop.f32.mrb[3].mxu1  ;;  %v6402_v19 = vld [vmem:[#allocation7 + $0xc0] ss:$8 sps:$4 sm:$0xff]   ;;  %v6404_v20 = vld [vmem:[#allocation7 + $0xc4] ss:$8 sps:$4 sm:$0xff]  }
 0x2b0   : > { %v5953_v27 = vadd.f32 %v5952_v26, %v5951_v23  ;;  %v1324_v28 = vadd.f32 %v5931_v25, %v5475_v15  ;;  %v1362_v29 = vadd.f32 %v5950_v22, %v1321_v24  ;;  %v6398_v15 = vld [vmem:[#allocation7 + $0xa4] ss:$8 sps:$4 sm:$0xff]   ;;  %1646 = vst [vmem:[#allocation2] sm:$0xf] %v7447_v21  ;;  %1647 = vst [vmem:[#allocation2 + $0x8] sm:$0xf0] %v7447_v21 }
 0x2b1   : > { %v6407_v22 = vld [vmem:[#allocation7 + $0xd4] ss:$8 sps:$4 sm:$0xff]   ;;  %v6405_v23 = vld [vmem:[#allocation7 + $0xd0] ss:$8 sps:$4 sm:$0xff]   ;;  %v6410_v24 = vld [vmem:[#allocation7 + $0xe4] ss:$8 sps:$4 sm:$0xff]  }
 0x2b2   : > { %v1365_v30 = vadd.f32 %v5953_v27, %v1324_v28  ;;  %v6408_v25 = vld [vmem:[#allocation7 + $0xe0] ss:$8 sps:$4 sm:$0xff]   ;;  %v6413_v26 = vld [vmem:[#allocation7 + $0xf4] ss:$8 sps:$4 sm:$0xff]   ;;  %v6411_v27 = vld [vmem:[#allocation7 + $0xf0] ss:$8 sps:$4 sm:$0xff]  }
 0x2b3   : > { %v6416_v28 = vld [vmem:[#allocation7 + $0x104] ss:$8 sps:$4 sm:$0xff]  }
 0x2ca   : > { %v1402_v31 = vpop.f32.mrb[4].mxu0 }
 0x2cb   : > { %v8015_v32 = vadd.f32 %v1402_v31, %v1362_v29  ;;  %v6015_v34 = vpop.f32.mrb[5].mxu0  ;;  %v1544_v29 = vld [vmem:[%s8423_s19] sm:$0x1] }
 0x2cc   : > { %v1405_v35 = vpop.f32.mrb[6].mxu0 }
 0x2cd   : > { %v8017_v36 = vadd.f32 %v1405_v35, %v1365_v30  ;;  %v6016_v37 = vpop.f32.mrb[7].mxu0  ;;  %v1409_v38 = vmax.f32 %v8015_v32, 0.0  ;;  %v6501_v32 = vld [vmem:[#allocation8 + $0xf0] ss:$24 sps:$4 sm:$0xff]  }
 0x2cf   : > { %v1410_v39 = vmax.f32 %v8017_v36, 0.0 }
 0x2d1   : > { %v1411_v40 = vadd.f32 %v1410_v39, %v1409_v38 }
 0x2d3   : > { %v1412_v41 = vrot.slane %v1411_v40, 4 }
 0x2d5   : > { %v1413_v42 = vadd.f32 %v1412_v41, %v1411_v40 }
 0x2d7   : > { %v1414_v43 = vrot.slane %v1413_v42, 2 }
 0x2d9   : > { %v1415_v44 = vadd.f32 %v1414_v43, %v1413_v42 }
 0x2db   : > { %v1416_v45 = vrot.slane %v1415_v44, 1 }
 0x2dd   : > { %v1417_v46 = vadd.f32 %v1416_v45, %v1415_v44  ;;  %v1639_v44 = vlaneseq }
 0x2df   : > { %v1419_v47 = vmul.f32 0.0625, %v1417_v46  ;;  %v8041_v45 = vshrl.u32 %v1639_v44, 7  ;;  %v6486_v46 = vld [vmem:[#allocation8] ss:$24 sps:$4 sm:$0xff]   ;;  %vm5235_vm8 = vcmp.lt.s32.totalorder %v1639_v44, 256 }
 0x2e1   : > { %v1420_v48 = vpack.c.bf16 %v1419_v47, %v1419_v47  ;;  %v6488_v47 = vld [vmem:[#allocation8 + $0x4] ss:$24 sps:$4 sm:$0xff]  }
 0x2e2   : > { %2941 = vmatprep.subr.bf16.mxu0 %v6488_v47 }
 0x2e3   : > { %6034 = vmatmul.mubr.bf16.vlgmr.msra.gmra.mrb[4].mxu1 %v1420_v48  ;;  %v8044_v48 = vsub.s32 0, %v8041_v45 }
 0x2e4   : > { %2199 = vmatpush1.bf16.msra.mxu1 %v6366_v51 }
 0x2e5   : > { %2200 = vmatprep.subr.bf16.mxu1 %v6371_v53 }
 0x2e8   : > { %2201 = vmatpush1.bf16.msra.mxu1 %v6369_v54 }
 0x2e9   : > { %2202 = vmatprep.subr.bf16.mxu1 %v6374_v63  ;;  %v6503_v63 = vld [vmem:[#allocation8 + $0xf4] ss:$24 sps:$4 sm:$0xff]  }
 0x2ec   : > { %2203 = vmatpush1.bf16.msra.mxu1 %v6372_v0 }
 0x2ed   : > { %2204 = vmatprep.subr.bf16.mxu1 %v6377_v1 }
 0x2f0   : > { %2205 = vmatpush1.bf16.msra.mxu1 %v6375_v2 }
 0x2f1   : > { %2206 = vmatprep.subr.bf16.mxu1 %v6380_v3 }
 0x2f4   : > { %2207 = vmatpush1.bf16.msra.mxu1 %v6378_v4 }
 0x2f5   : > { %2208 = vmatprep.subr.bf16.mxu1 %v6383_v5 }
 0x2f8   : > { %2209 = vmatpush1.bf16.msra.mxu1 %v6381_v6 }
 0x2f9   : > { %2210 = vmatprep.subr.bf16.mxu1 %v6386_v7 }
 0x2fc   : > { %2211 = vmatpush1.bf16.msra.mxu1 %v6384_v8 }
 0x2fd   : > { %2212 = vmatprep.subr.bf16.mxu1 %v6389_v9 }
 0x300   : > { %2213 = vmatpush1.bf16.msra.mxu1 %v6387_v10  ;;  %v6504_v10 = vld [vmem:[#allocation8 + $0x120] ss:$24 sps:$4 sm:$0xff]  }
 0x301   : > { %2214 = vmatprep.subr.bf16.mxu1 %v6392_v11 }
 0x304   : > { %2215 = vmatpush1.bf16.msra.mxu1 %v6390_v12 }
 0x305   : > { %2216 = vmatprep.subr.bf16.mxu1 %v6395_v13 }
 0x308   : > { %2217 = vmatpush1.bf16.msra.mxu1 %v6393_v14  ;;  %v6509_v14 = vld [vmem:[#allocation8 + $0x154] ss:$24 sps:$4 sm:$0xff]  }
 0x309   : > { %2218 = vmatprep.subr.bf16.mxu1 %v6398_v15 }
 0x30c   : > { %2219 = vmatpush1.bf16.msra.mxu1 %v6396_v16 }
 0x30d   : > { %2220 = vmatprep.subr.bf16.mxu1 %v6401_v17 }
 0x310   : > { %2221 = vmatpush1.bf16.msra.mxu1 %v6399_v18 }
 0x311   : > { %2222 = vmatprep.subr.bf16.mxu1 %v6404_v20 }
 0x314   : > { %2223 = vmatpush1.bf16.msra.mxu1 %v6402_v19 }
 0x315   : > { %2224 = vmatprep.subr.bf16.mxu1 %v6407_v22 }
 0x318   : > { %2225 = vmatpush1.bf16.msra.mxu1 %v6405_v23 }
 0x319   : > { %2226 = vmatprep.subr.bf16.mxu1 %v6410_v24 }
 0x31c   : > { %2227 = vmatpush1.bf16.msra.mxu1 %v6408_v25 }
 0x31d   : > { %2228 = vmatprep.subr.bf16.mxu1 %v6413_v26 }
 0x320   : > { %2229 = vmatpush1.bf16.msra.mxu1 %v6411_v27 }
 0x321   : > { %2241 = vmatprep.subr.bf16.mxu1 %v6416_v28  ;;  %v6507_v28 = vld [vmem:[#allocation8 + $0x150] ss:$24 sps:$4 sm:$0xff]  }
 0x3b6   : > { %v1520_v56 = vpop.f32.mrb[4].mxu1 }
 0x3b7   : > { %v1521_v57 = vadd.f32 %v1520_v56, %v1437_v55  ;;  %v6035_v58 = vpop.f32.mrb[5].mxu1  ;;  %v6492_v56 = vld [vmem:[#allocation8 + $0x60] ss:$24 sps:$4 sm:$0xff]  }
 0x3b8   : > { %v1523_v59 = vpop.f32.mrb[6].mxu1 }
 0x3b9   : > { %v1526_v60 = vmax.f32 %v1521_v57, 0.0  ;;  %v6036_v61 = vpop.f32.mrb[7].mxu1  ;;  %v6497_v57 = vld [vmem:[#allocation8 + $0x94] ss:$24 sps:$4 sm:$0xff]  }
 0x3ba   : > { %v6500_v61 = vld [vmem:[#allocation8 + $0xc4] ss:$24 sps:$4 sm:$0xff]  }
 0x3bb   : > { %v1527_v62 = vpack.c.bf16 %v1526_v60, %v1526_v60  ;;  %v6495_v60 = vld [vmem:[#allocation8 + $0x90] ss:$24 sps:$4 sm:$0xff]  }
 0x3bd   : > { %6054 = vmatmul.mubr.bf16.vlgmr.msra.gmra.mrb[8].mxu0 %v1527_v62  ;;  %v6498_v62 = vld [vmem:[#allocation8 + $0xc0] ss:$24 sps:$4 sm:$0xff]  }
 0x3be   : > { %2942 = vmatpush1.bf16.msra.mxu0 %v6486_v46  ;;  %v6419_v46 = vld [vmem:[#allocation7 + $0x114] ss:$8 sps:$4 sm:$0xff]  }
 0x3bf   : > { %2943 = vmatprep.subr.bf16.mxu0 %v6491_v49 }
 0x3c2   : > { %2944 = vmatpush1.bf16.msra.mxu0 %v6489_v50  ;;  %v6510_v50 = vld [vmem:[#allocation8 + $0x180] ss:$24 sps:$4 sm:$0xff]  }
 0x3c3   : > { %2945 = vmatprep.subr.bf16.mxu0 %v6494_v52 }
 0x3c6   : > { %2946 = vmatpush1.bf16.msra.mxu0 %v6492_v56  ;;  %v6513_v56 = vld [vmem:[#allocation8 + $0x1b0] ss:$24 sps:$4 sm:$0xff]  }
 0x3c7   : > { %2947 = vmatprep.subr.bf16.mxu0 %v6497_v57  ;;  %v6518_v57 = vld [vmem:[#allocation8 + $0x1e4] ss:$24 sps:$4 sm:$0xff]  }
 0x3ca   : > { %2948 = vmatpush1.bf16.msra.mxu0 %v6495_v60  ;;  %v6516_v60 = vld [vmem:[#allocation8 + $0x1e0] ss:$24 sps:$4 sm:$0xff]  }
 0x3cb   : > { %2949 = vmatprep.subr.bf16.mxu0 %v6500_v61  ;;  %v6521_v61 = vld [vmem:[#allocation8 + $0x214] ss:$24 sps:$4 sm:$0xff]  }
 0x3ce   : > { %2950 = vmatpush1.bf16.msra.mxu0 %v6498_v62  ;;  %v6423_v62 = vld [vmem:[#allocation7 + $0x130] ss:$8 sps:$4 sm:$0xff]  }
 0x3cf   : > { %2951 = vmatprep.subr.bf16.mxu0 %v6503_v63  ;;  %v6428_v63 = vld [vmem:[#allocation7 + $0x144] ss:$8 sps:$4 sm:$0xff]  }
 0x3d2   : > { %2952 = vmatpush1.bf16.msra.mxu0 %v6501_v32  ;;  %v6519_v32 = vld [vmem:[#allocation8 + $0x210] ss:$24 sps:$4 sm:$0xff]  }
 0x490   : > { %v1627_v30 = vpop.f32.mrb[8].mxu0 }
 0x491   : > { %v1628_v31 = vadd.f32 %v1627_v30, %v1544_v29  ;;  %v6055_v34 = vpop.f32.mrb[9].mxu0 }
 0x492   : > { %v1630_v35 = vpop.f32.mrb[10].mxu0 }
 0x493   : > { %v1633_v37 = vsub.f32 0.0, %v1628_v31  ;;  %v6056_v40 = vpop.f32.mrb[11].mxu0  ;;  %v6512_v35 = vld [vmem:[#allocation8 + $0x184] ss:$24 sps:$4 sm:$0xff]  }
 0x495   : > { %v1634_v41 = vmul.f32 1.442695, %v1633_v37  ;;  %v6414_v37 = vld [vmem:[#allocation7 + $0x100] ss:$8 sps:$4 sm:$0xff]  }
 0x497   : > { %6918 = vpow2.f32 %v1634_v41 }
 0x4a1   : > { %v6919_v42 = vpop.eup %6918 }
 0x4a2   : > { %v1636_v43 = vadd.f32 1.0, %v6919_v42 }
 0x4a4   : > { %6920 = vrcp.f32 %v1636_v43 }
 0x4ae   : > { %v6921_v51 = vpop.eup %6920 }
 0x4af   : > { %v1642_v53 = vrot.slane %v6921_v51, %v8044_v48 }
 0x4b1   : > { %v1643_v54 = vmul.f32 %v1642_v53, %v1409_v38  ;;  %v1644_v55 = vmul.f32 %v1642_v53, %v1410_v39  ;;  %v6506_v39 = vld [vmem:[#allocation8 + $0x124] ss:$24 sps:$4 sm:$0xff]   ;;  %v6515_v53 = vld [vmem:[#allocation8 + $0x1b4] ss:$24 sps:$4 sm:$0xff]  }
 0x4b2   : > { %2953 = vmatprep.subr.bf16.mxu0 %v6506_v39  ;;  %v6431_v39 = vld [vmem:[#allocation7 + $0x154] ss:$8 sps:$4 sm:$0xff]  }
 0x4b3   : > { %v1645_v58 = vpack.c.bf16 %v1644_v55, %v1643_v54  ;;  %2954 = vmatpush1.bf16.msra.mxu0 %v6504_v10  ;;  %v6417_v54 = vld [vmem:[#allocation7 + $0x110] ss:$8 sps:$4 sm:$0xff]   ;;  %v6422_v55 = vld [vmem:[#allocation7 + $0x124] ss:$8 sps:$4 sm:$0xff]   ;;  %v6443_v10 = vld [vmem:[#allocation7 + $0x194] ss:$8 sps:$4 sm:$0xff]  }
 0x4b4   : > { %2955 = vmatprep.subr.bf16.mxu0 %v6509_v14  ;;  %v6449_v14 = vld [vmem:[#allocation7 + $0x1b4] ss:$8 sps:$4 sm:$0xff]  }
 0x4b5   : > { %v1649_v59 = vrot.slane %v1645_v58, 4  ;;  %v6420_v58 = vld [vmem:[#allocation7 + $0x120] ss:$8 sps:$4 sm:$0xff]  }
 0x4b7   : > { %1651 = vst [vmem:[#allocation2 + $0x8] ss:$-4 sps:$4 sm:$0xff] %v1649_v59   ;;  %2956 = vmatpush1.bf16.msra.mxu0 %v6507_v28  ;;  %v6425_v59 = vld [vmem:[#allocation7 + $0x134] ss:$8 sps:$4 sm:$0xff]   ;;  %v6465_v28 = vld [vmem:[#allocation7 + $0x210] ss:$8 sps:$4 sm:$0xff]  }
 0x4b8   : > { %2957 = vmatprep.subr.bf16.mxu0 %v6512_v35  ;;  %v6471_v35 = vld [vmem:[#allocation7 + $0x230] ss:$8 sps:$4 sm:$0xff]  }
 0x4bb   : > { %2958 = vmatpush1.bf16.msra.mxu0 %v6510_v50  ;;  %v6531_v50 = vld [vmem:[#allocation8 + $0x2d0] ss:$24 sps:$4 sm:$0xff]  }
 0x4bc   : > { %2959 = vmatprep.subr.bf16.mxu0 %v6515_v53  ;;  %v6536_v53 = vld [vmem:[#allocation8 + $0xc] ss:$24 sps:$4 sm:$0xff]  }
 0x4be   : > { %v1653_v38 = vld [vmem:[#allocation2] sm:$0xff]  ;;  %v1654_v36 = vld [vmem:[#allocation2 + $0x8] sm:$0xff] }
 0x4bf   : > { %v1656_v0 = vshrl.u32 %v1653_v38, 16  ;;  %v1658_v1 = vshll.u32 %v1653_v38, 16  ;;  %v1663_v2 = vshll.u32 %v1654_v36, 16  ;;  %v1667_v3 = vshrl.u32 %v1654_v36, 16  ;;  %2960 = vmatpush1.bf16.msra.mxu0 %v6513_v56 }
 0x4c0   : > { %v1672_v4 = vrot.slane %v1653_v38, 1  ;;  %v1673_v5 = vrot.slane %v1654_v36, 1  ;;  %v1682_v22 = vrot.slane %v1653_v38, 2  ;;  %v1683_v23 = vrot.slane %v1654_v36, 2  ;;  %2961 = vmatprep.subr.bf16.mxu0 %v6518_v57 }
 0x4c1   : > { %v1660_v6 = vrot.slane %v1658_v1, 1  ;;  %v1665_v7 = vrot.slane %v1663_v2, 1  ;;  %v1675_v8 = vrot.slane %v1656_v0, 1  ;;  %v1676_v9 = vrot.slane %v1658_v1, 2  ;;  %v6527_v1 = vld [vmem:[#allocation8 + $0x274] ss:$24 sps:$4 sm:$0xff]  }
 0x4c2   : > { %v1678_v11 = vrot.slane %v1667_v3, 1  ;;  %v1679_v12 = vrot.slane %v1663_v2, 2  ;;  %v1674_v13 = vsel %vm938_vm1, %v1672_v4, %v1673_v5  ;;  %v1785_v20 = vrot.slane %v1673_v5, 3  ;;  %v6429_v2 = vld [vmem:[#allocation7 + $0x150] ss:$8 sps:$4 sm:$0xff]  }
 0x4c3   : > { %v1661_v15 = vor.u32 %v1660_v6, %v1656_v0  ;;  %v1669_v16 = vor.u32 %v1667_v3, %v1665_v7  ;;  %v1677_v17 = vor.u32 %v1676_v9, %v1675_v8  ;;  %v1784_v18 = vrot.slane %v1674_v13, 3  ;;  %2962 = vmatpush1.bf16.msra.mxu0 %v6516_v60  ;;  %v6522_v0 = vld [vmem:[#allocation8 + $0x240] ss:$24 sps:$4 sm:$0xff]   ;;  %v6434_v3 = vld [vmem:[#allocation7 + $0x164] ss:$8 sps:$4 sm:$0xff]  }
 0x4c4   : > { %v1680_v19 = vor.u32 %v1679_v12, %v1678_v11  ;;  %v1778_v26 = vrot.slane %v1653_v38, 3  ;;  %v1779_v27 = vrot.slane %v1654_v36, 3  ;;  %v1684_v41 = vsel %vm954_vm4, %v1682_v22, %v1683_v23  ;;  %2963 = vmatprep.subr.bf16.mxu0 %v6521_v61  ;;  %v6524_v38 = vld [vmem:[#allocation8 + $0x244] ss:$24 sps:$4 sm:$0xff]   ;;  %v6426_v36 = vld [vmem:[#allocation7 + $0x140] ss:$8 sps:$4 sm:$0xff]  }
 0x4c5   : > { %v1666_v24 = vsel %vm924_vm0, %v1661_v15, %v1665_v7  ;;  %v1782_v25 = vrot.slane %v1669_v16, 3  ;;  %v8055_v34 = vsel %vm1777_vm5, %v1784_v18, %v1785_v20  ;;  %v1791_v42 = vrot.slane %v1683_v23, 3  ;;  %v6525_v4 = vld [vmem:[#allocation8 + $0x270] ss:$24 sps:$4 sm:$0xff]   ;;  %v6437_v6 = vld [vmem:[#allocation7 + $0x174] ss:$8 sps:$4 sm:$0xff]  }
 0x4c6   : > { %v1781_v29 = vrot.slane %v1666_v24, 3  ;;  %v1681_v30 = vsel %vm943_vm2, %v1677_v17, %v1680_v19  ;;  %v1788_v31 = vrot.slane %v1680_v19, 3  ;;  %v1790_v47 = vrot.slane %v1684_v41, 3  ;;  %v6432_v5 = vld [vmem:[#allocation7 + $0x160] ss:$8 sps:$4 sm:$0xff]  }
 0x4c7   : > { %v1787_v40 = vrot.slane %v1681_v30, 3  ;;  %v1780_v49 = vsel %vm1777_vm5, %v1778_v26, %v1779_v27  ;;  %2964 = vmatpush1.bf16.msra.mxu0 %v6519_v32  ;;  %v6435_v7 = vld [vmem:[#allocation7 + $0x170] ss:$8 sps:$4 sm:$0xff]   ;;  %v6440_v8 = vld [vmem:[#allocation7 + $0x184] ss:$8 sps:$4 sm:$0xff]  }
 0x4c8   : > { %v1783_v43 = vsel %vm1777_vm5, %v1781_v29, %v1782_v25  ;;  %v8062_v52 = vsel %vm1777_vm5, %v1790_v47, %v1791_v42  ;;  %2965 = vmatprep.subr.bf16.mxu0 %v6524_v38  ;;  %v6438_v9 = vld [vmem:[#allocation7 + $0x180] ss:$8 sps:$4 sm:$0xff]   ;;  %v6441_v11 = vld [vmem:[#allocation7 + $0x190] ss:$8 sps:$4 sm:$0xff]   ;;  %v6446_v12 = vld [vmem:[#allocation7 + $0x1a4] ss:$8 sps:$4 sm:$0xff]  }
 0x4c9   : > { %2230 = vmatprep.mubr.bf16.mxu1 %v1783_v43  ;;  %v1789_v51 = vsel %vm1777_vm5, %v1787_v40, %v1788_v31  ;;  %v6444_v13 = vld [vmem:[#allocation7 + $0x1a0] ss:$8 sps:$4 sm:$0xff]   ;;  %v6447_v15 = vld [vmem:[#allocation7 + $0x1b0] ss:$8 sps:$4 sm:$0xff]   ;;  %v6452_v16 = vld [vmem:[#allocation7 + $0x1c4] ss:$8 sps:$4 sm:$0xff]  }
 0x4ca   : > { %2231 = vmatmul.mubr.bf16.vlgmr.msra.gmra.mrb[8].mxu1 %v1780_v49  ;;  %v6450_v17 = vld [vmem:[#allocation7 + $0x1c0] ss:$8 sps:$4 sm:$0xff]   ;;  %v6455_v18 = vld [vmem:[#allocation7 + $0x1d4] ss:$8 sps:$4 sm:$0xff]   ;;  %v6453_v19 = vld [vmem:[#allocation7 + $0x1d0] ss:$8 sps:$4 sm:$0xff]  }
 0x4cb   : > { %2242 = vmatpush1.bf16.msra.mxu1 %v6414_v37  ;;  %2273 = vmatprep.mubr.bf16.mxu1 %v1789_v51  ;;  %v6458_v20 = vld [vmem:[#allocation7 + $0x1e4] ss:$8 sps:$4 sm:$0xff]   ;;  %v6456_v22 = vld [vmem:[#allocation7 + $0x1e0] ss:$8 sps:$4 sm:$0xff]   ;;  %v6461_v23 = vld [vmem:[#allocation7 + $0x1f4] ss:$8 sps:$4 sm:$0xff]  }
 0x4cc   : > { %2243 = vmatprep.subr.bf16.mxu1 %v6419_v46  ;;  %2966 = vmatpush1.bf16.msra.mxu0 %v6522_v0  ;;  %v6459_v24 = vld [vmem:[#allocation7 + $0x1f0] ss:$8 sps:$4 sm:$0xff]   ;;  %v6464_v25 = vld [vmem:[#allocation7 + $0x204] ss:$8 sps:$4 sm:$0xff]   ;;  %v6462_v26 = vld [vmem:[#allocation7 + $0x200] ss:$8 sps:$4 sm:$0xff]  }
 0x4cd   : > { %2967 = vmatprep.subr.bf16.mxu0 %v6527_v1  ;;  %v6467_v27 = vld [vmem:[#allocation7 + $0x214] ss:$8 sps:$4 sm:$0xff]   ;;  %v6470_v29 = vld [vmem:[#allocation7 + $0x224] ss:$8 sps:$4 sm:$0xff]   ;;  %v6468_v30 = vld [vmem:[#allocation7 + $0x220] ss:$8 sps:$4 sm:$0xff]  }
 0x4ce   : > { %v6473_v31 = vld [vmem:[#allocation7 + $0x234] ss:$8 sps:$4 sm:$0xff]   ;;  %v6476_v37 = vld [vmem:[#allocation7 + $0x244] ss:$8 sps:$4 sm:$0xff]   ;;  %v6474_v40 = vld [vmem:[#allocation7 + $0x240] ss:$8 sps:$4 sm:$0xff]  }
 0x4cf   : > { %2244 = vmatpush1.bf16.msra.mxu1 %v6417_v54  ;;  %v6479_v41 = vld [vmem:[#allocation7 + $0x254] ss:$8 sps:$4 sm:$0xff]   ;;  %v6482_v42 = vld [vmem:[#allocation7 + $0x264] ss:$8 sps:$4 sm:$0xff]   ;;  %v6483_v46 = vld [vmem:[#allocation7 + $0x270] ss:$8 sps:$4 sm:$0xff]  }
 0x4d0   : > { %2245 = vmatprep.subr.bf16.mxu1 %v6422_v55  ;;  %2968 = vmatpush1.bf16.msra.mxu0 %v6525_v4  ;;  %v6485_v43 = vld [vmem:[#allocation7 + $0x274] ss:$8 sps:$4 sm:$0xff]   ;;  %v6528_v49 = vld [vmem:[#allocation8 + $0x2a0] ss:$24 sps:$4 sm:$0xff]   ;;  %v8071_v54 = vsub.s32 1, %v8041_v45 }
 0x4d1   : > { %v6530_v47 = vld [vmem:[#allocation8 + $0x2a4] ss:$24 sps:$4 sm:$0xff]   ;;  %v6533_v51 = vld [vmem:[#allocation8 + $0x2d4] ss:$24 sps:$4 sm:$0xff]  }
 0x4d2   : > { %2969 = vmatprep.subr.bf16.mxu0 %v6530_v47  ;;  %v6539_v4 = vld [vmem:[#allocation8 + $0x3c] ss:$24 sps:$4 sm:$0xff]  }
 0x4d3   : > { %2246 = vmatpush1.bf16.msra.mxu1 %v6420_v58  ;;  %v6593_v47 = vld [vmem:[#allocation8 + $0xa4] ss:$24 sps:$4 sm:$0xff]  }
 0x4d4   : > { %2247 = vmatprep.subr.bf16.mxu1 %v6425_v59  ;;  %2970 = vmatpush1.bf16.msra.mxu0 %v6528_v49  ;;  %v6591_v49 = vld [vmem:[#allocation8 + $0xa0] ss:$24 sps:$4 sm:$0xff]  }
 0x4d5   : > { %2971 = vmatprep.subr.bf16.mxu0 %v6533_v51  ;;  %v6594_v51 = vld [vmem:[#allocation8 + $0xd0] ss:$24 sps:$4 sm:$0xff]  }
 0x4d7   : > { %2248 = vmatpush1.bf16.msra.mxu1 %v6423_v62 }
 0x4d8   : > { %2249 = vmatprep.subr.bf16.mxu1 %v6428_v63  ;;  %2972 = vmatpush1.bf16.msra.mxu0 %v6531_v50  ;;  %v6596_v50 = vld [vmem:[#allocation8 + $0xd4] ss:$24 sps:$4 sm:$0xff]  }
 0x4d9   : > { %2984 = vmatprep.subr.bf16.mxu0 %v6536_v53  ;;  %v6599_v53 = vld [vmem:[#allocation8 + $0x104] ss:$24 sps:$4 sm:$0xff]  }
 0x4db   : > { %2250 = vmatpush1.bf16.msra.mxu1 %v6426_v36 }
 0x4dc   : > { %2251 = vmatprep.subr.bf16.mxu1 %v6431_v39 }
 0x4df   : > { %2252 = vmatpush1.bf16.msra.mxu1 %v6429_v2  ;;  %v6534_v2 = vld [vmem:[#allocation8 + $0x8] ss:$24 sps:$4 sm:$0xff]  }
 0x4e0   : > { %2253 = vmatprep.subr.bf16.mxu1 %v6434_v3 }
 0x4e3   : > { %2254 = vmatpush1.bf16.msra.mxu1 %v6432_v5  ;;  %v6537_v5 = vld [vmem:[#allocation8 + $0x38] ss:$24 sps:$4 sm:$0xff]  }
 0x4e4   : > { %2255 = vmatprep.subr.bf16.mxu1 %v6437_v6  ;;  %v6542_v6 = vld [vmem:[#allocation8 + $0x6c] ss:$24 sps:$4 sm:$0xff]  }
 0x4e7   : > { %2256 = vmatpush1.bf16.msra.mxu1 %v6435_v7  ;;  %v6540_v7 = vld [vmem:[#allocation8 + $0x68] ss:$24 sps:$4 sm:$0xff]  }
 0x4e8   : > { %2257 = vmatprep.subr.bf16.mxu1 %v6440_v8  ;;  %v6545_v8 = vld [vmem:[#allocation8 + $0x9c] ss:$24 sps:$4 sm:$0xff]  }
 0x4eb   : > { %2258 = vmatpush1.bf16.msra.mxu1 %v6438_v9  ;;  %v6543_v9 = vld [vmem:[#allocation8 + $0x98] ss:$24 sps:$4 sm:$0xff]  }
 0x4ec   : > { %2259 = vmatprep.subr.bf16.mxu1 %v6443_v10  ;;  %v6548_v10 = vld [vmem:[#allocation8 + $0xcc] ss:$24 sps:$4 sm:$0xff]  }
 0x4ef   : > { %2260 = vmatpush1.bf16.msra.mxu1 %v6441_v11  ;;  %v6546_v11 = vld [vmem:[#allocation8 + $0xc8] ss:$24 sps:$4 sm:$0xff]  }
 0x4f0   : > { %2261 = vmatprep.subr.bf16.mxu1 %v6446_v12  ;;  %v6551_v12 = vld [vmem:[#allocation8 + $0xfc] ss:$24 sps:$4 sm:$0xff]  }
 0x4f3   : > { %2262 = vmatpush1.bf16.msra.mxu1 %v6444_v13  ;;  %v6549_v13 = vld [vmem:[#allocation8 + $0xf8] ss:$24 sps:$4 sm:$0xff]  }
 0x4f4   : > { %2263 = vmatprep.subr.bf16.mxu1 %v6449_v14  ;;  %v6554_v14 = vld [vmem:[#allocation8 + $0x12c] ss:$24 sps:$4 sm:$0xff]  }
 0x4f7   : > { %2264 = vmatpush1.bf16.msra.mxu1 %v6447_v15  ;;  %v6552_v15 = vld [vmem:[#allocation8 + $0x128] ss:$24 sps:$4 sm:$0xff]  }
 0x4f8   : > { %2265 = vmatprep.subr.bf16.mxu1 %v6452_v16  ;;  %v6557_v16 = vld [vmem:[#allocation8 + $0x15c] ss:$24 sps:$4 sm:$0xff]  }
 0x4fb   : > { %2266 = vmatpush1.bf16.msra.mxu1 %v6450_v17  ;;  %v6555_v17 = vld [vmem:[#allocation8 + $0x158] ss:$24 sps:$4 sm:$0xff]  }
 0x4fc   : > { %2267 = vmatprep.subr.bf16.mxu1 %v6455_v18  ;;  %v6560_v18 = vld [vmem:[#allocation8 + $0x18c] ss:$24 sps:$4 sm:$0xff]  }
 0x4ff   : > { %2268 = vmatpush1.bf16.msra.mxu1 %v6453_v19  ;;  %v6558_v19 = vld [vmem:[#allocation8 + $0x188] ss:$24 sps:$4 sm:$0xff]  }
 0x500   : > { %2269 = vmatprep.subr.bf16.mxu1 %v6458_v20  ;;  %v6563_v20 = vld [vmem:[#allocation8 + $0x1bc] ss:$24 sps:$4 sm:$0xff]  }
 0x503   : > { %2270 = vmatpush1.bf16.msra.mxu1 %v6456_v22  ;;  %v6561_v22 = vld [vmem:[#allocation8 + $0x1b8] ss:$24 sps:$4 sm:$0xff]  }
 0x504   : > { %2271 = vmatprep.subr.bf16.mxu1 %v6461_v23  ;;  %v6566_v23 = vld [vmem:[#allocation8 + $0x1ec] ss:$24 sps:$4 sm:$0xff]  }
 0x507   : > { %2272 = vmatpush1.bf16.msra.mxu1 %v6459_v24  ;;  %v6564_v24 = vld [vmem:[#allocation8 + $0x1e8] ss:$24 sps:$4 sm:$0xff]  }
 0x508   : > { %2284 = vmatprep.subr.bf16.mxu1 %v6464_v25  ;;  %v6569_v25 = vld [vmem:[#allocation8 + $0x21c] ss:$24 sps:$4 sm:$0xff]  }
 0x50a   : > { %2274 = vmatmul.mubr.bf16.vlgmr.msra.gmra.mrb[8].mxu1 %v8055_v34  ;;  %v6477_v34 = vld [vmem:[#allocation7 + $0x250] ss:$8 sps:$4 sm:$0xff]  }
 0x50b   : > { %2285 = vmatpush1.bf16.msra.mxu1 %v6462_v26  ;;  %2316 = vmatprep.mubr.bf16.mxu1 %v7447_v21  ;;  %v6480_v21 = vld [vmem:[#allocation7 + $0x260] ss:$8 sps:$4 sm:$0xff]   ;;  %v6567_v26 = vld [vmem:[#allocation8 + $0x218] ss:$24 sps:$4 sm:$0xff]  }
 0x50c   : > { %2286 = vmatprep.subr.bf16.mxu1 %v6467_v27  ;;  %v6572_v27 = vld [vmem:[#allocation8 + $0x24c] ss:$24 sps:$4 sm:$0xff]  }
 0x50f   : > { %2287 = vmatpush1.bf16.msra.mxu1 %v6465_v28  ;;  %v6570_v28 = vld [vmem:[#allocation8 + $0x248] ss:$24 sps:$4 sm:$0xff]  }
 0x510   : > { %2288 = vmatprep.subr.bf16.mxu1 %v6470_v29  ;;  %v6575_v29 = vld [vmem:[#allocation8 + $0x27c] ss:$24 sps:$4 sm:$0xff]  }
 0x513   : > { %2289 = vmatpush1.bf16.msra.mxu1 %v6468_v30  ;;  %v6573_v30 = vld [vmem:[#allocation8 + $0x278] ss:$24 sps:$4 sm:$0xff]  }
 0x514   : > { %2290 = vmatprep.subr.bf16.mxu1 %v6473_v31  ;;  %v6578_v31 = vld [vmem:[#allocation8 + $0x2ac] ss:$24 sps:$4 sm:$0xff]  }
 0x517   : > { %2291 = vmatpush1.bf16.msra.mxu1 %v6471_v35  ;;  %v6576_v35 = vld [vmem:[#allocation8 + $0x2a8] ss:$24 sps:$4 sm:$0xff]  }
 0x518   : > { %2292 = vmatprep.subr.bf16.mxu1 %v6476_v37  ;;  %v6581_v37 = vld [vmem:[#allocation8 + $0x2dc] ss:$24 sps:$4 sm:$0xff]  }
 0x51b   : > { %2293 = vmatpush1.bf16.msra.mxu1 %v6474_v40  ;;  %v6579_v40 = vld [vmem:[#allocation8 + $0x2d8] ss:$24 sps:$4 sm:$0xff]  }
 0x51c   : > { %2294 = vmatprep.subr.bf16.mxu1 %v6479_v41  ;;  %v6584_v41 = vld [vmem:[#allocation8 + $0x14] ss:$24 sps:$4 sm:$0xff]  }
 0x51f   : > { %2295 = vmatpush1.bf16.msra.mxu1 %v6477_v34  ;;  %v6582_v34 = vld [vmem:[#allocation8 + $0x10] ss:$24 sps:$4 sm:$0xff]  }
 0x520   : > { %2296 = vmatprep.subr.bf16.mxu1 %v6482_v42  ;;  %v6587_v42 = vld [vmem:[#allocation8 + $0x44] ss:$24 sps:$4 sm:$0xff]  }
 0x523   : > { %2297 = vmatpush1.bf16.msra.mxu1 %v6480_v21  ;;  %v6585_v21 = vld [vmem:[#allocation8 + $0x40] ss:$24 sps:$4 sm:$0xff]  }
 0x524   : > { %2298 = vmatprep.subr.bf16.mxu1 %v6485_v43  ;;  %v6590_v43 = vld [vmem:[#allocation8 + $0x74] ss:$24 sps:$4 sm:$0xff]  }
 0x527   : > { %2299 = vmatpush1.bf16.msra.mxu1 %v6483_v46  ;;  %v6588_v46 = vld [vmem:[#allocation8 + $0x70] ss:$24 sps:$4 sm:$0xff]  }
 0x528   : > { %6057 = vmatprep.subr.bf16.mxu1 %v7445_v33 }
 0x52a   : > { %2317 = vmatmul.mubr.bf16.vlgmr.msra.gmra.mrb[8].mxu1 %v8062_v52  ;;  %v1765_v52 = vld [vmem:[%s8424_s23] sm:$0x3] }
 0x52b   : > { %6059 = vmatprep.mubr.msk.bf16.mxu1 %vm7446_vm3, %v7445_v33  ;;  %v1774_v55 = vrot.slane %v1765_v52, %v8071_v54  ;;  %v1770_v56 = vrot.slane %v1765_v52, %v8044_v48  ;;  %v6597_v52 = vld [vmem:[#allocation8 + $0x100] ss:$24 sps:$4 sm:$0xff]  }
 0x5fd   : > { %v2318_v57 = vpop.f32.mrb[8].mxu1 }
 0x5fe   : > { %v2320_v58 = vpop.f32.mrb[9].mxu1  ;;  %v8080_v61 = vadd.f32 %v2318_v57, %v1770_v56  ;;  %v6605_v57 = vld [vmem:[#allocation8 + $0x164] ss:$24 sps:$4 sm:$0xff]  }
 0x5ff   : > { %v8078_v59 = vadd.f32 %v2320_v58, %v1774_v55  ;;  %v2322_v60 = vpop.f32.mrb[10].mxu1  ;;  %v6603_v58 = vld [vmem:[#allocation8 + $0x160] ss:$24 sps:$4 sm:$0xff]  }
 0x600   : > { %v8082_v62 = vadd.f32 %v2322_v60, %v1770_v56  ;;  %v2324_v63 = vpop.f32.mrb[11].mxu1  ;;  %v2327_v0 = vmax.f32 %v8080_v61, 0.0  ;;  %v6600_v56 = vld [vmem:[#allocation8 + $0x130] ss:$24 sps:$4 sm:$0xff]   ;;  %v6608_v60 = vld [vmem:[#allocation8 + $0x194] ss:$24 sps:$4 sm:$0xff]  }
 0x601   : > { %v8084_v32 = vadd.f32 %v2324_v63, %v1774_v55  ;;  %v2328_v36 = vmax.f32 %v8078_v59, 0.0  ;;  %v6602_v55 = vld [vmem:[#allocation8 + $0x134] ss:$24 sps:$4 sm:$0xff]   ;;  %v6606_v63 = vld [vmem:[#allocation8 + $0x190] ss:$24 sps:$4 sm:$0xff]  }
 0x602   : > { %v2329_v38 = vmax.f32 %v8082_v62, 0.0  ;;  %v6678_v59 = vld [vmem:[#allocation17] ss:$16 sps:$4 sm:$0xff]   ;;  %v6689_v62 = vld [vmem:[#allocation17 + $0x2c] ss:$16 sps:$4 sm:$0xff]  }
 0x603   : > { %v2330_v39 = vmax.f32 %v8084_v32, 0.0  ;;  %v6684_v32 = vld [vmem:[#allocation17 + $0x20] ss:$16 sps:$4 sm:$0xff]  }
 0x604   : > { %v8100_v3 = vpack.c.bf16 %v2329_v38, %v2327_v0 }
 0x605   : > { %v8094_v1 = vpack.c.bf16 %v2330_v39, %v2328_v36 }
 0x607   : > { %2973 = vmatprep.mubr.bf16.mxu0 %v8094_v1 }
 0x608   : > { %2974 = vmatmul.mubr.bf16.vlgmr.msra.gmra.mrb[12].mxu0 %v8100_v3 }
 0x609   : > { %2985 = vmatpush1.bf16.msra.mxu0 %v6534_v2  ;;  %3016 = vmatprep.mubr.bf16.mxu0 %v8094_v1  ;;  %v6609_v2 = vld [vmem:[#allocation8 + $0x1c0] ss:$24 sps:$4 sm:$0xff]  }
 0x60a   : > { %2986 = vmatprep.subr.bf16.mxu0 %v6539_v4  ;;  %v6614_v4 = vld [vmem:[#allocation8 + $0x1f4] ss:$24 sps:$4 sm:$0xff]  }
 0x60d   : > { %2987 = vmatpush1.bf16.msra.mxu0 %v6537_v5  ;;  %v6612_v5 = vld [vmem:[#allocation8 + $0x1f0] ss:$24 sps:$4 sm:$0xff]  }
 0x60e   : > { %2988 = vmatprep.subr.bf16.mxu0 %v6542_v6  ;;  %v6617_v6 = vld [vmem:[#allocation8 + $0x224] ss:$24 sps:$4 sm:$0xff]  }
 0x611   : > { %2989 = vmatpush1.bf16.msra.mxu0 %v6540_v7  ;;  %v6615_v7 = vld [vmem:[#allocation8 + $0x220] ss:$24 sps:$4 sm:$0xff]  }
 0x612   : > { %2990 = vmatprep.subr.bf16.mxu0 %v6545_v8  ;;  %v6620_v8 = vld [vmem:[#allocation8 + $0x254] ss:$24 sps:$4 sm:$0xff]  }
 0x615   : > { %2991 = vmatpush1.bf16.msra.mxu0 %v6543_v9  ;;  %v6618_v9 = vld [vmem:[#allocation8 + $0x250] ss:$24 sps:$4 sm:$0xff]  }
 0x616   : > { %2992 = vmatprep.subr.bf16.mxu0 %v6548_v10  ;;  %v6623_v10 = vld [vmem:[#allocation8 + $0x284] ss:$24 sps:$4 sm:$0xff]  }
 0x619   : > { %2993 = vmatpush1.bf16.msra.mxu0 %v6546_v11  ;;  %v6621_v11 = vld [vmem:[#allocation8 + $0x280] ss:$24 sps:$4 sm:$0xff]  }
 0x61a   : > { %2994 = vmatprep.subr.bf16.mxu0 %v6551_v12  ;;  %v6626_v12 = vld [vmem:[#allocation8 + $0x2b4] ss:$24 sps:$4 sm:$0xff]  }
 0x61d   : > { %2995 = vmatpush1.bf16.msra.mxu0 %v6549_v13  ;;  %v6624_v13 = vld [vmem:[#allocation8 + $0x2b0] ss:$24 sps:$4 sm:$0xff]  }
 0x61e   : > { %2996 = vmatprep.subr.bf16.mxu0 %v6554_v14  ;;  %v6629_v14 = vld [vmem:[#allocation8 + $0x2e4] ss:$24 sps:$4 sm:$0xff]  }
 0x621   : > { %2997 = vmatpush1.bf16.msra.mxu0 %v6552_v15  ;;  %v6627_v15 = vld [vmem:[#allocation8 + $0x2e0] ss:$24 sps:$4 sm:$0xff]  }
 0x622   : > { %2998 = vmatprep.subr.bf16.mxu0 %v6557_v16  ;;  %v2429_v16 = vld [vmem:[#allocation10] sm:$0x3f] }
 0x625   : > { %2999 = vmatpush1.bf16.msra.mxu0 %v6555_v17  ;;  %v2434_v17 = vrot.slane %v2429_v16, %v8044_v48 }
 0x626   : > { %3000 = vmatprep.subr.bf16.mxu0 %v6560_v18  ;;  %v2438_v18 = vrot.slane %v2429_v16, %v8071_v54 }
 0x629   : > { %3001 = vmatpush1.bf16.msra.mxu0 %v6558_v19 }
 0x62a   : > { %3002 = vmatprep.subr.bf16.mxu0 %v6563_v20 }
 0x62d   : > { %3003 = vmatpush1.bf16.msra.mxu0 %v6561_v22 }
 0x62e   : > { %3004 = vmatprep.subr.bf16.mxu0 %v6566_v23 }
 0x631   : > { %3005 = vmatpush1.bf16.msra.mxu0 %v6564_v24 }
 0x632   : > { %3006 = vmatprep.subr.bf16.mxu0 %v6569_v25 }
 0x635   : > { %3007 = vmatpush1.bf16.msra.mxu0 %v6567_v26 }
 0x636   : > { %3008 = vmatprep.subr.bf16.mxu0 %v6572_v27 }
 0x639   : > { %3009 = vmatpush1.bf16.msra.mxu0 %v6570_v28 }
 0x63a   : > { %3010 = vmatprep.subr.bf16.mxu0 %v6575_v29 }
 0x63d   : > { %3011 = vmatpush1.bf16.msra.mxu0 %v6573_v30 }
 0x63e   : > { %3012 = vmatprep.subr.bf16.mxu0 %v6578_v31 }
 0x641   : > { %3013 = vmatpush1.bf16.msra.mxu0 %v6576_v35 }
 0x642   : > { %3014 = vmatprep.subr.bf16.mxu0 %v6581_v37 }
 0x645   : > { %3015 = vmatpush1.bf16.msra.mxu0 %v6579_v40  ;;  %v2445_v40 = vsub.s32 3, %v8041_v45 }
 0x646   : > { %3027 = vmatprep.subr.bf16.mxu0 %v6584_v41 }
 0x648   : > { %3017 = vmatmul.mubr.bf16.vlgmr.msra.gmra.mrb[16].mxu0 %v8100_v3 }
 0x649   : > { %3028 = vmatpush1.bf16.msra.mxu0 %v6582_v34  ;;  %3059 = vmatprep.mubr.bf16.mxu0 %v8094_v1  ;;  %v6611_v1 = vld [vmem:[#allocation8 + $0x1c4] ss:$24 sps:$4 sm:$0xff]  }
 0x64a   : > { %3029 = vmatprep.subr.bf16.mxu0 %v6587_v42  ;;  %v2446_v42 = vrot.slane %v2429_v16, %v2445_v40 }
 0x64d   : > { %3030 = vmatpush1.bf16.msra.mxu0 %v6585_v21 }
 0x64e   : > { %3031 = vmatprep.subr.bf16.mxu0 %v6590_v43 }
 0x651   : > { %3032 = vmatpush1.bf16.msra.mxu0 %v6588_v46 }
 0x652   : > { %3033 = vmatprep.subr.bf16.mxu0 %v6593_v47 }
 0x655   : > { %3034 = vmatpush1.bf16.msra.mxu0 %v6591_v49 }
 0x656   : > { %3035 = vmatprep.subr.bf16.mxu0 %v6596_v50 }
 0x659   : > { %3036 = vmatpush1.bf16.msra.mxu0 %v6594_v51 }
 0x65a   : > { %3037 = vmatprep.subr.bf16.mxu0 %v6599_v53 }
 0x65d   : > { %3038 = vmatpush1.bf16.msra.mxu0 %v6597_v52 }
 0x65e   : > { %3039 = vmatprep.subr.bf16.mxu0 %v6602_v55 }
 0x661   : > { %3040 = vmatpush1.bf16.msra.mxu0 %v6600_v56  ;;  %v2449_v56 = vsub.s32 4, %v8041_v45 }
 0x662   : > { %3041 = vmatprep.subr.bf16.mxu0 %v6605_v57  ;;  %v2453_v57 = vsub.s32 5, %v8041_v45 }
 0x665   : > { %3042 = vmatpush1.bf16.msra.mxu0 %v6603_v58  ;;  %v2450_v58 = vrot.slane %v2429_v16, %v2449_v56 }
 0x666   : > { %3043 = vmatprep.subr.bf16.mxu0 %v6608_v60 }
 0x669   : > { %3044 = vmatpush1.bf16.msra.mxu0 %v6606_v63  ;;  %v2454_v63 = vrot.slane %v2429_v16, %v2453_v57 }
 0x66a   : > { %3045 = vmatprep.subr.bf16.mxu0 %v6611_v1 }
 0x66d   : > { %3046 = vmatpush1.bf16.msra.mxu0 %v6609_v2 }
 0x66e   : > { %3047 = vmatprep.subr.bf16.mxu0 %v6614_v4 }
 0x671   : > { %3048 = vmatpush1.bf16.msra.mxu0 %v6612_v5 }
 0x672   : > { %3049 = vmatprep.subr.bf16.mxu0 %v6617_v6 }
 0x675   : > { %3050 = vmatpush1.bf16.msra.mxu0 %v6615_v7 }
 0x676   : > { %3051 = vmatprep.subr.bf16.mxu0 %v6620_v8 }
 0x679   : > { %3052 = vmatpush1.bf16.msra.mxu0 %v6618_v9 }
 0x67a   : > { %3053 = vmatprep.subr.bf16.mxu0 %v6623_v10 }
 0x67d   : > { %3054 = vmatpush1.bf16.msra.mxu0 %v6621_v11 }
 0x67e   : > { %3055 = vmatprep.subr.bf16.mxu0 %v6626_v12 }
 0x681   : > { %3056 = vmatpush1.bf16.msra.mxu0 %v6624_v13 }
 0x682   : > { %3057 = vmatprep.subr.bf16.mxu0 %v6629_v14 }
 0x685   : > { %3058 = vmatpush1.bf16.msra.mxu0 %v6627_v15 }
 0x688   : > { %3060 = vmatmul.mubr.bf16.vlgmr.msra.gmra.mrb[20].mxu0 %v8100_v3  ;;  %v2441_v3 = vsub.s32 2, %v8041_v45 }
 0x68a   : > { %v2442_v41 = vrot.slane %v2429_v16, %v2441_v3 }
 0x6db   : > { %v2975_v19 = vpop.f32.mrb[12].mxu0 }
 0x6dc   : > { %v2976_v20 = vadd.f32 %v2975_v19, %v2434_v17  ;;  %v2977_v22 = vpop.f32.mrb[13].mxu0 }
 0x6dd   : > { %v2978_v23 = vadd.f32 %v2977_v22, %v2438_v18  ;;  %v2979_v24 = vpop.f32.mrb[14].mxu0 }
 0x6de   : > { %v2980_v25 = vadd.f32 %v2979_v24, %v2434_v17  ;;  %v2981_v26 = vpop.f32.mrb[15].mxu0  ;;  %v3070_v28 = vmul.f32 0.125, %v2976_v20 }
 0x6df   : > { %v2982_v27 = vadd.f32 %v2981_v26, %v2438_v18  ;;  %v3315_v30 = vmul.f32 0.125, %v2978_v23 }
 0x6e0   : > { %v3071_v29 = vmul.f32 0.125, %v2980_v25 }
 0x6e1   : > { %v3316_v31 = vmul.f32 0.125, %v2982_v27 }
 0x6e2   : > { %v3072_v35 = vpack.c.bf16 %v3071_v29, %v3070_v28 }
 0x6e3   : > { %v8110_v37 = vpack.c.bf16 %v3316_v31, %v3315_v30 }
 0x71b   : > { %v3018_v34 = vpop.f32.mrb[16].mxu0 }
 0x71c   : > { %v3020_v21 = vpop.f32.mrb[17].mxu0  ;;  %v3019_v46 = vadd.f32 %v3018_v34, %v2442_v41 }
 0x71d   : > { %v3022_v43 = vpop.f32.mrb[18].mxu0  ;;  %v3021_v50 = vadd.f32 %v3020_v21, %v2446_v42 }
 0x71e   : > { %v3023_v47 = vadd.f32 %v3022_v43, %v2442_v41  ;;  %v3024_v49 = vpop.f32.mrb[19].mxu0 }
 0x71f   : > { %v3025_v51 = vadd.f32 %v3024_v49, %v2446_v42 }
 0x720   : > { %v3073_v53 = vpack.c.bf16 %v3023_v47, %v3019_v46 }
 0x721   : > { %v8118_v52 = vpack.c.bf16 %v3025_v51, %v3021_v50 }
 0x722   : > { %v3080_v55 = vsel %vm3075_vm6, %v3073_v53, 0 }
 0x723   : > { %6058 = vmatpush3.bf16.xpose.msra.mxu1 %v3080_v55 }
 0x724   : > { %6063 = vmatprep.subr.bf16.mxu1 %v7445_v33 }
 0x72a   : > { %6060 = vmatmul.mubr.msk.bf16.vlgmr.msra.gmra.mrb[12].mxu1 %vm3075_vm6, %v3072_v35 }
 0x72b   : > { %6065 = vmatprep.mubr.msk.bf16.mxu1 %vm7446_vm3, %v7445_v33 }
 0x75b   : > { %v3061_v60 = vpop.f32.mrb[20].mxu0 }
 0x75c   : > { %v3063_v1 = vpop.f32.mrb[21].mxu0  ;;  %v3062_v4 = vadd.f32 %v3061_v60, %v2450_v58 }
 0x75d   : > { %v3065_v2 = vpop.f32.mrb[22].mxu0  ;;  %v3064_v7 = vadd.f32 %v3063_v1, %v2454_v63 }
 0x75e   : > { %v3066_v5 = vadd.f32 %v3065_v2, %v2450_v58  ;;  %v3067_v6 = vpop.f32.mrb[23].mxu0 }
 0x75f   : > { %v3068_v8 = vadd.f32 %v3067_v6, %v2454_v63 }
 0x760   : > { %v8127_v9 = vpack.c.bf16 %v3066_v5, %v3062_v4 }
 0x761   : > { %v8129_v10 = vpack.c.bf16 %v3068_v8, %v3064_v7 }
 0x762   : > { %6064 = vmatpush3.bf16.msra.mxu1 %v8127_v9 }
 0x763   : > { %6069 = vmatprep.subr.bf16.mxu1 %v7445_v33 }
 0x7fd   : > { %v3116_v11 = vpop.f32.mrb[12].mxu1 }
 0x7fe   : > { %v6061_v12 = vpop.f32.mrb[13].mxu1  ;;  %v3124_v13 = vsel %vm3123_vm7, %v3116_v11, -inf }
 0x7ff   : > { %3125 = vmax.xlane.f32.xlu0 %v3124_v13  ;;  %v3119_v14 = vpop.f32.mrb[14].mxu1 }
 0x800   : > { %v6062_v15 = vpop.f32.mrb[15].mxu1  ;;  %v3127_v16 = vsel %vm3123_vm7, %v3119_v14, -inf }
 0x803   : > { %3128 = vmax.xlane.f32.xlu0 %v3127_v16 }
 0x819   : > { %3195 = vrot.lane.b32.xlu0 %v3073_v53, %s7448_s30 }
 0x88c   : > { %v3126_v17 = vpop.xlane.xlu0 %3125 }
 0x88d   : > { %v3130_v18 = vsub.f32 %v3116_v11, %v3126_v17 }
 0x88f   : > { %v3132_v19 = vmul.f32 1.442695, %v3130_v18 }
 0x890   : > { %v3129_v20 = vpop.xlane.xlu0 %3128 }
 0x891   : > { %6922 = vpow2.f32 %v3132_v19  ;;  %v3131_v22 = vsub.f32 %v3119_v14, %v3129_v20 }
 0x893   : > { %v3134_v23 = vmul.f32 1.442695, %v3131_v22 }
 0x894   : > { %v3196_v42 = vpop.permute.xlu0 %3195 }
 0x895   : > { %6924 = vpow2.f32 %v3134_v23  ;;  %v3201_v43 = vsel %vm3075_vm6, %v3196_v42, 0 }
 0x89b   : > { %v6923_v24 = vpop.eup %6922 }
 0x89c   : > { %v3136_v25 = vsel %vm3123_vm7, %v6923_v24, 0.0 }
 0x89d   : > { %3137 = vadd.xlane.f32.xlu1 %v3136_v25 }
 0x89f   : > { %v6925_v26 = vpop.eup %6924 }
 0x8a0   : > { %v3139_v27 = vsel %vm3123_vm7, %v6925_v26, 0.0 }
 0x8a1   : > { %3140 = vadd.xlane.f32.xlu1 %v3139_v27 }
 0x8b2   : > { %3192 = vrot.lane.b32.xlu1 %v3072_v35, %s7448_s30 }
 0x92a   : > { %v3138_v28 = vpop.xlane.xlu1 %3137 }
 0x92b   : > { %6926 = vrcp.f32 %v3138_v28 }
 0x92e   : > { %v3141_v29 = vpop.xlane.xlu1 %3140 }
 0x92f   : > { %6928 = vrcp.f32 %v3141_v29 }
 0x932   : > { %v3193_v35 = vpop.permute.xlu1 %3192 }
 0x935   : > { %v6927_v30 = vpop.eup %6926 }
 0x936   : > { %v3143_v41 = vmul.f32 %v6927_v30, %v6923_v24 }
 0x939   : > { %v6929_v31 = vpop.eup %6928 }
 0x93a   : > { %v3145_v34 = vmul.f32 %v6929_v31, %v6925_v26 }
 0x93c   : > { %v3146_v21 = vpack.c.bf16 %v3145_v34, %v3143_v41 }
 0x93e   : > { %6066 = vmatmul.mubr.msk.bf16.vlgmr.msra.gmra.mrb[16].mxu1 %vm3123_vm7, %v3146_v21 }
 0x93f   : > { %6070 = vmatpush3.bf16.xpose.msra.mxu1 %v3201_v43  ;;  %6071 = vmatprep.mubr.msk.bf16.mxu1 %vm7446_vm3, %v7445_v33 }
 0x940   : > { %6075 = vmatprep.subr.bf16.mxu1 %v7445_v33 }
 0x946   : > { %6072 = vmatmul.mubr.msk.bf16.vlgmr.msra.gmra.mrb[20].mxu1 %vm3075_vm6, %v3193_v35 }
 0x947   : > { %6077 = vmatprep.mubr.msk.bf16.mxu1 %vm7446_vm3, %v7445_v33 }
 0xa11   : > { %v8147_v46 = vpop.f32.mrb[16].mxu1 }
 0xa12   : > { %v6067_v47 = vpop.f32.mrb[17].mxu1 }
 0xa13   : > { %v8149_v49 = vpop.f32.mrb[18].mxu1 }
 0xa14   : > { %v6068_v50 = vpop.f32.mrb[19].mxu1 }
 0xa19   : > { %v3237_v51 = vpop.f32.mrb[20].mxu1 }
 0xa1a   : > { %v6073_v53 = vpop.f32.mrb[21].mxu1  ;;  %v3244_v55 = vsel %vm3123_vm7, %v3237_v51, -inf }
 0xa1b   : > { %3245 = vmax.xlane.f32.xlu1 %v3244_v55  ;;  %v3240_v56 = vpop.f32.mrb[22].mxu1 }
 0xa1c   : > { %v6074_v57 = vpop.f32.mrb[23].mxu1  ;;  %v3247_v58 = vsel %vm3123_vm7, %v3240_v56, -inf }
 0xa1d   : > { %3248 = vmax.xlane.f32.xlu0 %v3247_v58 }
 0xaa8   : > { %v3246_v60 = vpop.xlane.xlu1 %3245 }
 0xaa9   : > { %v3250_v63 = vsub.f32 %v3237_v51, %v3246_v60 }
 0xaaa   : > { %v3249_v1 = vpop.xlane.xlu0 %3248 }
 0xaab   : > { %v3252_v2 = vmul.f32 1.442695, %v3250_v63  ;;  %v3251_v4 = vsub.f32 %v3240_v56, %v3249_v1 }
 0xaad   : > { %6930 = vpow2.f32 %v3252_v2  ;;  %v3254_v5 = vmul.f32 1.442695, %v3251_v4 }
 0xaaf   : > { %6932 = vpow2.f32 %v3254_v5 }
 0xab7   : > { %v6931_v6 = vpop.eup %6930 }
 0xab8   : > { %v3256_v7 = vsel %vm3123_vm7, %v6931_v6, 0.0 }
 0xab9   : > { %v6933_v8 = vpop.eup %6932  ;;  %3257 = vadd.xlane.f32.xlu0 %v3256_v7 }
 0xaba   : > { %v3259_v11 = vsel %vm3123_vm7, %v6933_v8, 0.0 }
 0xabb   : > { %3260 = vadd.xlane.f32.xlu1 %v3259_v11 }
 0xacf   : > { %3268 = vrot.lane.b32.xlu0 %v8127_v9, %s7448_s30  ;;  %v3324_v9 = vsel %vm3075_vm6, %v8118_v52, 0 }
 0xad3   : > { %3435 = vrot.lane.b32.xlu0 %v8110_v37, %s7448_s30 }
 0xb46   : > { %v3258_v12 = vpop.xlane.xlu0 %3257 }
 0xb47   : > { %6934 = vrcp.f32 %v3258_v12 }
 0xb48   : > { %v3261_v13 = vpop.xlane.xlu1 %3260 }
 0xb49   : > { %6936 = vrcp.f32 %v3261_v13 }
 0xb4a   : > { %v3269_v14 = vpop.permute.xlu0 %3268 }
 0xb4b   : > { %6076 = vmatpush3.bf16.msra.mxu1 %v3269_v14 }
 0xb4c   : > { %6081 = vmatprep.subr.bf16.mxu1 %v7445_v33 }
 0xb51   : > { %v6935_v15 = vpop.eup %6934 }
 0xb52   : > { %v3263_v17 = vmul.f32 %v6935_v15, %v6931_v6 }
 0xb53   : > { %v6937_v16 = vpop.eup %6936 }
 0xb54   : > { %v3265_v18 = vmul.f32 %v6937_v16, %v6933_v8 }
 0xb56   : > { %v3266_v19 = vpack.c.bf16 %v3265_v18, %v3263_v17 }
 0xb58   : > { %6078 = vmatmul.mubr.msk.bf16.vlgmr.msra.gmra.mrb[24].mxu1 %vm3123_vm7, %v3266_v19 }
 0xb59   : > { %6082 = vmatpush3.bf16.xpose.msra.mxu1 %v3324_v9  ;;  %6083 = vmatprep.mubr.msk.bf16.mxu1 %vm7446_vm3, %v7445_v33 }
 0xb5a   : > { %6087 = vmatprep.subr.bf16.mxu1 %v7445_v33 }
 0xb60   : > { %6084 = vmatmul.mubr.msk.bf16.vlgmr.msra.gmra.mrb[28].mxu1 %vm3075_vm6, %v8110_v37 }
 0xb61   : > { %6088 = vmatpush3.bf16.msra.mxu1 %v8129_v10  ;;  %6089 = vmatprep.mubr.msk.bf16.mxu1 %vm7446_vm3, %v7445_v33 }
 0xb62   : > { %6093 = vmatprep.subr.bf16.mxu1 %v7445_v33 }
 0xc2b   : > { %v8172_v20 = vpop.f32.mrb[24].mxu1 }
 0xc2c   : > { %v6079_v22 = vpop.f32.mrb[25].mxu1 }
 0xc2d   : > { %v8174_v23 = vpop.f32.mrb[26].mxu1 }
 0xc2e   : > { %v6303_v24 = vpack.i.bf16 %v8174_v23, %v8172_v20  ;;  %v6080_v25 = vpop.f32.mrb[27].mxu1 }
 0xc33   : > { %v3360_v26 = vpop.f32.mrb[28].mxu1 }
 0xc34   : > { %v6085_v27 = vpop.f32.mrb[29].mxu1  ;;  %v3367_v37 = vsel %vm3123_vm7, %v3360_v26, -inf }
 0xc35   : > { %3368 = vmax.xlane.f32.xlu1 %v3367_v37  ;;  %v3363_v28 = vpop.f32.mrb[30].mxu1 }
 0xc36   : > { %v6086_v29 = vpop.f32.mrb[31].mxu1  ;;  %v3370_v30 = vsel %vm3123_vm7, %v3363_v28, -inf }
 0xc39   : > { %3371 = vmax.xlane.f32.xlu1 %v3370_v30 }
 0xcc2   : > { %v3369_v31 = vpop.xlane.xlu1 %3368 }
 0xcc3   : > { %v3373_v41 = vsub.f32 %v3360_v26, %v3369_v31 }
 0xcc5   : > { %v3375_v34 = vmul.f32 1.442695, %v3373_v41 }
 0xcc6   : > { %v3372_v42 = vpop.xlane.xlu1 %3371 }
 0xcc7   : > { %6938 = vpow2.f32 %v3375_v34  ;;  %v3374_v21 = vsub.f32 %v3363_v28, %v3372_v42 }
 0xcc9   : > { %v3377_v43 = vmul.f32 1.442695, %v3374_v21  ;;  %v6630_v21 = vld [vmem:[#allocation11] ss:$8 sps:$4 sm:$0xff]  }
 0xccb   : > { %6940 = vpow2.f32 %v3377_v43  ;;  %v6632_v43 = vld [vmem:[#allocation11 + $0x4] ss:$8 sps:$4 sm:$0xff]  }
 0xccc   : > { %3784 = vmatprep.subr.bf16.mxu0 %v6632_v43 }
 0xccd   : > { %3785 = vmatpush1.bf16.msra.mxu0 %v6630_v21 }
 0xcd1   : > { %v6939_v35 = vpop.eup %6938 }
 0xcd2   : > { %v3379_v47 = vsel %vm3123_vm7, %v6939_v35, 0.0 }
 0xcd3   : > { %3380 = vadd.xlane.f32.xlu1 %v3379_v47  ;;  %v6633_v47 = vld [vmem:[#allocation11 + $0x10] ss:$8 sps:$4 sm:$0xff]  }
 0xcd5   : > { %v6941_v50 = vpop.eup %6940 }
 0xcd6   : > { %v3382_v51 = vsel %vm3123_vm7, %v6941_v50, 0.0 }
 0xcd7   : > { %3383 = vadd.xlane.f32.xlu1 %v3382_v51  ;;  %v6641_v51 = vld [vmem:[#allocation11 + $0x34] ss:$8 sps:$4 sm:$0xff]  }
 0xce8   : > { %3438 = vrot.lane.b32.xlu1 %v8118_v52, %s7448_s30  ;;  %v3436_v52 = vpop.permute.xlu0 %3435 }
 0xd60   : > { %v3381_v53 = vpop.xlane.xlu1 %3380 }
 0xd61   : > { %6942 = vrcp.f32 %v3381_v53  ;;  %v6639_v53 = vld [vmem:[#allocation11 + $0x30] ss:$8 sps:$4 sm:$0xff]  }
 0xd64   : > { %v3384_v55 = vpop.xlane.xlu1 %3383 }
 0xd65   : > { %6944 = vrcp.f32 %v3384_v55  ;;  %v6644_v55 = vld [vmem:[#allocation11 + $0x44] ss:$8 sps:$4 sm:$0xff]  }
 0xd68   : > { %v3439_v63 = vpop.permute.xlu1 %3438 }
 0xd69   : > { %v3444_v2 = vsel %vm3075_vm6, %v3439_v63, 0  ;;  %v6648_v63 = vld [vmem:[#allocation11 + $0x60] ss:$8 sps:$4 sm:$0xff]  }
 0xd6b   : > { %v6943_v56 = vpop.eup %6942 }
 0xd6c   : > { %v3386_v58 = vmul.f32 %v6943_v56, %v6939_v35  ;;  %v6635_v35 = vld [vmem:[#allocation11 + $0x14] ss:$8 sps:$4 sm:$0xff]   ;;  %v6642_v56 = vld [vmem:[#allocation11 + $0x40] ss:$8 sps:$4 sm:$0xff]  }
 0xd6d   : > { %3786 = vmatprep.subr.bf16.mxu0 %v6635_v35 }
 0xd6e   : > { %3787 = vmatpush1.bf16.msra.mxu0 %v6633_v47 }
 0xd6f   : > { %v6945_v57 = vpop.eup %6944 }
 0xd70   : > { %v3388_v60 = vmul.f32 %v6945_v57, %v6941_v50  ;;  %v6636_v50 = vld [vmem:[#allocation11 + $0x20] ss:$8 sps:$4 sm:$0xff]   ;;  %v6647_v57 = vld [vmem:[#allocation11 + $0x54] ss:$8 sps:$4 sm:$0xff]  }
 0xd72   : > { %v3389_v1 = vpack.c.bf16 %v3388_v60, %v3386_v58  ;;  %v6645_v58 = vld [vmem:[#allocation11 + $0x50] ss:$8 sps:$4 sm:$0xff]   ;;  %v6650_v60 = vld [vmem:[#allocation11 + $0x64] ss:$8 sps:$4 sm:$0xff]  }
 0xd74   : > { %6090 = vmatmul.mubr.msk.bf16.vlgmr.msra.gmra.mrb[32].mxu1 %vm3123_vm7, %v3389_v1  ;;  %v6653_v1 = vld [vmem:[#allocation11 + $0x74] ss:$8 sps:$4 sm:$0xff]  }
 0xd75   : > { %6094 = vmatpush3.bf16.xpose.msra.mxu1 %v3444_v2  ;;  %6095 = vmatprep.mubr.msk.bf16.mxu1 %vm7446_vm3, %v7445_v33  ;;  %v6651_v2 = vld [vmem:[#allocation11 + $0x70] ss:$8 sps:$4 sm:$0xff]  }
 0xd76   : > { %6099 = vmatprep.subr.bf16.mxu1 %v7445_v33 }
 0xd7c   : > { %6096 = vmatmul.mubr.msk.bf16.vlgmr.msra.gmra.mrb[36].mxu1 %vm3075_vm6, %v3436_v52  ;;  %v6656_v52 = vld [vmem:[#allocation11 + $0x84] ss:$8 sps:$4 sm:$0xff]  }
 0xd7d   : > { %6101 = vmatprep.mubr.msk.bf16.mxu1 %vm7446_vm3, %v7445_v33 }
 0xe47   : > { %v8192_v4 = vpop.f32.mrb[32].mxu1 }
 0xe48   : > { %v6091_v5 = vpop.f32.mrb[33].mxu1 }
 0xe49   : > { %v8194_v6 = vpop.f32.mrb[34].mxu1  ;;  %v6654_v5 = vld [vmem:[#allocation11 + $0x80] ss:$8 sps:$4 sm:$0xff]  }
 0xe4a   : > { %v6092_v7 = vpop.f32.mrb[35].mxu1 }
 0xe4b   : > { %v6659_v7 = vld [vmem:[#allocation11 + $0x94] ss:$8 sps:$4 sm:$0xff]  }
 0xe4f   : > { %v3480_v8 = vpop.f32.mrb[36].mxu1 }
 0xe50   : > { %v6097_v11 = vpop.f32.mrb[37].mxu1  ;;  %v3487_v12 = vsel %vm3123_vm7, %v3480_v8, -inf }
 0xe51   : > { %3488 = vmax.xlane.f32.xlu0 %v3487_v12  ;;  %v3483_v13 = vpop.f32.mrb[38].mxu1  ;;  %v6662_v11 = vld [vmem:[#allocation11 + $0xa4] ss:$8 sps:$4 sm:$0xff]   ;;  %v6660_v12 = vld [vmem:[#allocation11 + $0xa0] ss:$8 sps:$4 sm:$0xff]  }
 0xe52   : > { %v6098_v14 = vpop.f32.mrb[39].mxu1  ;;  %v3490_v15 = vsel %vm3123_vm7, %v3483_v13, -inf }
 0xe53   : > { %3491 = vmax.xlane.f32.xlu1 %v3490_v15  ;;  %v6663_v14 = vld [vmem:[#allocation11 + $0xb0] ss:$8 sps:$4 sm:$0xff]   ;;  %v6668_v15 = vld [vmem:[#allocation11 + $0xc4] ss:$8 sps:$4 sm:$0xff]  }
 0xede   : > { %v3489_v16 = vpop.xlane.xlu0 %3488 }
 0xedf   : > { %v3493_v17 = vsub.f32 %v3480_v8, %v3489_v16  ;;  %v6657_v8 = vld [vmem:[#allocation11 + $0x90] ss:$8 sps:$4 sm:$0xff]   ;;  %v6666_v16 = vld [vmem:[#allocation11 + $0xc0] ss:$8 sps:$4 sm:$0xff]  }
 0xee0   : > { %v3492_v18 = vpop.xlane.xlu1 %3491 }
 0xee1   : > { %v3495_v33 = vmul.f32 1.442695, %v3493_v17  ;;  %v3494_v19 = vsub.f32 %v3483_v13, %v3492_v18  ;;  %v6665_v13 = vld [vmem:[#allocation11 + $0xb4] ss:$8 sps:$4 sm:$0xff]   ;;  %v6669_v18 = vld [vmem:[#allocation11 + $0xd0] ss:$8 sps:$4 sm:$0xff]  }
 0xee2   : > { %v6671_v17 = vld [vmem:[#allocation11 + $0xd4] ss:$8 sps:$4 sm:$0xff]  }
 0xee3   : > { %6946 = vpow2.f32 %v3495_v33  ;;  %v3497_v9 = vmul.f32 1.442695, %v3494_v19  ;;  %v6672_v33 = vld [vmem:[#allocation11 + $0xe0] ss:$8 sps:$4 sm:$0xff]   ;;  %v6674_v19 = vld [vmem:[#allocation11 + $0xe4] ss:$8 sps:$4 sm:$0xff]  }
 0xee5   : > { %6948 = vpow2.f32 %v3497_v9  ;;  %v6675_v9 = vld [vmem:[#allocation11 + $0xf0] ss:$8 sps:$4 sm:$0xff]  }
 0xeed   : > { %v6947_v22 = vpop.eup %6946 }
 0xeee   : > { %v3499_v25 = vsel %vm3123_vm7, %v6947_v22, 0.0 }
 0xeef   : > { %v6949_v26 = vpop.eup %6948  ;;  %3500 = vadd.xlane.f32.xlu0 %v3499_v25 }
 0xef0   : > { %v3502_v27 = vsel %vm3123_vm7, %v6949_v26, 0.0 }
 0xef3   : > { %3503 = vadd.xlane.f32.xlu0 %v3502_v27 }
 0xf09   : > { %3511 = vrot.lane.b32.xlu0 %v8129_v10, %s7448_s30  ;;  %v6638_v10 = vld [vmem:[#allocation11 + $0x24] ss:$8 sps:$4 sm:$0xff]  }
 0xf0a   : > { %3788 = vmatprep.subr.bf16.mxu0 %v6638_v10 }
 0xf0b   : > { %3789 = vmatpush1.bf16.msra.mxu0 %v6636_v50 }
 0xf0c   : > { %3790 = vmatprep.subr.bf16.mxu0 %v6641_v51 }
 0xf0f   : > { %3791 = vmatpush1.bf16.msra.mxu0 %v6639_v53 }
 0xf10   : > { %3792 = vmatprep.subr.bf16.mxu0 %v6644_v55 }
 0xf13   : > { %3793 = vmatpush1.bf16.msra.mxu0 %v6642_v56 }
 0xf14   : > { %3794 = vmatprep.subr.bf16.mxu0 %v6647_v57 }
 0xf17   : > { %3795 = vmatpush1.bf16.msra.mxu0 %v6645_v58 }
 0xf18   : > { %3796 = vmatprep.subr.bf16.mxu0 %v6650_v60 }
 0xf1b   : > { %3797 = vmatpush1.bf16.msra.mxu0 %v6648_v63 }
 0xf1c   : > { %3798 = vmatprep.subr.bf16.mxu0 %v6653_v1  ;;  %v6681_v1 = vld [vmem:[#allocation17 + $0x8] ss:$16 sps:$4 sm:$0xff]  }
 0xf1f   : > { %3799 = vmatpush1.bf16.msra.mxu0 %v6651_v2  ;;  %v6683_v2 = vld [vmem:[#allocation17 + $0xc] ss:$16 sps:$4 sm:$0xff]  }
 0xf20   : > { %3800 = vmatprep.subr.bf16.mxu0 %v6656_v52  ;;  %v6686_v52 = vld [vmem:[#allocation17 + $0x24] ss:$16 sps:$4 sm:$0xff]  }
 0xf23   : > { %3801 = vmatpush1.bf16.msra.mxu0 %v6654_v5  ;;  %v6695_v5 = vld [vmem:[#allocation17 + $0x4c] ss:$16 sps:$4 sm:$0xff]  }
 0xf24   : > { %3802 = vmatprep.subr.bf16.mxu0 %v6659_v7  ;;  %v6690_v7 = vld [vmem:[#allocation17 + $0x40] ss:$16 sps:$4 sm:$0xff]  }
 0xf27   : > { %3803 = vmatpush1.bf16.msra.mxu0 %v6657_v8  ;;  %v6693_v8 = vld [vmem:[#allocation17 + $0x48] ss:$16 sps:$4 sm:$0xff]  }
 0xf28   : > { %3804 = vmatprep.subr.bf16.mxu0 %v6662_v11  ;;  %v6698_v11 = vld [vmem:[#allocation17 + $0x64] ss:$16 sps:$4 sm:$0xff]  }
 0xf2b   : > { %3805 = vmatpush1.bf16.msra.mxu0 %v6660_v12  ;;  %v6701_v12 = vld [vmem:[#allocation17 + $0x6c] ss:$16 sps:$4 sm:$0xff]  }
 0xf2c   : > { %3806 = vmatprep.subr.bf16.mxu0 %v6665_v13  ;;  %v6696_v13 = vld [vmem:[#allocation17 + $0x60] ss:$16 sps:$4 sm:$0xff]  }
 0xf2f   : > { %3807 = vmatpush1.bf16.msra.mxu0 %v6663_v14  ;;  %v6699_v14 = vld [vmem:[#allocation17 + $0x68] ss:$16 sps:$4 sm:$0xff]  }
 0xf30   : > { %3808 = vmatprep.subr.bf16.mxu0 %v6668_v15  ;;  %v6704_v15 = vld [vmem:[#allocation17 + $0x84] ss:$16 sps:$4 sm:$0xff]  }
 0xf33   : > { %3809 = vmatpush1.bf16.msra.mxu0 %v6666_v16  ;;  %v6707_v16 = vld [vmem:[#allocation17 + $0x8c] ss:$16 sps:$4 sm:$0xff]  }
 0xf34   : > { %3810 = vmatprep.subr.bf16.mxu0 %v6671_v17  ;;  %v6702_v17 = vld [vmem:[#allocation17 + $0x80] ss:$16 sps:$4 sm:$0xff]  }
 0xf37   : > { %3811 = vmatpush1.bf16.msra.mxu0 %v6669_v18  ;;  %v6705_v18 = vld [vmem:[#allocation17 + $0x88] ss:$16 sps:$4 sm:$0xff]  }
 0xf38   : > { %3812 = vmatprep.subr.bf16.mxu0 %v6674_v19  ;;  %v6713_v19 = vld [vmem:[#allocation17 + $0xac] ss:$16 sps:$4 sm:$0xff]  }
 0xf3b   : > { %3813 = vmatpush1.bf16.msra.mxu0 %v6672_v33  ;;  %v6710_v33 = vld [vmem:[#allocation17 + $0xa4] ss:$16 sps:$4 sm:$0xff]  }
 0xf7c   : > { %v3501_v37 = vpop.xlane.xlu0 %3500 }
 0xf7d   : > { %6950 = vrcp.f32 %v3501_v37 }
 0xf80   : > { %v3504_v28 = vpop.xlane.xlu0 %3503 }
 0xf81   : > { %6952 = vrcp.f32 %v3504_v28 }
 0xf84   : > { %v3512_v29 = vpop.permute.xlu0 %3511 }
 0xf85   : > { %6100 = vmatpush3.bf16.msra.mxu1 %v3512_v29 }
 0xf87   : > { %v6951_v30 = vpop.eup %6950 }
 0xf88   : > { %v3506_v41 = vmul.f32 %v6951_v30, %v6947_v22  ;;  %v6677_v22 = vld [vmem:[#allocation11 + $0xf4] ss:$8 sps:$4 sm:$0xff]  }
 0xf89   : > { %3814 = vmatprep.subr.bf16.mxu0 %v6677_v22  ;;  %v6711_v22 = vld [vmem:[#allocation17 + $0xa8] ss:$16 sps:$4 sm:$0xff]  }
 0xf8a   : > { %3815 = vmatpush1.bf16.msra.mxu0 %v6675_v9  ;;  %v6708_v9 = vld [vmem:[#allocation17 + $0xa0] ss:$16 sps:$4 sm:$0xff]  }
 0xf8b   : > { %v6953_v31 = vpop.eup %6952  ;;  %4347 = vmatprep.subr.bf16.mxu0 %v6683_v2  ;;  %v6747_v2 = vld [vmem:[#allocation17 + $0x168] ss:$16 sps:$4 sm:$0xff]  }
 0xf8c   : > { %v3508_v34 = vmul.f32 %v6953_v31, %v6949_v26 }
 0xf8e   : > { %v3509_v42 = vpack.c.bf16 %v3508_v34, %v3506_v41 }
 0xf90   : > { %6102 = vmatmul.mubr.msk.bf16.vlgmr.msra.gmra.mrb[40].mxu1 %vm3123_vm7, %v3509_v42 }
0x1063   : > { %v3551_v25 = vpop.f32.mrb[40].mxu1 }
0x1064   : > { %v6103_v26 = vpop.f32.mrb[41].mxu1 }
0x1065   : > { %v3554_v27 = vpop.f32.mrb[42].mxu1  ;;  %v6719_v26 = vld [vmem:[#allocation17 + $0xcc] ss:$16 sps:$4 sm:$0xff]  }
0x1066   : > { %v6298_v37 = vpack.i.bf16 %v3554_v27, %v3551_v25  ;;  %v6104_v28 = vpop.f32.mrb[43].mxu1  ;;  %v6716_v25 = vld [vmem:[#allocation17 + $0xc4] ss:$16 sps:$4 sm:$0xff]   ;;  %v6714_v27 = vld [vmem:[#allocation17 + $0xc0] ss:$16 sps:$4 sm:$0xff]  }
0x1067   : > { %v6722_v28 = vld [vmem:[#allocation17 + $0xe4] ss:$16 sps:$4 sm:$0xff]  }
0x1068   : > { %6299 = vrot.lane.b32.xlu1 %v6298_v37, %s7448_s30  ;;  %v6717_v37 = vld [vmem:[#allocation17 + $0xc8] ss:$16 sps:$4 sm:$0xff]  }
0x106c   : > { %6304 = vrot.lane.b32.xlu1 %v6303_v24, %s7448_s30  ;;  %v3612_v24 = vld [vmem:[#allocation13] sm:$0x3] }
0x106d   : > { %v3617_v10 = vrot.slane %v3612_v24, %v8044_v48 }
0x10da   : > { %v6300_v29 = vpop.permute.xlu1 %6299 }
0x10db   : > { %v6302_v30 = vunpack.i.h.bf16 %v6300_v29  ;;  %v6301_v31 = vunpack.i.l.bf16 %v6300_v29  ;;  %v6725_v29 = vld [vmem:[#allocation17 + $0xec] ss:$16 sps:$4 sm:$0xff]  }
0x10dd   : > { %v3576_v41 = vsel %vm3075_vm6, %v8192_v4, %v6301_v31  ;;  %v3577_v34 = vsel %vm3075_vm6, %v8194_v6, %v6302_v30  ;;  %v3621_v4 = vrot.slane %v3612_v24, %v8071_v54  ;;  %v6720_v30 = vld [vmem:[#allocation17 + $0xe0] ss:$16 sps:$4 sm:$0xff]   ;;  %v6723_v31 = vld [vmem:[#allocation17 + $0xe8] ss:$16 sps:$4 sm:$0xff]  }
0x10de   : > { %v6305_v42 = vpop.permute.xlu1 %6304  ;;  %v3579_v21 = vpack.c.bf16 %v3577_v34, %v3576_v41  ;;  %v6728_v41 = vld [vmem:[#allocation17 + $0x104] ss:$16 sps:$4 sm:$0xff]   ;;  %v6731_v34 = vld [vmem:[#allocation17 + $0x10c] ss:$16 sps:$4 sm:$0xff]  }
0x10df   : > { %v6307_v43 = vunpack.i.h.bf16 %v6305_v42  ;;  %v6306_v35 = vunpack.i.l.bf16 %v6305_v42  ;;  %v6726_v42 = vld [vmem:[#allocation17 + $0x100] ss:$16 sps:$4 sm:$0xff]  }
0x10e0   : > { %3816 = vmatprep.mubr.bf16.mxu0 %v3579_v21  ;;  %v6729_v21 = vld [vmem:[#allocation17 + $0x108] ss:$16 sps:$4 sm:$0xff]  }
0x10e1   : > { %v3575_v47 = vsel %vm3075_vm6, %v8149_v49, %v6307_v43  ;;  %v3574_v20 = vsel %vm3075_vm6, %v8147_v46, %v6306_v35 }
0x10e2   : > { %v3578_v23 = vpack.c.bf16 %v3575_v47, %v3574_v20 }
0x10e4   : > { %3817 = vmatmul.mubr.bf16.vlgmr.msra.gmra.mrb[24].mxu0 %v3578_v23 }
0x10e5   : > { %4348 = vmatpush1.bf16.msra.mxu0 %v6681_v1  ;;  %v6744_v1 = vld [vmem:[#allocation17 + $0x160] ss:$16 sps:$4 sm:$0xff]  }
0x10e6   : > { %4349 = vmatprep.subr.bf16.mxu0 %v6689_v62  ;;  %v6755_v62 = vld [vmem:[#allocation17 + $0x18c] ss:$16 sps:$4 sm:$0xff]  }
0x11b7   : > { %v3818_v50 = vpop.f32.mrb[24].mxu0 }
0x11b8   : > { %v3819_v6 = vadd.f32 %v3818_v50, %v3617_v10  ;;  %v3820_v51 = vpop.f32.mrb[25].mxu0 }
0x11b9   : > { %v3821_v53 = vadd.f32 %v3820_v51, %v3621_v4  ;;  %v3822_v55 = vpop.f32.mrb[26].mxu0 }
0x11ba   : > { %v8220_v56 = vadd.f32 %v3819_v6, %v2327_v0  ;;  %v3823_v49 = vadd.f32 %v3822_v55, %v3617_v10  ;;  %v3824_v57 = vpop.f32.mrb[27].mxu0 }
0x11bb   : > { %v8224_v46 = vadd.f32 %v3821_v53, %v2328_v36  ;;  %v3825_v58 = vadd.f32 %v3824_v57, %v3621_v4  ;;  %v6680_v36 = vld [vmem:[#allocation17 + $0x4] ss:$16 sps:$4 sm:$0xff]   ;;  %v6737_v57 = vld [vmem:[#allocation17 + $0x12c] ss:$16 sps:$4 sm:$0xff]  }
0x11bc   : > { %v8228_v60 = vadd.f32 %v3823_v49, %v2329_v38  ;;  %4304 = vmatprep.subr.bf16.mxu1 %v6680_v36  ;;  %v6687_v38 = vld [vmem:[#allocation17 + $0x28] ss:$16 sps:$4 sm:$0xff]   ;;  %v6734_v49 = vld [vmem:[#allocation17 + $0x124] ss:$16 sps:$4 sm:$0xff]   ;;  %v6749_v36 = vld [vmem:[#allocation17 + $0x16c] ss:$16 sps:$4 sm:$0xff]  }
0x11bd   : > { %v8232_v63 = vadd.f32 %v3825_v58, %v2330_v39  ;;  %v3833_v61 = vadd.f32 %v8224_v46, %v8220_v56  ;;  %4305 = vmatpush1.bf16.msra.mxu1 %v6678_v59  ;;  %v6692_v39 = vld [vmem:[#allocation17 + $0x44] ss:$16 sps:$4 sm:$0xff]   ;;  %4350 = vmatpush1.bf16.msra.mxu0 %v6687_v38  ;;  %v6735_v58 = vld [vmem:[#allocation17 + $0x128] ss:$16 sps:$4 sm:$0xff]  }
0x11be   : > { %4306 = vmatprep.subr.bf16.mxu1 %v6686_v52  ;;  %4351 = vmatprep.subr.bf16.mxu0 %v6695_v5  ;;  %v6746_v59 = vld [vmem:[#allocation17 + $0x164] ss:$16 sps:$4 sm:$0xff]   ;;  %v6753_v38 = vld [vmem:[#allocation17 + $0x188] ss:$16 sps:$4 sm:$0xff]   ;;  %v6761_v5 = vld [vmem:[#allocation17 + $0x1ac] ss:$16 sps:$4 sm:$0xff]  }
0x11bf   : > { %3834 = vadd.xlane.f32.xlu0 %v3833_v61  ;;  %v3836_v0 = vadd.f32 %v8232_v63, %v8228_v60  ;;  %v6738_v61 = vld [vmem:[#allocation17 + $0x140] ss:$16 sps:$4 sm:$0xff]   ;;  %v6752_v52 = vld [vmem:[#allocation17 + $0x184] ss:$16 sps:$4 sm:$0xff]  }
0x11c1   : > { %3837 = vadd.xlane.f32.xlu1 %v3836_v0  ;;  %4307 = vmatpush1.bf16.msra.mxu1 %v6684_v32  ;;  %v6741_v0 = vld [vmem:[#allocation17 + $0x148] ss:$16 sps:$4 sm:$0xff]   ;;  %v6750_v32 = vld [vmem:[#allocation17 + $0x180] ss:$16 sps:$4 sm:$0xff]  }
0x11c2   : > { %4308 = vmatprep.subr.bf16.mxu1 %v6692_v39  ;;  %4352 = vmatpush1.bf16.msra.mxu0 %v6693_v8  ;;  %v6758_v39 = vld [vmem:[#allocation17 + $0x1a4] ss:$16 sps:$4 sm:$0xff]   ;;  %v6759_v8 = vld [vmem:[#allocation17 + $0x1a8] ss:$16 sps:$4 sm:$0xff]  }
0x11c3   : > { %4353 = vmatprep.subr.bf16.mxu0 %v6701_v12  ;;  %v6767_v12 = vld [vmem:[#allocation17 + $0x1cc] ss:$16 sps:$4 sm:$0xff]  }
0x11c5   : > { %4309 = vmatpush1.bf16.msra.mxu1 %v6690_v7  ;;  %v6756_v7 = vld [vmem:[#allocation17 + $0x1a0] ss:$16 sps:$4 sm:$0xff]  }
0x11c6   : > { %4310 = vmatprep.subr.bf16.mxu1 %v6698_v11  ;;  %4354 = vmatpush1.bf16.msra.mxu0 %v6699_v14  ;;  %v6764_v11 = vld [vmem:[#allocation17 + $0x1c4] ss:$16 sps:$4 sm:$0xff]   ;;  %v6765_v14 = vld [vmem:[#allocation17 + $0x1c8] ss:$16 sps:$4 sm:$0xff]  }
0x11c7   : > { %4355 = vmatprep.subr.bf16.mxu0 %v6707_v16  ;;  %v6773_v16 = vld [vmem:[#allocation17 + $0x1ec] ss:$16 sps:$4 sm:$0xff]  }
0x11c9   : > { %4311 = vmatpush1.bf16.msra.mxu1 %v6696_v13  ;;  %v6762_v13 = vld [vmem:[#allocation17 + $0x1c0] ss:$16 sps:$4 sm:$0xff]  }
0x11ca   : > { %4312 = vmatprep.subr.bf16.mxu1 %v6704_v15  ;;  %4356 = vmatpush1.bf16.msra.mxu0 %v6705_v18  ;;  %v6770_v15 = vld [vmem:[#allocation17 + $0x1e4] ss:$16 sps:$4 sm:$0xff]   ;;  %v6771_v18 = vld [vmem:[#allocation17 + $0x1e8] ss:$16 sps:$4 sm:$0xff]  }
0x11cb   : > { %4357 = vmatprep.subr.bf16.mxu0 %v6713_v19 }
0x11cd   : > { %4313 = vmatpush1.bf16.msra.mxu1 %v6702_v17  ;;  %v6768_v17 = vld [vmem:[#allocation17 + $0x1e0] ss:$16 sps:$4 sm:$0xff]  }
0x11ce   : > { %4314 = vmatprep.subr.bf16.mxu1 %v6710_v33  ;;  %4358 = vmatpush1.bf16.msra.mxu0 %v6711_v22  ;;  %v6776_v33 = vld [vmem:[#allocation20 + $0x4] ss:$8 sps:$4 sm:$0xff]  }
0x11cf   : > { %4359 = vmatprep.subr.bf16.mxu0 %v6719_v26 }
0x11d1   : > { %4315 = vmatpush1.bf16.msra.mxu1 %v6708_v9 }
0x11d2   : > { %4316 = vmatprep.subr.bf16.mxu1 %v6716_v25  ;;  %4360 = vmatpush1.bf16.msra.mxu0 %v6717_v37  ;;  %v3831_v37 = vld [vmem:[#allocation14] sm:$0x3] }
0x11d3   : > { %4361 = vmatprep.subr.bf16.mxu0 %v6725_v29 }
0x11d5   : > { %4317 = vmatpush1.bf16.msra.mxu1 %v6714_v27 }
0x11d6   : > { %4318 = vmatprep.subr.bf16.mxu1 %v6722_v28  ;;  %4362 = vmatpush1.bf16.msra.mxu0 %v6723_v31 }
0x11d7   : > { %4363 = vmatprep.subr.bf16.mxu0 %v6731_v34  ;;  %v3874_v34 = vrot.slane %v3831_v37, %v8071_v54 }
0x11d9   : > { %4319 = vmatpush1.bf16.msra.mxu1 %v6720_v30  ;;  %v3832_v30 = vld [vmem:[#allocation16] sm:$0x3] }
0x11da   : > { %4320 = vmatprep.subr.bf16.mxu1 %v6728_v41  ;;  %4364 = vmatpush1.bf16.msra.mxu0 %v6729_v21  ;;  %v3870_v41 = vrot.slane %v3831_v37, %v8044_v48  ;;  %v3885_v21 = vrot.slane %v3832_v30, %v8044_v48 }
0x11db   : > { %4365 = vmatprep.subr.bf16.mxu0 %v6737_v57  ;;  %v6777_v57 = vld [vmem:[#allocation20 + $0x10] ss:$8 sps:$4 sm:$0xff]  }
0x11dd   : > { %4321 = vmatpush1.bf16.msra.mxu1 %v6726_v42 }
0x11de   : > { %4322 = vmatprep.subr.bf16.mxu1 %v6734_v49  ;;  %4366 = vmatpush1.bf16.msra.mxu0 %v6735_v58  ;;  %v6774_v49 = vld [vmem:[#allocation20] ss:$8 sps:$4 sm:$0xff]  }
0x11df   : > { %v6780_v58 = vld [vmem:[#allocation20 + $0x20] ss:$8 sps:$4 sm:$0xff]  }
0x124c   : > { %v3835_v43 = vpop.xlane.xlu0 %3834 }
0x124d   : > { %v3840_v35 = vmul.f32 0.00390625, %v3835_v43  ;;  %v3889_v43 = vrot.slane %v3832_v30, %v8071_v54 }
0x124e   : > { %v3838_v47 = vpop.xlane.xlu1 %3837 }
0x124f   : > { %v8239_v20 = vsub.f32 %v8220_v56, %v3840_v35  ;;  %v8242_v23 = vsub.f32 %v8224_v46, %v3840_v35  ;;  %v3841_v24 = vmul.f32 0.00390625, %v3838_v47  ;;  %v6732_v46 = vld [vmem:[#allocation17 + $0x120] ss:$16 sps:$4 sm:$0xff]  }
0x1250   : > { %4323 = vmatpush1.bf16.msra.mxu1 %v6732_v46  ;;  %v6782_v46 = vld [vmem:[#allocation20 + $0x24] ss:$8 sps:$4 sm:$0xff]  }
0x1251   : > { %v8245_v10 = vsub.f32 %v8228_v60, %v3841_v24  ;;  %v8248_v4 = vsub.f32 %v8232_v63, %v3841_v24  ;;  %v3846_v50 = vmul.f32 %v8239_v20, %v8239_v20  ;;  %v3847_v6 = vmul.f32 %v8242_v23, %v8242_v23  ;;  %v6740_v60 = vld [vmem:[#allocation17 + $0x144] ss:$16 sps:$4 sm:$0xff]   ;;  %v6743_v63 = vld [vmem:[#allocation17 + $0x14c] ss:$16 sps:$4 sm:$0xff]  }
0x1252   : > { %4324 = vmatprep.subr.bf16.mxu1 %v6740_v60  ;;  %4367 = vmatprep.subr.bf16.mxu0 %v6743_v63  ;;  %v6785_v60 = vld [vmem:[#allocation20 + $0x34] ss:$8 sps:$4 sm:$0xff]   ;;  %v6783_v63 = vld [vmem:[#allocation20 + $0x30] ss:$8 sps:$4 sm:$0xff]  }
0x1253   : > { %v3850_v51 = vadd.f32 %v3847_v6, %v3846_v50  ;;  %v3848_v53 = vmul.f32 %v8245_v10, %v8245_v10  ;;  %v3849_v55 = vmul.f32 %v8248_v4, %v8248_v4  ;;  %4368 = vmatpush1.bf16.msra.mxu0 %v6741_v0  ;;  %v6786_v0 = vld [vmem:[#allocation20 + $0x40] ss:$8 sps:$4 sm:$0xff]  }
0x1254   : > { %4325 = vmatpush1.bf16.msra.mxu1 %v6738_v61  ;;  %4369 = vmatprep.subr.bf16.mxu0 %v6749_v36  ;;  %v6788_v61 = vld [vmem:[#allocation20 + $0x44] ss:$8 sps:$4 sm:$0xff]   ;;  %v6789_v36 = vld [vmem:[#allocation20 + $0x50] ss:$8 sps:$4 sm:$0xff]  }
0x1255   : > { %3851 = vadd.xlane.f32.xlu0 %v3850_v51  ;;  %v3853_v56 = vadd.f32 %v3849_v55, %v3848_v53  ;;  %4326 = vmatprep.subr.bf16.mxu1 %v6746_v59  ;;  %v6791_v59 = vld [vmem:[#allocation20 + $0x54] ss:$8 sps:$4 sm:$0xff]  }
0x1257   : > { %4370 = vmatpush1.bf16.msra.mxu0 %v6747_v2  ;;  %v6792_v2 = vld [vmem:[#allocation20 + $0x60] ss:$8 sps:$4 sm:$0xff]  }
0x1258   : > { %4327 = vmatpush1.bf16.msra.mxu1 %v6744_v1  ;;  %4371 = vmatprep.subr.bf16.mxu0 %v6755_v62  ;;  %v6794_v1 = vld [vmem:[#allocation20 + $0x64] ss:$8 sps:$4 sm:$0xff]   ;;  %v6795_v62 = vld [vmem:[#allocation20 + $0x70] ss:$8 sps:$4 sm:$0xff]  }
0x1259   : > { %3854 = vadd.xlane.f32.xlu0 %v3853_v56  ;;  %4328 = vmatprep.subr.bf16.mxu1 %v6752_v52  ;;  %v6797_v52 = vld [vmem:[#allocation20 + $0x74] ss:$8 sps:$4 sm:$0xff]  }
0x125b   : > { %4372 = vmatpush1.bf16.msra.mxu0 %v6753_v38  ;;  %v6798_v38 = vld [vmem:[#allocation20 + $0x80] ss:$8 sps:$4 sm:$0xff]  }
0x125c   : > { %4329 = vmatpush1.bf16.msra.mxu1 %v6750_v32  ;;  %4373 = vmatprep.subr.bf16.mxu0 %v6761_v5  ;;  %v6800_v32 = vld [vmem:[#allocation20 + $0x84] ss:$8 sps:$4 sm:$0xff]   ;;  %v6801_v5 = vld [vmem:[#allocation20 + $0x90] ss:$8 sps:$4 sm:$0xff]  }
0x125d   : > { %4330 = vmatprep.subr.bf16.mxu1 %v6758_v39  ;;  %v6803_v39 = vld [vmem:[#allocation20 + $0x94] ss:$8 sps:$4 sm:$0xff]  }
0x125f   : > { %4374 = vmatpush1.bf16.msra.mxu0 %v6759_v8  ;;  %v6804_v8 = vld [vmem:[#allocation20 + $0xa0] ss:$8 sps:$4 sm:$0xff]  }
0x1260   : > { %4331 = vmatpush1.bf16.msra.mxu1 %v6756_v7  ;;  %4375 = vmatprep.subr.bf16.mxu0 %v6767_v12  ;;  %v6806_v7 = vld [vmem:[#allocation20 + $0xa4] ss:$8 sps:$4 sm:$0xff]   ;;  %v6807_v12 = vld [vmem:[#allocation20 + $0xb0] ss:$8 sps:$4 sm:$0xff]  }
0x1261   : > { %4332 = vmatprep.subr.bf16.mxu1 %v6764_v11  ;;  %v6809_v11 = vld [vmem:[#allocation20 + $0xb4] ss:$8 sps:$4 sm:$0xff]  }
0x1263   : > { %4376 = vmatpush1.bf16.msra.mxu0 %v6765_v14  ;;  %v6810_v14 = vld [vmem:[#allocation20 + $0xc0] ss:$8 sps:$4 sm:$0xff]  }
0x1264   : > { %4333 = vmatpush1.bf16.msra.mxu1 %v6762_v13  ;;  %4377 = vmatprep.subr.bf16.mxu0 %v6773_v16  ;;  %v6812_v13 = vld [vmem:[#allocation20 + $0xc4] ss:$8 sps:$4 sm:$0xff]   ;;  %v6813_v16 = vld [vmem:[#allocation20 + $0xd0] ss:$8 sps:$4 sm:$0xff]  }
0x1265   : > { %4334 = vmatprep.subr.bf16.mxu1 %v6770_v15  ;;  %v6815_v15 = vld [vmem:[#allocation20 + $0xd4] ss:$8 sps:$4 sm:$0xff]  }
0x1267   : > { %4378 = vmatpush1.bf16.msra.mxu0 %v6771_v18  ;;  %v6816_v18 = vld [vmem:[#allocation20 + $0xe0] ss:$8 sps:$4 sm:$0xff]  }
0x1268   : > { %4335 = vmatpush1.bf16.msra.mxu1 %v6768_v17  ;;  %v6818_v17 = vld [vmem:[#allocation20 + $0xe4] ss:$8 sps:$4 sm:$0xff]  }
0x1269   : > { %4798 = vmatprep.subr.bf16.mxu1 %v6776_v33  ;;  %v6819_v33 = vld [vmem:[#allocation20 + $0xf0] ss:$8 sps:$4 sm:$0xff]  }
0x12e2   : > { %v3852_v19 = vpop.xlane.xlu0 %3851 }
0x12e3   : > { %v3856_v9 = vmul.f32 0.00390625, %v3852_v19  ;;  %v6821_v19 = vld [vmem:[#allocation20 + $0xf4] ss:$8 sps:$4 sm:$0xff]  }
0x12e5   : > { %v3858_v22 = vadd.f32 1e-05, %v3856_v9  ;;  %v6824_v9 = vld [vmem:[#allocation20 + $0x104] ss:$8 sps:$4 sm:$0xff]  }
0x12e6   : > { %v3855_v25 = vpop.xlane.xlu0 %3854 }
0x12e7   : > { %6954 = vrsqrt.f32 %v3858_v22  ;;  %v3857_v26 = vmul.f32 0.00390625, %v3855_v25  ;;  %v3962_v22 = vld [vmem:[#allocation19] sm:$0xf] }
0x12e8   : > { %v3967_v25 = vrot.slane %v3962_v22, %v8044_v48  ;;  %v3979_v37 = vrot.slane %v3962_v22, %v2445_v40 }
0x12e9   : > { %v3859_v27 = vadd.f32 1e-05, %v3857_v26  ;;  %v3975_v26 = vrot.slane %v3962_v22, %v2441_v3 }
0x12eb   : > { %6956 = vrsqrt.f32 %v3859_v27  ;;  %v3971_v27 = vrot.slane %v3962_v22, %v8071_v54  ;;  %v6860_v22 = vld [vmem:[#allocation20 + $0x1c4] ss:$8 sps:$4 sm:$0xff]  }
0x12f1   : > { %v6955_v28 = vpop.eup %6954 }
0x12f2   : > { %v3862_v29 = vmul.f32 %v6955_v28, %v8239_v20  ;;  %v3863_v31 = vmul.f32 %v6955_v28, %v8242_v23 }
0x12f4   : > { %v3878_v24 = vmul.f32 %v3874_v34, %v3863_v31  ;;  %v3877_v50 = vmul.f32 %v3870_v41, %v3862_v29 }
0x12f5   : > { %v6957_v42 = vpop.eup %6956 }
0x12f6   : > { %v3864_v35 = vmul.f32 %v6957_v42, %v8245_v10  ;;  %v3865_v47 = vmul.f32 %v6957_v42, %v8248_v4  ;;  %v8266_v51 = vadd.f32 %v3889_v43, %v3878_v24  ;;  %v8270_v53 = vadd.f32 %v3885_v21, %v3877_v50  ;;  %v6779_v4 = vld [vmem:[#allocation20 + $0x14] ss:$8 sps:$4 sm:$0xff]  }
0x12f8   : > { %v3880_v6 = vmul.f32 %v3874_v34, %v3865_v47  ;;  %v3879_v20 = vmul.f32 %v3870_v41, %v3864_v35 }
0x12fa   : > { %v8268_v23 = vadd.f32 %v3889_v43, %v3880_v6  ;;  %v8272_v55 = vadd.f32 %v3885_v21, %v3879_v20 }
0x12fc   : > { %v3897_v56 = vpack.c.bf16 %v8268_v23, %v8266_v51  ;;  %v3896_v10 = vpack.c.bf16 %v8272_v55, %v8270_v53 }
0x12fe   : > { %4336 = vmatprep.mubr.bf16.mxu1 %v3897_v56  ;;  %4379 = vmatprep.mubr.bf16.mxu0 %v3897_v56 }
0x12ff   : > { %4337 = vmatmul.mubr.bf16.vlgmr.msra.gmra.mrb[44].mxu1 %v3896_v10  ;;  %4380 = vmatmul.mubr.bf16.vlgmr.msra.gmra.mrb[28].mxu0 %v3896_v10 }
0x1300   : > { %4799 = vmatpush1.bf16.msra.mxu1 %v6774_v49 }
0x1301   : > { %4800 = vmatprep.subr.bf16.mxu1 %v6779_v4 }
0x1304   : > { %4801 = vmatpush1.bf16.msra.mxu1 %v6777_v57 }
0x1305   : > { %4802 = vmatprep.subr.bf16.mxu1 %v6782_v46 }
0x1308   : > { %4803 = vmatpush1.bf16.msra.mxu1 %v6780_v58 }
0x1309   : > { %4804 = vmatprep.subr.bf16.mxu1 %v6785_v60 }
0x130c   : > { %4805 = vmatpush1.bf16.msra.mxu1 %v6783_v63 }
0x130d   : > { %4806 = vmatprep.subr.bf16.mxu1 %v6788_v61 }
0x1310   : > { %4807 = vmatpush1.bf16.msra.mxu1 %v6786_v0 }
0x1311   : > { %4808 = vmatprep.subr.bf16.mxu1 %v6791_v59  ;;  %v6822_v59 = vld [vmem:[#allocation20 + $0x100] ss:$8 sps:$4 sm:$0xff]  }
0x1314   : > { %4809 = vmatpush1.bf16.msra.mxu1 %v6789_v36  ;;  %v6827_v36 = vld [vmem:[#allocation20 + $0x114] ss:$8 sps:$4 sm:$0xff]  }
0x1315   : > { %4810 = vmatprep.subr.bf16.mxu1 %v6794_v1  ;;  %v6825_v1 = vld [vmem:[#allocation20 + $0x110] ss:$8 sps:$4 sm:$0xff]  }
0x1318   : > { %4811 = vmatpush1.bf16.msra.mxu1 %v6792_v2  ;;  %v6830_v2 = vld [vmem:[#allocation20 + $0x124] ss:$8 sps:$4 sm:$0xff]  }
0x1319   : > { %4812 = vmatprep.subr.bf16.mxu1 %v6797_v52  ;;  %v6828_v52 = vld [vmem:[#allocation20 + $0x120] ss:$8 sps:$4 sm:$0xff]  }
0x131c   : > { %4813 = vmatpush1.bf16.msra.mxu1 %v6795_v62  ;;  %v6833_v62 = vld [vmem:[#allocation20 + $0x134] ss:$8 sps:$4 sm:$0xff]  }
0x131d   : > { %4814 = vmatprep.subr.bf16.mxu1 %v6800_v32  ;;  %v6831_v32 = vld [vmem:[#allocation20 + $0x130] ss:$8 sps:$4 sm:$0xff]  }
0x1320   : > { %4815 = vmatpush1.bf16.msra.mxu1 %v6798_v38  ;;  %v6836_v38 = vld [vmem:[#allocation20 + $0x144] ss:$8 sps:$4 sm:$0xff]  }
0x1321   : > { %4816 = vmatprep.subr.bf16.mxu1 %v6803_v39  ;;  %v6834_v39 = vld [vmem:[#allocation20 + $0x140] ss:$8 sps:$4 sm:$0xff]  }
0x1324   : > { %4817 = vmatpush1.bf16.msra.mxu1 %v6801_v5  ;;  %v6839_v5 = vld [vmem:[#allocation20 + $0x154] ss:$8 sps:$4 sm:$0xff]  }
0x1325   : > { %4818 = vmatprep.subr.bf16.mxu1 %v6806_v7  ;;  %v6837_v7 = vld [vmem:[#allocation20 + $0x150] ss:$8 sps:$4 sm:$0xff]  }
0x1328   : > { %4819 = vmatpush1.bf16.msra.mxu1 %v6804_v8  ;;  %v6842_v8 = vld [vmem:[#allocation20 + $0x164] ss:$8 sps:$4 sm:$0xff]  }
0x1329   : > { %4820 = vmatprep.subr.bf16.mxu1 %v6809_v11  ;;  %v6840_v11 = vld [vmem:[#allocation20 + $0x160] ss:$8 sps:$4 sm:$0xff]  }
0x132c   : > { %4821 = vmatpush1.bf16.msra.mxu1 %v6807_v12  ;;  %v6845_v12 = vld [vmem:[#allocation20 + $0x174] ss:$8 sps:$4 sm:$0xff]  }
0x132d   : > { %4822 = vmatprep.subr.bf16.mxu1 %v6812_v13  ;;  %v6843_v13 = vld [vmem:[#allocation20 + $0x170] ss:$8 sps:$4 sm:$0xff]  }
0x1330   : > { %4823 = vmatpush1.bf16.msra.mxu1 %v6810_v14  ;;  %v6848_v14 = vld [vmem:[#allocation20 + $0x184] ss:$8 sps:$4 sm:$0xff]  }
0x1331   : > { %4824 = vmatprep.subr.bf16.mxu1 %v6815_v15  ;;  %v6846_v15 = vld [vmem:[#allocation20 + $0x180] ss:$8 sps:$4 sm:$0xff]  }
0x1334   : > { %4825 = vmatpush1.bf16.msra.mxu1 %v6813_v16  ;;  %v6851_v16 = vld [vmem:[#allocation20 + $0x194] ss:$8 sps:$4 sm:$0xff]  }
0x1335   : > { %4826 = vmatprep.subr.bf16.mxu1 %v6818_v17  ;;  %v6849_v17 = vld [vmem:[#allocation20 + $0x190] ss:$8 sps:$4 sm:$0xff]  }
0x1338   : > { %4827 = vmatpush1.bf16.msra.mxu1 %v6816_v18  ;;  %v6854_v18 = vld [vmem:[#allocation20 + $0x1a4] ss:$8 sps:$4 sm:$0xff]  }
0x1339   : > { %4828 = vmatprep.subr.bf16.mxu1 %v6821_v19  ;;  %v6857_v19 = vld [vmem:[#allocation20 + $0x1b4] ss:$8 sps:$4 sm:$0xff]  }
0x133c   : > { %4829 = vmatpush1.bf16.msra.mxu1 %v6819_v33  ;;  %v6852_v33 = vld [vmem:[#allocation20 + $0x1a0] ss:$8 sps:$4 sm:$0xff]  }
0x133d   : > { %4841 = vmatprep.subr.bf16.mxu1 %v6824_v9  ;;  %v6855_v9 = vld [vmem:[#allocation20 + $0x1b0] ss:$8 sps:$4 sm:$0xff]  }
0x13d2   : > { %v4338_v28 = vpop.f32.mrb[44].mxu1  ;;  %v4381_v29 = vpop.f32.mrb[28].mxu0 }
0x13d3   : > { %v4339_v30 = vadd.f32 %v4338_v28, %v3967_v25  ;;  %v4382_v31 = vadd.f32 %v4381_v29, %v3975_v26  ;;  %v4340_v41 = vpop.f32.mrb[45].mxu1  ;;  %v4383_v34 = vpop.f32.mrb[29].mxu0  ;;  %v6864_v28 = vld [vmem:[#allocation20 + $0x1e0] ss:$8 sps:$4 sm:$0xff]   ;;  %v6869_v29 = vld [vmem:[#allocation20 + $0x1f4] ss:$8 sps:$4 sm:$0xff]  }
0x13d4   : > { %v4341_v42 = vadd.f32 %v4340_v41, %v3971_v27  ;;  %v4384_v21 = vadd.f32 %v4383_v34, %v3979_v37  ;;  %v4342_v43 = vpop.f32.mrb[46].mxu1  ;;  %v4385_v35 = vpop.f32.mrb[30].mxu0 }
0x13d5   : > { %v4343_v47 = vadd.f32 %v4342_v43, %v3967_v25  ;;  %v4386_v24 = vadd.f32 %v4385_v35, %v3975_v26  ;;  %v4344_v50 = vpop.f32.mrb[47].mxu1  ;;  %v4387_v6 = vpop.f32.mrb[31].mxu0  ;;  %v4390_v56 = vmax.f32 %v4339_v30, 0.0  ;;  %v4392_v10 = vmax.f32 %v4382_v31, 0.0  ;;  %v6858_v25 = vld [vmem:[#allocation20 + $0x1c0] ss:$8 sps:$4 sm:$0xff]  }
0x13d6   : > { %v4345_v3 = vadd.f32 %v4344_v50, %v3971_v27  ;;  %v4388_v20 = vadd.f32 %v4387_v6, %v3979_v37  ;;  %v4391_v4 = vmax.f32 %v4341_v42, 0.0  ;;  %v4393_v57 = vmax.f32 %v4384_v21, 0.0  ;;  %v6863_v26 = vld [vmem:[#allocation20 + $0x1d4] ss:$8 sps:$4 sm:$0xff]   ;;  %v6861_v27 = vld [vmem:[#allocation20 + $0x1d0] ss:$8 sps:$4 sm:$0xff]  }
0x13d7   : > { %v4394_v49 = vmax.f32 %v4343_v47, 0.0  ;;  %v4396_v40 = vmax.f32 %v4386_v24, 0.0  ;;  %v6866_v37 = vld [vmem:[#allocation20 + $0x1e4] ss:$8 sps:$4 sm:$0xff]   ;;  %v6867_v30 = vld [vmem:[#allocation20 + $0x1f0] ss:$8 sps:$4 sm:$0xff]  }
0x13d8   : > { %v4395_v46 = vmax.f32 %v4345_v3, 0.0  ;;  %v4397_v58 = vmax.f32 %v4388_v20, 0.0  ;;  %v4466_v31 = vld [vmem:[#allocation22] sm:$0x3] }
0x13d9   : > { %v4398_v60 = vpack.c.bf16 %v4394_v49, %v4390_v56  ;;  %v8284_v63 = vpack.c.bf16 %v4396_v40, %v4392_v10  ;;  %v4471_v41 = vrot.slane %v4466_v31, %v8044_v48  ;;  %v4475_v34 = vrot.slane %v4466_v31, %v8071_v54  ;;  %v6912_v31 = vld [vmem:[#allocation23 + $0xe0] ss:$8 sps:$4 sm:$0xff]  }
0x13da   : > { %v4399_v61 = vpack.c.bf16 %v4395_v46, %v4391_v4  ;;  %v4401_v0 = vpack.c.bf16 %v4397_v58, %v4393_v57  ;;  %v6870_v4 = vld [vmem:[#allocation23] ss:$8 sps:$4 sm:$0xff]   ;;  %v6872_v57 = vld [vmem:[#allocation23 + $0x4] ss:$8 sps:$4 sm:$0xff]   ;;  %v6875_v46 = vld [vmem:[#allocation23 + $0x14] ss:$8 sps:$4 sm:$0xff]  }
0x13db   : > { %5174 = vmatprep.subr.bf16.mxu0 %v6872_v57  ;;  %v6873_v58 = vld [vmem:[#allocation23 + $0x10] ss:$8 sps:$4 sm:$0xff]  }
0x13dc   : > { %4830 = vmatprep.mubr.bf16.mxu1 %v4399_v61  ;;  %5175 = vmatpush1.bf16.msra.mxu0 %v6870_v4  ;;  %v6887_v61 = vld [vmem:[#allocation23 + $0x54] ss:$8 sps:$4 sm:$0xff]  }
0x13dd   : > { %4831 = vmatmul.mubr.bf16.vlgmr.msra.gmra.mrb[48].mxu1 %v4398_v60  ;;  %5176 = vmatprep.subr.bf16.mxu0 %v6875_v46  ;;  %v6876_v60 = vld [vmem:[#allocation23 + $0x20] ss:$8 sps:$4 sm:$0xff]  }
0x13de   : > { %4842 = vmatpush1.bf16.msra.mxu1 %v6822_v59  ;;  %4873 = vmatprep.mubr.bf16.mxu1 %v4401_v0  ;;  %v6885_v0 = vld [vmem:[#allocation23 + $0x50] ss:$8 sps:$4 sm:$0xff]  }
0x13df   : > { %4843 = vmatprep.subr.bf16.mxu1 %v6827_v36 }
0x13e0   : > { %5177 = vmatpush1.bf16.msra.mxu0 %v6873_v58 }
0x13e2   : > { %4844 = vmatpush1.bf16.msra.mxu1 %v6825_v1 }
0x13e3   : > { %4845 = vmatprep.subr.bf16.mxu1 %v6830_v2 }
0x13e6   : > { %4846 = vmatpush1.bf16.msra.mxu1 %v6828_v52 }
0x13e7   : > { %4847 = vmatprep.subr.bf16.mxu1 %v6833_v62 }
0x13ea   : > { %4848 = vmatpush1.bf16.msra.mxu1 %v6831_v32 }
0x13eb   : > { %4849 = vmatprep.subr.bf16.mxu1 %v6836_v38 }
0x13ee   : > { %4850 = vmatpush1.bf16.msra.mxu1 %v6834_v39 }
0x13ef   : > { %4851 = vmatprep.subr.bf16.mxu1 %v6839_v5 }
0x13f2   : > { %4852 = vmatpush1.bf16.msra.mxu1 %v6837_v7 }
0x13f3   : > { %4853 = vmatprep.subr.bf16.mxu1 %v6842_v8 }
0x13f6   : > { %4854 = vmatpush1.bf16.msra.mxu1 %v6840_v11 }
0x13f7   : > { %4855 = vmatprep.subr.bf16.mxu1 %v6845_v12 }
0x13fa   : > { %4856 = vmatpush1.bf16.msra.mxu1 %v6843_v13  ;;  %v6890_v13 = vld [vmem:[#allocation23 + $0x64] ss:$8 sps:$4 sm:$0xff]  }
0x13fb   : > { %4857 = vmatprep.subr.bf16.mxu1 %v6848_v14  ;;  %v6888_v14 = vld [vmem:[#allocation23 + $0x60] ss:$8 sps:$4 sm:$0xff]  }
0x13fe   : > { %4858 = vmatpush1.bf16.msra.mxu1 %v6846_v15  ;;  %v6893_v15 = vld [vmem:[#allocation23 + $0x74] ss:$8 sps:$4 sm:$0xff]  }
0x13ff   : > { %4859 = vmatprep.subr.bf16.mxu1 %v6851_v16  ;;  %v6891_v16 = vld [vmem:[#allocation23 + $0x70] ss:$8 sps:$4 sm:$0xff]  }
0x1402   : > { %4860 = vmatpush1.bf16.msra.mxu1 %v6849_v17  ;;  %v6896_v17 = vld [vmem:[#allocation23 + $0x84] ss:$8 sps:$4 sm:$0xff]  }
0x1403   : > { %4861 = vmatprep.subr.bf16.mxu1 %v6854_v18  ;;  %v6894_v18 = vld [vmem:[#allocation23 + $0x80] ss:$8 sps:$4 sm:$0xff]  }
0x1406   : > { %4862 = vmatpush1.bf16.msra.mxu1 %v6852_v33  ;;  %v6899_v33 = vld [vmem:[#allocation23 + $0x94] ss:$8 sps:$4 sm:$0xff]  }
0x1407   : > { %4863 = vmatprep.subr.bf16.mxu1 %v6857_v19  ;;  %v6897_v19 = vld [vmem:[#allocation23 + $0x90] ss:$8 sps:$4 sm:$0xff]  }
0x140a   : > { %4864 = vmatpush1.bf16.msra.mxu1 %v6855_v9  ;;  %v6902_v9 = vld [vmem:[#allocation23 + $0xa4] ss:$8 sps:$4 sm:$0xff]  }
0x140b   : > { %4865 = vmatprep.subr.bf16.mxu1 %v6860_v22  ;;  %v6900_v22 = vld [vmem:[#allocation23 + $0xa0] ss:$8 sps:$4 sm:$0xff]  }
0x140e   : > { %4866 = vmatpush1.bf16.msra.mxu1 %v6858_v25  ;;  %v6905_v25 = vld [vmem:[#allocation23 + $0xb4] ss:$8 sps:$4 sm:$0xff]  }
0x140f   : > { %4867 = vmatprep.subr.bf16.mxu1 %v6863_v26  ;;  %v6903_v26 = vld [vmem:[#allocation23 + $0xb0] ss:$8 sps:$4 sm:$0xff]  }
0x1412   : > { %4868 = vmatpush1.bf16.msra.mxu1 %v6861_v27  ;;  %v6908_v27 = vld [vmem:[#allocation23 + $0xc4] ss:$8 sps:$4 sm:$0xff]  }
0x1413   : > { %4869 = vmatprep.subr.bf16.mxu1 %v6866_v37  ;;  %v6906_v37 = vld [vmem:[#allocation23 + $0xc0] ss:$8 sps:$4 sm:$0xff]  }
0x1416   : > { %4870 = vmatpush1.bf16.msra.mxu1 %v6864_v28  ;;  %v6911_v28 = vld [vmem:[#allocation23 + $0xd4] ss:$8 sps:$4 sm:$0xff]  }
0x1417   : > { %4871 = vmatprep.subr.bf16.mxu1 %v6869_v29  ;;  %v6909_v29 = vld [vmem:[#allocation23 + $0xd0] ss:$8 sps:$4 sm:$0xff]  }
0x141a   : > { %4872 = vmatpush1.bf16.msra.mxu1 %v6867_v30  ;;  %v6914_v30 = vld [vmem:[#allocation23 + $0xe4] ss:$8 sps:$4 sm:$0xff]  }
0x141d   : > { %4874 = vmatmul.mubr.bf16.vlgmr.msra.gmra.mrb[48].mxu1 %v8284_v63  ;;  %v6882_v63 = vld [vmem:[#allocation23 + $0x40] ss:$8 sps:$4 sm:$0xff]  }
0x14f0   : > { %v4875_v42 = vpop.f32.mrb[48].mxu1 }
0x14f1   : > { %v6109_v21 = vadd.f32 %v4875_v42, %v4471_v41  ;;  %v4877_v43 = vpop.f32.mrb[49].mxu1 }
0x14f2   : > { %v6110_v35 = vadd.f32 %v4877_v43, %v4475_v34  ;;  %v4879_v47 = vpop.f32.mrb[50].mxu1 }
0x14f3   : > { %v4884_v24 = vadd.f32 %v6109_v21, %v8270_v53  ;;  %v6111_v50 = vadd.f32 %v4879_v47, %v4471_v41  ;;  %v4881_v6 = vpop.f32.mrb[51].mxu1  ;;  %v6878_v53 = vld [vmem:[#allocation23 + $0x24] ss:$8 sps:$4 sm:$0xff]   ;;  %v6917_v41 = vld [vmem:[#allocation23 + $0xf4] ss:$8 sps:$4 sm:$0xff]  }
0x14f4   : > { %v4885_v3 = vadd.f32 %v6110_v35, %v8266_v51  ;;  %v6112_v20 = vadd.f32 %v4881_v6, %v4475_v34  ;;  %5178 = vmatprep.subr.bf16.mxu0 %v6878_v53  ;;  %v6881_v51 = vld [vmem:[#allocation23 + $0x34] ss:$8 sps:$4 sm:$0xff]   ;;  %v6915_v34 = vld [vmem:[#allocation23 + $0xf0] ss:$8 sps:$4 sm:$0xff]  }
0x14f5   : > { %v4886_v56 = vadd.f32 %v6111_v50, %v8272_v55  ;;  %5179 = vmatpush1.bf16.msra.mxu0 %v6876_v60  ;;  %v6879_v55 = vld [vmem:[#allocation23 + $0x30] ss:$8 sps:$4 sm:$0xff]   ;;  %v4888_v50 = vld [vmem:[%s8425_s7] sm:$0x3] }
0x14f6   : > { %v4887_v10 = vadd.f32 %v6112_v20, %v8268_v23  ;;  %v4890_v49 = vadd.f32 %v4885_v3, %v4884_v24  ;;  %5180 = vmatprep.subr.bf16.mxu0 %v6881_v51  ;;  %v6884_v23 = vld [vmem:[#allocation23 + $0x44] ss:$8 sps:$4 sm:$0xff]   ;;  %v4889_v6 = vld [vmem:[%s8426_s4] sm:$0x3]  ;;  %v4930_v20 = vrot.slane %v4888_v50, %v8071_v54 }
0x14f7   : > { %v4941_v4 = vrot.slane %v4889_v6, %v8044_v48  ;;  %v4945_v57 = vrot.slane %v4889_v6, %v8071_v54 }
0x14f8   : > { %4891 = vadd.xlane.f32.xlu0 %v4890_v49  ;;  %v4893_v40 = vadd.f32 %v4887_v10, %v4886_v56 }
0x14f9   : > { %5181 = vmatpush1.bf16.msra.mxu0 %v6879_v55 }
0x14fa   : > { %4894 = vadd.xlane.f32.xlu1 %v4893_v40  ;;  %5182 = vmatprep.subr.bf16.mxu0 %v6884_v23 }
0x14fd   : > { %5183 = vmatpush1.bf16.msra.mxu0 %v6882_v63 }
0x14fe   : > { %5184 = vmatprep.subr.bf16.mxu0 %v6887_v61 }
0x1501   : > { %5185 = vmatpush1.bf16.msra.mxu0 %v6885_v0 }
0x1502   : > { %5186 = vmatprep.subr.bf16.mxu0 %v6890_v13 }
0x1505   : > { %5187 = vmatpush1.bf16.msra.mxu0 %v6888_v14 }
0x1506   : > { %5188 = vmatprep.subr.bf16.mxu0 %v6893_v15 }
0x1509   : > { %5189 = vmatpush1.bf16.msra.mxu0 %v6891_v16 }
0x150a   : > { %5190 = vmatprep.subr.bf16.mxu0 %v6896_v17  ;;  %v5002_v17 = vld [vmem:[#allocation25] sm:$0x3] }
0x150d   : > { %5191 = vmatpush1.bf16.msra.mxu0 %v6894_v18  ;;  %v7449_v18 = vmov 1966171168  }
0x150e   : > { %5192 = vmatprep.subr.bf16.mxu0 %v6899_v33  ;;  %v5219_v33 = vunpack.c.l.s4 %v7449_v18 }
0x1511   : > { %5193 = vmatpush1.bf16.msra.mxu0 %v6897_v19  ;;  %v5167_v19 = vrot.slane %v5002_v17, %v8044_v48 }
0x1512   : > { %5194 = vmatprep.subr.bf16.mxu0 %v6902_v9  ;;  %v5171_v9 = vrot.slane %v5002_v17, %v8071_v54 }
0x1515   : > { %5195 = vmatpush1.bf16.msra.mxu0 %v6900_v22  ;;  %v5220_v22 = vunpack.c.0.s8 %v5219_v33 }
0x1516   : > { %5196 = vmatprep.subr.bf16.mxu0 %v6905_v25 }
0x1519   : > { %5197 = vmatpush1.bf16.msra.mxu0 %v6903_v26 }
0x151a   : > { %5198 = vmatprep.subr.bf16.mxu0 %v6908_v27 }
0x151d   : > { %5199 = vmatpush1.bf16.msra.mxu0 %v6906_v37 }
0x151e   : > { %5200 = vmatprep.subr.bf16.mxu0 %v6911_v28  ;;  %v5223_v28 = vsub.s32 %v5220_v22, %v8041_v45 }
0x1521   : > { %5201 = vmatpush1.bf16.msra.mxu0 %v6909_v29 }
0x1522   : > { %5202 = vmatprep.subr.bf16.mxu0 %v6914_v30 }
0x1525   : > { %5203 = vmatpush1.bf16.msra.mxu0 %v6912_v31 }
0x1526   : > { %5204 = vmatprep.subr.bf16.mxu0 %v6917_v41 }
0x1529   : > { %5205 = vmatpush1.bf16.msra.mxu0 %v6915_v34 }
0x1585   : > { %v4892_v59 = vpop.xlane.xlu0 %4891 }
0x1586   : > { %v4896_v36 = vmul.f32 0.00390625, %v4892_v59 }
0x1587   : > { %v4895_v1 = vpop.xlane.xlu1 %4894 }
0x1588   : > { %v8293_v2 = vsub.f32 %v4884_v24, %v4896_v36  ;;  %v8295_v52 = vsub.f32 %v4885_v3, %v4896_v36  ;;  %v4897_v62 = vmul.f32 0.00390625, %v4895_v1  ;;  %v4926_v3 = vrot.slane %v4888_v50, %v8044_v48 }
0x158a   : > { %v8297_v32 = vsub.f32 %v4886_v56, %v4897_v62  ;;  %v8299_v38 = vsub.f32 %v4887_v10, %v4897_v62  ;;  %v4902_v39 = vmul.f32 %v8293_v2, %v8293_v2  ;;  %v4903_v5 = vmul.f32 %v8295_v52, %v8295_v52 }
0x158c   : > { %v4906_v7 = vadd.f32 %v4903_v5, %v4902_v39  ;;  %v4904_v8 = vmul.f32 %v8297_v32, %v8297_v32  ;;  %v4905_v11 = vmul.f32 %v8299_v38, %v8299_v38 }
0x158e   : > { %4907 = vadd.xlane.f32.xlu0 %v4906_v7  ;;  %v4909_v12 = vadd.f32 %v4905_v11, %v4904_v8 }
0x1590   : > { %4910 = vadd.xlane.f32.xlu1 %v4909_v12 }
0x161b   : > { %v4908_v42 = vpop.xlane.xlu0 %4907 }
0x161c   : > { %v4912_v21 = vmul.f32 0.00390625, %v4908_v42 }
0x161d   : > { %v4911_v43 = vpop.xlane.xlu1 %4910 }
0x161e   : > { %v4914_v35 = vadd.f32 1e-05, %v4912_v21  ;;  %v4913_v47 = vmul.f32 0.00390625, %v4911_v43 }
0x1620   : > { %6958 = vrsqrt.f32 %v4914_v35  ;;  %v4915_v24 = vadd.f32 1e-05, %v4913_v47 }
0x1622   : > { %6960 = vrsqrt.f32 %v4915_v24 }
0x162a   : > { %v6959_v56 = vpop.eup %6958 }
0x162b   : > { %v4918_v10 = vmul.f32 %v6959_v56, %v8293_v2  ;;  %v4919_v49 = vmul.f32 %v6959_v56, %v8295_v52 }
0x162c   : > { %v6961_v40 = vpop.eup %6960 }
0x162d   : > { %v4933_v46 = vmul.f32 %v4926_v3, %v4918_v10  ;;  %v4934_v58 = vmul.f32 %v4930_v20, %v4919_v49  ;;  %v4920_v53 = vmul.f32 %v6961_v40, %v8297_v32  ;;  %v4921_v60 = vmul.f32 %v6961_v40, %v8299_v38 }
0x162f   : > { %v4935_v51 = vmul.f32 %v4926_v3, %v4920_v53  ;;  %v4936_v55 = vmul.f32 %v4930_v20, %v4921_v60  ;;  %v4948_v23 = vadd.f32 %v4941_v4, %v4933_v46  ;;  %v4949_v61 = vadd.f32 %v4945_v57, %v4934_v58 }
0x1631   : > { %v4950_v63 = vadd.f32 %v4941_v4, %v4935_v51  ;;  %v4951_v0 = vadd.f32 %v4945_v57, %v4936_v55 }
0x1633   : > { %v4959_v59 = vadd.f32 %v4951_v0, %v4949_v61  ;;  %v4952_v36 = vadd.f32 %v4950_v63, %v4948_v23 }
0x1635   : > { %v4960_v1 = vrot.slane %v4959_v59, 4  ;;  %v4953_v2 = vrot.slane %v4952_v36, 4 }
0x1637   : > { %v4961_v52 = vadd.f32 %v4960_v1, %v4959_v59  ;;  %v4954_v62 = vadd.f32 %v4953_v2, %v4952_v36 }
0x1639   : > { %v4962_v39 = vrot.slane %v4961_v52, 2  ;;  %v4955_v5 = vrot.slane %v4954_v62, 2 }
0x163b   : > { %v4963_v7 = vadd.f32 %v4962_v39, %v4961_v52  ;;  %v4956_v8 = vadd.f32 %v4955_v5, %v4954_v62 }
0x163d   : > { %v4964_v11 = vrot.slane %v4963_v7, 1  ;;  %v4957_v32 = vrot.slane %v4956_v8, 1 }
0x163f   : > { %v4965_v12 = vadd.f32 %v4964_v11, %v4963_v7  ;;  %v4958_v38 = vadd.f32 %v4957_v32, %v4956_v8 }
0x1641   : > { %v4967_v13 = vmul.f32 0.0625, %v4965_v12  ;;  %v4966_v14 = vmul.f32 0.0625, %v4958_v38 }
0x1643   : > { %v4969_v15 = vpack.c.bf16 %v4967_v13, %v4967_v13  ;;  %v4968_v16 = vpack.c.bf16 %v4966_v14, %v4966_v14 }
0x1645   : > { %5206 = vmatprep.mubr.bf16.mxu0 %v4969_v15 }
0x1646   : > { %5207 = vmatmul.mubr.bf16.vlgmr.msra.gmra.mrb[32].mxu0 %v4968_v16 }
0x1719   : > { %v5208_v25 = vpop.f32.mrb[32].mxu0 }
0x171a   : > { %v5209_v26 = vadd.f32 %v5208_v25, %v5167_v19  ;;  %v5210_v27 = vpop.f32.mrb[33].mxu0 }
0x171b   : > { %v5211_v37 = vadd.f32 %v5210_v27, %v5171_v9  ;;  %v5212_v29 = vpop.f32.mrb[34].mxu0 }
0x171c   : > { %v5213_v30 = vpop.f32.mrb[35].mxu0 }
0x171d   : > { %v5217_v31 = vcombine.low %v5209_v26, %v5211_v37 }
0x171f   : > { %v5224_v41 = vrot.slane %v5217_v31, %v5223_v28 }
0x1721   : > { %v5231_v48 = vrot.slane %v5224_v41, %v5223_v28 }
0x1723   : > { %5237 = vst.msk [vmem:[%s910_s9] sm:$0x3] %vm5235_vm8, %v5231_v48 }
0x1724 PF: > { %s8428_s5 = sld [smem:[#allocation34_spill]] }
0x172a   : > { %s41_s4 = sadd.s32 1, %s8428_s5  }
0x172b   : > { %p38_p2 = scmp.ge.s32.totalorder %s41_s4, 4  }
0x172d   :  { %40 = sbr.rel (!%p38_p2) target bundleno = 26 (0x1a), region = 203 }
0x1734   :  { %5257 = vsyncpa [#allocation4], 1 }
0x1735   :  { %5259 = vsyncpa [#allocation4 + $0x1], 1 }
0x1736   :  { %5260 = vsyncpa [#allocation6], 1 }
0x1737   :  { %5261 = vsyncpa [#allocation9], 1 }
0x1738   :  { %5262 = vsyncpa [#allocation12], 1 }
0x1739   :  { %5263 = vsyncpa [#allocation15], 1 }
0x173a   :  { %5264 = vsyncpa [#allocation18], 1 }
0x173b   :  { %5265 = vsyncpa [#allocation21], 1 }
0x173c   :  { %5266 = vsyncpa [#allocation24], 1 }

</bundles_post_ra>
